<compile_context>
chip_gen: v5e
topology: v5e:2x2
jax: 0.10.0
libtpu: 0.0.40
codegen_flags: <defaults>
</compile_context>

<pallas_src>
import numpy as np
import jax
import jax.numpy as jnp
from jax import lax
from jax.experimental import pallas as pl
from jax.experimental.pallas import tpu as pltpu

MIN_NORM = 1e-15
MIN_NORM_SQ = MIN_NORM * MIN_NORM      # 1e-30, representable in f32
PROJ_EPS = 4e-3                         # PoincareBall projection eps for float32
ARTANH_EPS = 1e-6                       # f32-safe artanh clip
LANE = 128                              # pad feature / adjacency column axis to a full lane tile


# ---------------------------------------------------------------------------
# In-kernel Poincare-ball math (rsqrt-fused, hoisted per-layer scalars).
# `cv` is the per-curvature scalar tuple (c, sqrt_c, rsqrt_c, maxnorm, maxnorm_sq, c_sq),
# all precomputed host-side and read from SMEM.
# ---------------------------------------------------------------------------
def _sq_norm(x):
    return jnp.sum(x * x, axis=-1, keepdims=True)


def _artanh_exact(x):
    # Exact division on the near-singular 1/(1-x) (correctness review).
    x = jnp.clip(x, -1.0 + ARTANH_EPS, 1.0 - ARTANH_EPS)
    return 0.5 * jnp.log((1.0 + x) / (1.0 - x))


def _k_proj(x, cv):
    _, _, _, maxnorm, maxnorm_sq, _ = cv
    ss = _sq_norm(x)
    inv_n = lax.rsqrt(jnp.maximum(ss, MIN_NORM_SQ))          # single EUP op
    return jnp.where(ss > maxnorm_sq, x * (maxnorm * inv_n), x)


def _k_expmap0(u, cv):
    _, sqrt_c, rsqrt_c, _, _, _ = cv
    ss = jnp.maximum(_sq_norm(u), MIN_NORM_SQ)
    inv_n = lax.rsqrt(ss)
    u_norm = ss * inv_n                                      # == max(||u||, MIN_NORM)
    return jnp.tanh(sqrt_c * u_norm) * u * (inv_n * rsqrt_c)


def _k_logmap0(p, cv):
    _, sqrt_c, rsqrt_c, _, _, _ = cv
    ss = jnp.maximum(_sq_norm(p), MIN_NORM_SQ)
    inv_n = lax.rsqrt(ss)
    p_norm = ss * inv_n
    return _artanh_exact(sqrt_c * p_norm) * p * (inv_n * rsqrt_c)


def _k_mobius_add(x, y, cv):
    c, _, _, _, _, c_sq = cv
    x2 = _sq_norm(x)
    y2 = _sq_norm(y)
    xy = jnp.sum(x * y, axis=-1, keepdims=True)
    num = (1.0 + 2.0 * c * xy + c * y2) * x + (1.0 - c * x2) * y
    denom = 1.0 + 2.0 * c * xy + c_sq * x2 * y2
    return num / jnp.maximum(denom, MIN_NORM)                # exact divide (review)


def _k_mobius_matvec_tanh(x, wt, cv):
    _, sqrt_c, rsqrt_c, _, _, _ = cv
    ss_x = jnp.maximum(_sq_norm(x), MIN_NORM_SQ)
    inv_x = lax.rsqrt(ss_x)
    x_norm = ss_x * inv_x
    mx = jnp.dot(x, wt, preferred_element_type=jnp.float32)  # real K=128 MXU pass
    ss_mx = jnp.maximum(_sq_norm(mx), MIN_NORM_SQ)
    inv_mx = lax.rsqrt(ss_mx)
    mx_norm = ss_mx * inv_mx
    res = (jnp.tanh(mx_norm * inv_x * _artanh_exact(sqrt_c * x_norm))
           * mx * (inv_mx * rsqrt_c))
    all_zero = jnp.sum(jnp.abs(mx), axis=-1, keepdims=True) == 0.0
    return jnp.where(all_zero, jnp.zeros_like(res), res)


# ---------------------------------------------------------------------------
# Fused Pallas kernel: init map + all layers in one invocation (no grid).
# ---------------------------------------------------------------------------
def _hgcn_fused_kernel(scal_ref, x_ref, adj_ref, wt_ref, b_ref, wl_ref, wr_ref,
                       o_ref, xt_pad_ref):
    num_layers = wt_ref.shape[0]
    adj = adj_ref[...]                                       # (N, LANE), zero-padded cols
    N = adj.shape[0]

    # Zero the (LANE, LANE) staging scratch once; rows >= N stay zero for the whole kernel
    # so `att @ xt_pad` is a native K=128 MXU pass with exact semantics.
    xt_pad_ref[...] = jnp.zeros_like(xt_pad_ref)

    def curv(i):  # hoisted per-curvature scalars, precomputed host-side
        return tuple(scal_ref[6 * i + j] for j in range(6))

    # Initial map to the manifold: proj(expmap0(proj_tan0(x))) (proj_tan0 is identity).
    cv0 = curv(0)
    h = _k_proj(_k_expmap0(x_ref[...], cv0), cv0)

    for l in range(num_layers):                              # static unroll (L is tiny)
        cv_in = curv(l)
        cv_out = curv(l + 1)
        att_b = scal_ref[6 * (num_layers + 1) + l]

        # ---- HypLinear: mobius_matvec(W, x) -> proj -> mobius_add(hyp bias) -> proj.
        res = _k_proj(_k_mobius_matvec_tanh(h, wt_ref[l], cv_in), cv_in)
        hyp_bias = _k_proj(_k_expmap0(b_ref[l], cv_in), cv_in)       # (1, LANE), once/layer
        res = _k_proj(_k_mobius_add(res, hyp_bias, cv_in), cv_in)

        # ---- HypAgg: dense attention in the tangent space at the origin (lane-dense).
        x_t = _k_logmap0(res, cv_in)                                 # (N, LANE)
        xt_pad_ref[0:N, :] = x_t                                     # stage into (LANE, LANE)
        xt_full = xt_pad_ref[...]
        # left[i] = <x_t[i], wl>: VPU broadcast-multiply + lane reduce.
        left = jnp.sum(x_t * wl_ref[l], axis=-1, keepdims=True)      # (N, 1)
        # right[j] = <x_t[j], wr>: one real K=128 MXU pass, lane-dense (1, LANE) output.
        right = lax.dot_general(wr_ref[l], xt_full, (((1,), (1,)), ((), ())),
                                preferred_element_type=jnp.float32)  # (1, LANE)
        att = jax.nn.sigmoid(left + right + att_b) * adj             # (N, LANE), pad masked
        support = jnp.dot(att, xt_full, preferred_element_type=jnp.float32)  # K=128 MXU
        hh = _k_proj(_k_expmap0(support, cv_in), cv_in)

        # ---- HypAct (tanh in tangent space), re-map to the output curvature.
        xt_act = jnp.tanh(_k_logmap0(hh, cv_in))
        h = _k_proj(_k_expmap0(xt_act, cv_out), cv_out)

    o_ref[...] = h                                           # lane-dense (N, 128) store


def _pad2(a, rows, cols):
    out = jnp.zeros((rows, cols), jnp.float32)
    return out.at[:a.shape[0], :a.shape[1]].set(a)


def hgcn_forward(x, adj, layer_params, curvatures):
    """Full HGCN.forward (encode_graph=True path, no edge_attr), single fused kernel."""
    N, _ = x.shape
    L = len(layer_params)
    dout_last = layer_params[-1]["wt"].shape[1]

    # Zero-pad feature axis (and adjacency columns) to 128 lanes; padding is exact.
    x_p = _pad2(x, N, LANE)
    adj_p = _pad2(adj, N, LANE)
    wt_p = jnp.stack([_pad2(p["wt"], LANE, LANE) for p in layer_params])     # (L,128,128)
    b_p = jnp.stack([_pad2(p["b"], 1, LANE) for p in layer_params])          # (L,1,128)
    wl_p = jnp.stack([_pad2(p["wl"].T, 1, LANE) for p in layer_params])      # (L,1,128)
    wr_p = jnp.stack([_pad2(p["wr"].T, 1, LANE) for p in layer_params])      # (L,1,128)

    # Hoist every per-curvature scalar derivation to the wrapper (no in-kernel scalar
    # sqrt/divide, no repeated broadcasts): (c, sqrt_c, 1/sqrt_c, maxnorm, maxnorm^2, c^2).
    cs = jnp.asarray(list(curvatures), jnp.float32)                          # (L+1,)
    sqrt_c = jnp.sqrt(cs)
    rsqrt_c = 1.0 / sqrt_c
    maxnorm = (1.0 - PROJ_EPS) * rsqrt_c
    scal_tab = jnp.stack([cs, sqrt_c, rsqrt_c, maxnorm, maxnorm * maxnorm, cs * cs],
                         axis=1).reshape(-1)                                 # (6*(L+1),)
    att_bs = jnp.asarray([p["att_b"] for p in layer_params], jnp.float32)    # (L,)
    scal = jnp.concatenate([scal_tab, att_bs])                               # (6*(L+1)+L,)

    vmem = pl.BlockSpec(memory_space=pltpu.MemorySpace.VMEM)
    out = pl.pallas_call(
        _hgcn_fused_kernel,
        out_shape=jax.ShapeDtypeStruct((N, LANE), jnp.float32),
        in_specs=[
            pl.BlockSpec(memory_space=pltpu.MemorySpace.SMEM),   # packed scalars
            vmem,   # x (padded)
            vmem,   # adjacency, zero-padded to (N, 128)
            vmem,   # stacked W^T (padded)
            vmem,   # stacked bias (padded)
            vmem,   # attention w_left rows
            vmem,   # attention w_right rows
        ],
        out_specs=vmem,
        scratch_shapes=[pltpu.VMEM((LANE, LANE), jnp.float32)],  # zero-padded x_t staging
    )(scal, x_p, adj_p, wt_p, b_p, wl_p, wr_p)
    return out[:, :dout_last]


# ---------------------------------------------------------------------------
# Pure-JAX reference (exact sqrt/divisions, unpadded, (N,N) attention).
# ---------------------------------------------------------------------------
def _ref_norm(x):
    return jnp.maximum(jnp.sqrt(jnp.sum(x * x, axis=-1, keepdims=True)), MIN_NORM)


def _ref_artanh(x):
    x = jnp.clip(x, -1.0 + ARTANH_EPS, 1.0 - ARTANH_EPS)
    return 0.5 * jnp.log((1.0 + x) / (1.0 - x))


def _ref_proj(x, c):
    norm = _ref_norm(x)
    maxnorm = (1.0 - PROJ_EPS) / jnp.sqrt(c)
    return jnp.where(norm > maxnorm, x * maxnorm / norm, x)


def _ref_expmap0(u, c):
    sqrt_c = jnp.sqrt(c)
    u_norm = _ref_norm(u)
    return jnp.tanh(sqrt_c * u_norm) * u / (sqrt_c * u_norm)


def _ref_logmap0(p, c):
    sqrt_c = jnp.sqrt(c)
    p_norm = _ref_norm(p)
    return _ref_artanh(sqrt_c * p_norm) * p / (sqrt_c * p_norm)


def _ref_mobius_add(x, y, c):
    x2 = jnp.sum(x * x, axis=-1, keepdims=True)
    y2 = jnp.sum(y * y, axis=-1, keepdims=True)
    xy = jnp.sum(x * y, axis=-1, keepdims=True)
    num = (1.0 + 2.0 * c * xy + c * y2) * x + (1.0 - c * x2) * y
    denom = 1.0 + 2.0 * c * xy + c * c * x2 * y2
    return num / jnp.maximum(denom, MIN_NORM)


def _ref_layer(x, adj, wt, b, wl_row, wr_row, att_b, c_in, c_out):
    sqrt_c = jnp.sqrt(c_in)
    x_norm = _ref_norm(x)
    mx = jnp.dot(x, wt, preferred_element_type=jnp.float32)
    mx_norm = _ref_norm(mx)
    res = jnp.tanh(mx_norm / x_norm * _ref_artanh(sqrt_c * x_norm)) * mx / (mx_norm * sqrt_c)
    all_zero = jnp.sum(jnp.abs(mx), axis=-1, keepdims=True) == 0.0
    res = jnp.where(all_zero, jnp.zeros_like(res), res)
    res = _ref_proj(res, c_in)
    hyp_bias = _ref_proj(_ref_expmap0(b, c_in), c_in)
    res = _ref_proj(_ref_mobius_add(res, hyp_bias, c_in), c_in)

    x_t = _ref_logmap0(res, c_in)
    left = jnp.sum(x_t * wl_row, axis=-1, keepdims=True)                       # (N, 1)
    right = jnp.sum(x_t * wr_row, axis=-1, keepdims=True).T                    # (1, N)
    att = jax.nn.sigmoid(left + right + att_b) * adj
    support = jnp.dot(att, x_t, preferred_element_type=jnp.float32)
    h = _ref_proj(_ref_expmap0(support, c_in), c_in)

    xt = jnp.tanh(_ref_logmap0(h, c_in))
    return _ref_proj(_ref_expmap0(xt, c_out), c_out)


def hgcn_forward_ref(x, adj, layer_params, curvatures):
    h = _ref_proj(_ref_expmap0(x, jnp.float32(curvatures[0])), jnp.float32(curvatures[0]))
    for i, p in enumerate(layer_params):
        h = _ref_layer(h, adj, p["wt"], p["b"], p["wl"].T, p["wr"].T,
                       jnp.float32(p["att_b"]),
                       jnp.float32(curvatures[i]), jnp.float32(curvatures[i + 1]))
    return h


# ---------------------------------------------------------------------------
# Deterministic parameter / input construction and run
# ---------------------------------------------------------------------------
if __name__ == "__main__":
    # HGCN.__init__ defaults: input_dim=10, hidden_dim=16, num_layers=2
    # -> dims = [10, 16, 16], acts = [tanh, tanh], 3 curvatures initialized to 1.0.
    input_dim, hidden_dim, num_layers = 10, 16, 2
    dims = [input_dim] + [hidden_dim] * (num_layers - 1) + [hidden_dim]
    curvatures = [1.0] * (num_layers + 1)

    N = 16  # number of graph nodes

    key = jax.random.PRNGKey(0)
    k_x, key = jax.random.split(key)
    x = 0.1 * jax.random.normal(k_x, (N, input_dim), jnp.float32)
    # Edge cases (per review): one exactly-zero input row and one row that maps near the
    # Poincare-ball boundary (tanh saturation + proj clamp path).
    x = x.at[0].set(0.0)
    x = x.at[1].set(jnp.full((input_dim,), 5.0, jnp.float32))

    # Deterministic ring graph with self loops, dense float adjacency.
    A = np.zeros((N, N), np.float32)
    idx = np.arange(N)
    A[idx, idx] = 1.0
    A[idx, (idx + 1) % N] = 1.0
    A[idx, (idx - 1) % N] = 1.0
    adj = jnp.asarray(A)

    layer_params = []
    for li in range(len(dims) - 1):
        din, dout = dims[li], dims[li + 1]
        k1, k2, k3, k4, key = jax.random.split(key, 5)
        layer_params.append(dict(
            wt=jax.random.normal(k1, (din, dout), jnp.float32) / np.sqrt(din),  # W^T
            b=0.01 * jax.random.normal(k2, (1, dout), jnp.float32),
            wl=jax.random.normal(k3, (dout, 1), jnp.float32) / np.sqrt(dout),
            wr=jax.random.normal(k4, (dout, 1), jnp.float32) / np.sqrt(dout),
            att_b=0.0,
        ))

    out = jax.block_until_ready(hgcn_forward(x, adj, layer_params, curvatures))
    ref = jax.block_until_ready(hgcn_forward_ref(x, adj, layer_params, curvatures))

    assert out.shape == (N, hidden_dim), out.shape
    assert np.all(np.isfinite(np.asarray(out)))
    assert np.allclose(np.asarray(out), np.asarray(ref), rtol=5e-2, atol=2e-2), (
        float(np.max(np.abs(np.asarray(out) - np.asarray(ref)))))

    print("KERNEL_OK")
</pallas_src>

<mosaic_0001>
module attributes {stable_mosaic.version = 11 : i64} {
  func.func @_hgcn_fused_kernel(%arg0: memref<20xf32, #tpu.memory_space<smem>>, %arg1: memref<16x128xf32, #tpu.memory_space<vmem>>, %arg2: memref<16x128xf32, #tpu.memory_space<vmem>>, %arg3: memref<2x128x128xf32, #tpu.memory_space<vmem>>, %arg4: memref<2x1x128xf32, #tpu.memory_space<vmem>>, %arg5: memref<2x1x128xf32, #tpu.memory_space<vmem>>, %arg6: memref<2x1x128xf32, #tpu.memory_space<vmem>>, %arg7: memref<16x128xf32, #tpu.memory_space<vmem>>, %arg8: memref<128x128xf32, #tpu.memory_space<vmem>>) attributes {dimension_semantics = [], scalar_prefetch = 0 : i64, scratch_operands = 1 : i64, tpu.core_type = #tpu.core_type<tc>} {
    %c0 = arith.constant 0 : index
    %c0_0 = arith.constant 0 : index
    %0 = vector.load %arg2[%c0, %c0_0] : memref<16x128xf32, #tpu.memory_space<vmem>>, vector<16x128xf32>
    %cst = arith.constant 0.000000e+00 : f32
    %1 = vector.broadcast %cst : f32 to vector<128x128xf32>
    %c0_1 = arith.constant 0 : index
    %c0_2 = arith.constant 0 : index
    %2 = vector.load %arg8[%c0_1, %c0_2] : memref<128x128xf32, #tpu.memory_space<vmem>>, vector<128x128xf32>
    tpu.vector_store %arg8[%c0_1, %c0_2], %1 {strides = array<i32>} : memref<128x128xf32, #tpu.memory_space<vmem>>, vector<128x128xf32>,
    %c1 = arith.constant 1 : index
    %3 = memref.load %arg0[%c1] : memref<20xf32, #tpu.memory_space<smem>>
    %c2 = arith.constant 2 : index
    %4 = memref.load %arg0[%c2] : memref<20xf32, #tpu.memory_space<smem>>
    %c3 = arith.constant 3 : index
    %5 = memref.load %arg0[%c3] : memref<20xf32, #tpu.memory_space<smem>>
    %c4 = arith.constant 4 : index
    %6 = memref.load %arg0[%c4] : memref<20xf32, #tpu.memory_space<smem>>
    %c0_3 = arith.constant 0 : index
    %c0_4 = arith.constant 0 : index
    %7 = vector.load %arg1[%c0_3, %c0_4] : memref<16x128xf32, #tpu.memory_space<vmem>>, vector<16x128xf32>
    %8 = arith.mulf %7, %7 : vector<16x128xf32>
    %cst_5 = arith.constant dense<0.000000e+00> : vector<16xf32>
    %9 = vector.multi_reduction <add>, %8, %cst_5 [1] : vector<16x128xf32> to vector<16xf32>
    %10 = vector.shape_cast %9 : vector<16xf32> to vector<16x1xf32>
    %cst_6 = arith.constant 1.000000e-30 : f32
    %11 = vector.broadcast %cst_6 : f32 to vector<16x1xf32>
    %12 = arith.maximumf %10, %11 : vector<16x1xf32>
    %13 = math.rsqrt %12 : vector<16x1xf32>
    %14 = arith.mulf %12, %13 : vector<16x1xf32>
    %15 = vector.broadcast %3 : f32 to vector<16x1xf32>
    %16 = arith.mulf %15, %14 : vector<16x1xf32>
    %17 = math.tanh %16 : vector<16x1xf32>
    %18 = vector.broadcast %17 : vector<16x1xf32> to vector<16x128xf32>
    %19 = arith.mulf %18, %7 : vector<16x128xf32>
    %20 = vector.broadcast %4 : f32 to vector<16x1xf32>
    %21 = arith.mulf %13, %20 : vector<16x1xf32>
    %22 = vector.broadcast %21 : vector<16x1xf32> to vector<16x128xf32>
    %23 = arith.mulf %19, %22 : vector<16x128xf32>
    %24 = arith.mulf %23, %23 : vector<16x128xf32>
    %cst_7 = arith.constant dense<0.000000e+00> : vector<16xf32>
    %25 = vector.multi_reduction <add>, %24, %cst_7 [1] : vector<16x128xf32> to vector<16xf32>
    %26 = vector.shape_cast %25 : vector<16xf32> to vector<16x1xf32>
    %cst_8 = arith.constant 1.000000e-30 : f32
    %27 = vector.broadcast %cst_8 : f32 to vector<16x1xf32>
    %28 = arith.maximumf %26, %27 : vector<16x1xf32>
    %29 = math.rsqrt %28 : vector<16x1xf32>
    %30 = vector.broadcast %6 : f32 to vector<16x1xf32>
    %31 = arith.cmpf ogt, %26, %30 : vector<16x1xf32>
    %32 = vector.broadcast %5 : f32 to vector<16x1xf32>
    %33 = arith.mulf %32, %29 : vector<16x1xf32>
    %34 = vector.broadcast %33 : vector<16x1xf32> to vector<16x128xf32>
    %35 = arith.mulf %23, %34 : vector<16x128xf32>
    %36 = vector.shape_cast %31 : vector<16x1xi1> to vector<16x1xi1>
    %37 = vector.broadcast %36 : vector<16x1xi1> to vector<16x128xi1>
    %38 = arith.select %37, %35, %23 : vector<16x128xi1>, vector<16x128xf32>
    %c0_9 = arith.constant 0 : index
    %39 = memref.load %arg0[%c0_9] : memref<20xf32, #tpu.memory_space<smem>>
    %c1_10 = arith.constant 1 : index
    %40 = memref.load %arg0[%c1_10] : memref<20xf32, #tpu.memory_space<smem>>
    %c2_11 = arith.constant 2 : index
    %41 = memref.load %arg0[%c2_11] : memref<20xf32, #tpu.memory_space<smem>>
    %c3_12 = arith.constant 3 : index
    %42 = memref.load %arg0[%c3_12] : memref<20xf32, #tpu.memory_space<smem>>
    %c4_13 = arith.constant 4 : index
    %43 = memref.load %arg0[%c4_13] : memref<20xf32, #tpu.memory_space<smem>>
    %c5 = arith.constant 5 : index
    %44 = memref.load %arg0[%c5] : memref<20xf32, #tpu.memory_space<smem>>
    %c7 = arith.constant 7 : index
    %45 = memref.load %arg0[%c7] : memref<20xf32, #tpu.memory_space<smem>>
    %c8 = arith.constant 8 : index
    %46 = memref.load %arg0[%c8] : memref<20xf32, #tpu.memory_space<smem>>
    %c9 = arith.constant 9 : index
    %47 = memref.load %arg0[%c9] : memref<20xf32, #tpu.memory_space<smem>>
    %c10 = arith.constant 10 : index
    %48 = memref.load %arg0[%c10] : memref<20xf32, #tpu.memory_space<smem>>
    %c18 = arith.constant 18 : index
    %49 = memref.load %arg0[%c18] : memref<20xf32, #tpu.memory_space<smem>>
    %c0_14 = arith.constant 0 : index
    %c0_15 = arith.constant 0 : index
    %c0_16 = arith.constant 0 : index
    %50 = vector.load %arg3[%c0_14, %c0_15, %c0_16] : memref<2x128x128xf32, #tpu.memory_space<vmem>>, vector<1x128x128xf32>
    %51 = vector.shape_cast %50 : vector<1x128x128xf32> to vector<128x128xf32>
    %52 = arith.mulf %38, %38 : vector<16x128xf32>
    %cst_17 = arith.constant dense<0.000000e+00> : vector<16xf32>
    %53 = vector.multi_reduction <add>, %52, %cst_17 [1] : vector<16x128xf32> to vector<16xf32>
    %54 = vector.shape_cast %53 : vector<16xf32> to vector<16x1xf32>
    %cst_18 = arith.constant 1.000000e-30 : f32
    %55 = vector.broadcast %cst_18 : f32 to vector<16x1xf32>
    %56 = arith.maximumf %54, %55 : vector<16x1xf32>
    %57 = math.rsqrt %56 : vector<16x1xf32>
    %58 = arith.mulf %56, %57 : vector<16x1xf32>
    %cst_19 = arith.constant dense<0.000000e+00> : vector<16x128xf32>
    %59 = tpu.matmul %38, %51, %cst_19 {dimension_numbers = #tpu.dot_dimension_numbers<[1], [0], [0], [1], [0, 0, 1, 1], [], []>} : vector<16x128xf32>, vector<128x128xf32>, vector<16x128xf32> -> vector<16x128xf32>
    %60 = arith.mulf %59, %59 : vector<16x128xf32>
    %cst_20 = arith.constant dense<0.000000e+00> : vector<16xf32>
    %61 = vector.multi_reduction <add>, %60, %cst_20 [1] : vector<16x128xf32> to vector<16xf32>
    %62 = vector.shape_cast %61 : vector<16xf32> to vector<16x1xf32>
    %cst_21 = arith.constant 1.000000e-30 : f32
    %63 = vector.broadcast %cst_21 : f32 to vector<16x1xf32>
    %64 = arith.maximumf %62, %63 : vector<16x1xf32>
    %65 = math.rsqrt %64 : vector<16x1xf32>
    %66 = arith.mulf %64, %65 : vector<16x1xf32>
    %67 = arith.mulf %66, %57 : vector<16x1xf32>
    %68 = vector.broadcast %40 : f32 to vector<16x1xf32>
    %69 = arith.mulf %68, %58 : vector<16x1xf32>
    %cst_22 = arith.constant -0.999998986 : f32
    %cst_23 = arith.constant 0.999998986 : f32
    %70 = vector.broadcast %cst_22 : f32 to vector<16x1xf32>
    %71 = arith.maximumf %70, %69 : vector<16x1xf32>
    %72 = vector.broadcast %cst_23 : f32 to vector<16x1xf32>
    %73 = arith.minimumf %72, %71 : vector<16x1xf32>
    %cst_24 = arith.constant 1.000000e+00 : f32
    %74 = vector.broadcast %cst_24 : f32 to vector<16x1xf32>
    %75 = arith.addf %74, %73 : vector<16x1xf32>
    %cst_25 = arith.constant 1.000000e+00 : f32
    %76 = vector.broadcast %cst_25 : f32 to vector<16x1xf32>
    %77 = arith.subf %76, %73 : vector<16x1xf32>
    %78 = arith.divf %75, %77 : vector<16x1xf32>
    %79 = math.log %78 : vector<16x1xf32>
    %cst_26 = arith.constant 5.000000e-01 : f32
    %80 = vector.broadcast %cst_26 : f32 to vector<16x1xf32>
    %81 = arith.mulf %80, %79 : vector<16x1xf32>
    %82 = arith.mulf %67, %81 : vector<16x1xf32>
    %83 = math.tanh %82 : vector<16x1xf32>
    %84 = vector.broadcast %83 : vector<16x1xf32> to vector<16x128xf32>
    %85 = arith.mulf %84, %59 : vector<16x128xf32>
    %86 = vector.broadcast %41 : f32 to vector<16x1xf32>
    %87 = arith.mulf %65, %86 : vector<16x1xf32>
    %88 = vector.broadcast %87 : vector<16x1xf32> to vector<16x128xf32>
    %89 = arith.mulf %85, %88 : vector<16x128xf32>
    %90 = math.absf %59 : vector<16x128xf32>
    %cst_27 = arith.constant dense<0.000000e+00> : vector<16xf32>
    %91 = vector.multi_reduction <add>, %90, %cst_27 [1] : vector<16x128xf32> to vector<16xf32>
    %92 = vector.shape_cast %91 : vector<16xf32> to vector<16x1xf32>
    %cst_28 = arith.constant 0.000000e+00 : f32
    %93 = vector.broadcast %cst_28 : f32 to vector<16x1xf32>
    %94 = arith.cmpf oeq, %92, %93 : vector<16x1xf32>
    %cst_29 = arith.constant 0.000000e+00 : f32
    %95 = vector.broadcast %cst_29 : f32 to vector<16x128xf32>
    %96 = vector.shape_cast %94 : vector<16x1xi1> to vector<16x1xi1>
    %97 = vector.broadcast %96 : vector<16x1xi1> to vector<16x128xi1>
    %98 = arith.select %97, %95, %89 : vector<16x128xi1>, vector<16x128xf32>
    %99 = arith.mulf %98, %98 : vector<16x128xf32>
    %cst_30 = arith.constant dense<0.000000e+00> : vector<16xf32>
    %100 = vector.multi_reduction <add>, %99, %cst_30 [1] : vector<16x128xf32> to vector<16xf32>
    %101 = vector.shape_cast %100 : vector<16xf32> to vector<16x1xf32>
    %cst_31 = arith.constant 1.000000e-30 : f32
    %102 = vector.broadcast %cst_31 : f32 to vector<16x1xf32>
    %103 = arith.maximumf %101, %102 : vector<16x1xf32>
    %104 = math.rsqrt %103 : vector<16x1xf32>
    %105 = vector.broadcast %43 : f32 to vector<16x1xf32>
    %106 = arith.cmpf ogt, %101, %105 : vector<16x1xf32>
    %107 = vector.broadcast %42 : f32 to vector<16x1xf32>
    %108 = arith.mulf %107, %104 : vector<16x1xf32>
    %109 = vector.broadcast %108 : vector<16x1xf32> to vector<16x128xf32>
    %110 = arith.mulf %98, %109 : vector<16x128xf32>
    %111 = vector.shape_cast %106 : vector<16x1xi1> to vector<16x1xi1>
    %112 = vector.broadcast %111 : vector<16x1xi1> to vector<16x128xi1>
    %113 = arith.select %112, %110, %98 : vector<16x128xi1>, vector<16x128xf32>
    %c0_32 = arith.constant 0 : index
    %c0_33 = arith.constant 0 : index
    %c0_34 = arith.constant 0 : index
    %114 = vector.load %arg4[%c0_32, %c0_33, %c0_34] : memref<2x1x128xf32, #tpu.memory_space<vmem>>, vector<1x1x128xf32>
    %115 = vector.shape_cast %114 : vector<1x1x128xf32> to vector<1x128xf32>
    %116 = arith.mulf %115, %115 : vector<1x128xf32>
    %cst_35 = arith.constant dense<0.000000e+00> : vector<1xf32>
    %117 = vector.multi_reduction <add>, %116, %cst_35 [1] : vector<1x128xf32> to vector<1xf32>
    %118 = vector.shape_cast %117 : vector<1xf32> to vector<1x1xf32>
    %cst_36 = arith.constant 1.000000e-30 : f32
    %119 = vector.broadcast %cst_36 : f32 to vector<1x1xf32>
    %120 = arith.maximumf %118, %119 : vector<1x1xf32>
    %121 = math.rsqrt %120 : vector<1x1xf32>
    %122 = arith.mulf %120, %121 : vector<1x1xf32>
    %123 = vector.broadcast %40 : f32 to vector<1x1xf32>
    %124 = arith.mulf %123, %122 : vector<1x1xf32>
    %125 = math.tanh %124 : vector<1x1xf32>
    %126 = vector.broadcast %125 : vector<1x1xf32> to vector<1x128xf32>
    %127 = arith.mulf %126, %115 : vector<1x128xf32>
    %128 = vector.broadcast %41 : f32 to vector<1x1xf32>
    %129 = arith.mulf %121, %128 : vector<1x1xf32>
    %130 = vector.broadcast %129 : vector<1x1xf32> to vector<1x128xf32>
    %131 = arith.mulf %127, %130 : vector<1x128xf32>
    %132 = arith.mulf %131, %131 : vector<1x128xf32>
    %cst_37 = arith.constant dense<0.000000e+00> : vector<1xf32>
    %133 = vector.multi_reduction <add>, %132, %cst_37 [1] : vector<1x128xf32> to vector<1xf32>
    %134 = vector.shape_cast %133 : vector<1xf32> to vector<1x1xf32>
    %cst_38 = arith.constant 1.000000e-30 : f32
    %135 = vector.broadcast %cst_38 : f32 to vector<1x1xf32>
    %136 = arith.maximumf %134, %135 : vector<1x1xf32>
    %137 = math.rsqrt %136 : vector<1x1xf32>
    %138 = vector.broadcast %43 : f32 to vector<1x1xf32>
    %139 = arith.cmpf ogt, %134, %138 : vector<1x1xf32>
    %140 = vector.broadcast %42 : f32 to vector<1x1xf32>
    %141 = arith.mulf %140, %137 : vector<1x1xf32>
    %142 = vector.broadcast %141 : vector<1x1xf32> to vector<1x128xf32>
    %143 = arith.mulf %131, %142 : vector<1x128xf32>
    %144 = vector.shape_cast %139 : vector<1x1xi1> to vector<1x1xi1>
    %145 = vector.broadcast %144 : vector<1x1xi1> to vector<1x128xi1>
    %146 = arith.select %145, %143, %131 : vector<1x128xi1>, vector<1x128xf32>
    %147 = arith.mulf %113, %113 : vector<16x128xf32>
    %cst_39 = arith.constant dense<0.000000e+00> : vector<16xf32>
    %148 = vector.multi_reduction <add>, %147, %cst_39 [1] : vector<16x128xf32> to vector<16xf32>
    %149 = vector.shape_cast %148 : vector<16xf32> to vector<16x1xf32>
    %150 = arith.mulf %146, %146 : vector<1x128xf32>
    %cst_40 = arith.constant dense<0.000000e+00> : vector<1xf32>
    %151 = vector.multi_reduction <add>, %150, %cst_40 [1] : vector<1x128xf32> to vector<1xf32>
    %152 = vector.shape_cast %151 : vector<1xf32> to vector<1x1xf32>
    %153 = vector.broadcast %146 : vector<1x128xf32> to vector<16x128xf32>
    %154 = arith.mulf %113, %153 : vector<16x128xf32>
    %cst_41 = arith.constant dense<0.000000e+00> : vector<16xf32>
    %155 = vector.multi_reduction <add>, %154, %cst_41 [1] : vector<16x128xf32> to vector<16xf32>
    %156 = vector.shape_cast %155 : vector<16xf32> to vector<16x1xf32>
    %cst_42 = arith.constant 2.000000e+00 : f32
    %157 = arith.mulf %cst_42, %39 : f32
    %158 = vector.broadcast %157 : f32 to vector<16x1xf32>
    %159 = arith.mulf %158, %156 : vector<16x1xf32>
    %cst_43 = arith.constant 1.000000e+00 : f32
    %160 = vector.broadcast %cst_43 : f32 to vector<16x1xf32>
    %161 = arith.addf %160, %159 : vector<16x1xf32>
    %162 = vector.broadcast %39 : f32 to vector<1x1xf32>
    %163 = arith.mulf %162, %152 : vector<1x1xf32>
    %164 = vector.broadcast %163 : vector<1x1xf32> to vector<16x1xf32>
    %165 = arith.addf %161, %164 : vector<16x1xf32>
    %166 = vector.broadcast %165 : vector<16x1xf32> to vector<16x128xf32>
    %167 = arith.mulf %166, %113 : vector<16x128xf32>
    %168 = vector.broadcast %39 : f32 to vector<16x1xf32>
    %169 = arith.mulf %168, %149 : vector<16x1xf32>
    %cst_44 = arith.constant 1.000000e+00 : f32
    %170 = vector.broadcast %cst_44 : f32 to vector<16x1xf32>
    %171 = arith.subf %170, %169 : vector<16x1xf32>
    %172 = vector.broadcast %171 : vector<16x1xf32> to vector<16x128xf32>
    %173 = vector.broadcast %146 : vector<1x128xf32> to vector<16x128xf32>
    %174 = arith.mulf %172, %173 : vector<16x128xf32>
    %175 = arith.addf %167, %174 : vector<16x128xf32>
    %cst_45 = arith.constant 2.000000e+00 : f32
    %176 = arith.mulf %cst_45, %39 : f32
    %177 = vector.broadcast %176 : f32 to vector<16x1xf32>
    %178 = arith.mulf %177, %156 : vector<16x1xf32>
    %cst_46 = arith.constant 1.000000e+00 : f32
    %179 = vector.broadcast %cst_46 : f32 to vector<16x1xf32>
    %180 = arith.addf %179, %178 : vector<16x1xf32>
    %181 = vector.broadcast %44 : f32 to vector<16x1xf32>
    %182 = arith.mulf %181, %149 : vector<16x1xf32>
    %183 = vector.broadcast %152 : vector<1x1xf32> to vector<16x1xf32>
    %184 = arith.mulf %182, %183 : vector<16x1xf32>
    %185 = arith.addf %180, %184 : vector<16x1xf32>
    %cst_47 = arith.constant 1.000000e-15 : f32
    %186 = vector.broadcast %cst_47 : f32 to vector<16x1xf32>
    %187 = arith.maximumf %185, %186 : vector<16x1xf32>
    %188 = vector.broadcast %187 : vector<16x1xf32> to vector<16x128xf32>
    %189 = arith.divf %175, %188 : vector<16x128xf32>
    %190 = arith.mulf %189, %189 : vector<16x128xf32>
    %cst_48 = arith.constant dense<0.000000e+00> : vector<16xf32>
    %191 = vector.multi_reduction <add>, %190, %cst_48 [1] : vector<16x128xf32> to vector<16xf32>
    %192 = vector.shape_cast %191 : vector<16xf32> to vector<16x1xf32>
    %cst_49 = arith.constant 1.000000e-30 : f32
    %193 = vector.broadcast %cst_49 : f32 to vector<16x1xf32>
    %194 = arith.maximumf %192, %193 : vector<16x1xf32>
    %195 = math.rsqrt %194 : vector<16x1xf32>
    %196 = vector.broadcast %43 : f32 to vector<16x1xf32>
    %197 = arith.cmpf ogt, %192, %196 : vector<16x1xf32>
    %198 = vector.broadcast %42 : f32 to vector<16x1xf32>
    %199 = arith.mulf %198, %195 : vector<16x1xf32>
    %200 = vector.broadcast %199 : vector<16x1xf32> to vector<16x128xf32>
    %201 = arith.mulf %189, %200 : vector<16x128xf32>
    %202 = vector.shape_cast %197 : vector<16x1xi1> to vector<16x1xi1>
    %203 = vector.broadcast %202 : vector<16x1xi1> to vector<16x128xi1>
    %204 = arith.select %203, %201, %189 : vector<16x128xi1>, vector<16x128xf32>
    %205 = arith.mulf %204, %204 : vector<16x128xf32>
    %cst_50 = arith.constant dense<0.000000e+00> : vector<16xf32>
    %206 = vector.multi_reduction <add>, %205, %cst_50 [1] : vector<16x128xf32> to vector<16xf32>
    %207 = vector.shape_cast %206 : vector<16xf32> to vector<16x1xf32>
    %cst_51 = arith.constant 1.000000e-30 : f32
    %208 = vector.broadcast %cst_51 : f32 to vector<16x1xf32>
    %209 = arith.maximumf %207, %208 : vector<16x1xf32>
    %210 = math.rsqrt %209 : vector<16x1xf32>
    %211 = arith.mulf %209, %210 : vector<16x1xf32>
    %212 = vector.broadcast %40 : f32 to vector<16x1xf32>
    %213 = arith.mulf %212, %211 : vector<16x1xf32>
    %cst_52 = arith.constant -0.999998986 : f32
    %cst_53 = arith.constant 0.999998986 : f32
    %214 = vector.broadcast %cst_52 : f32 to vector<16x1xf32>
    %215 = arith.maximumf %214, %213 : vector<16x1xf32>
    %216 = vector.broadcast %cst_53 : f32 to vector<16x1xf32>
    %217 = arith.minimumf %216, %215 : vector<16x1xf32>
    %cst_54 = arith.constant 1.000000e+00 : f32
    %218 = vector.broadcast %cst_54 : f32 to vector<16x1xf32>
    %219 = arith.addf %218, %217 : vector<16x1xf32>
    %cst_55 = arith.constant 1.000000e+00 : f32
    %220 = vector.broadcast %cst_55 : f32 to vector<16x1xf32>
    %221 = arith.subf %220, %217 : vector<16x1xf32>
    %222 = arith.divf %219, %221 : vector<16x1xf32>
    %223 = math.log %222 : vector<16x1xf32>
    %cst_56 = arith.constant 5.000000e-01 : f32
    %224 = vector.broadcast %cst_56 : f32 to vector<16x1xf32>
    %225 = arith.mulf %224, %223 : vector<16x1xf32>
    %226 = vector.broadcast %225 : vector<16x1xf32> to vector<16x128xf32>
    %227 = arith.mulf %226, %204 : vector<16x128xf32>
    %228 = vector.broadcast %41 : f32 to vector<16x1xf32>
    %229 = arith.mulf %210, %228 : vector<16x1xf32>
    %230 = vector.broadcast %229 : vector<16x1xf32> to vector<16x128xf32>
    %231 = arith.mulf %227, %230 : vector<16x128xf32>
    %c0_57 = arith.constant 0 : index
    %c0_58 = arith.constant 0 : index
    %232 = vector.load %arg8[%c0_57, %c0_58] : memref<128x128xf32, #tpu.memory_space<vmem>>, vector<16x128xf32>
    tpu.vector_store %arg8[%c0_57, %c0_58], %231 {strides = array<i32>} : memref<128x128xf32, #tpu.memory_space<vmem>>, vector<16x128xf32>,
    %c0_59 = arith.constant 0 : index
    %c0_60 = arith.constant 0 : index
    %233 = vector.load %arg8[%c0_59, %c0_60] : memref<128x128xf32, #tpu.memory_space<vmem>>, vector<128x128xf32>
    %c0_61 = arith.constant 0 : index
    %c0_62 = arith.constant 0 : index
    %c0_63 = arith.constant 0 : index
    %234 = vector.load %arg5[%c0_61, %c0_62, %c0_63] : memref<2x1x128xf32, #tpu.memory_space<vmem>>, vector<1x1x128xf32>
    %235 = vector.shape_cast %234 : vector<1x1x128xf32> to vector<1x128xf32>
    %236 = vector.broadcast %235 : vector<1x128xf32> to vector<16x128xf32>
    %237 = arith.mulf %231, %236 : vector<16x128xf32>
    %cst_64 = arith.constant dense<0.000000e+00> : vector<16xf32>
    %238 = vector.multi_reduction <add>, %237, %cst_64 [1] : vector<16x128xf32> to vector<16xf32>
    %239 = vector.shape_cast %238 : vector<16xf32> to vector<16x1xf32>
    %c0_65 = arith.constant 0 : index
    %c0_66 = arith.constant 0 : index
    %c0_67 = arith.constant 0 : index
    %240 = vector.load %arg6[%c0_65, %c0_66, %c0_67] : memref<2x1x128xf32, #tpu.memory_space<vmem>>, vector<1x1x128xf32>
    %241 = vector.shape_cast %240 : vector<1x1x128xf32> to vector<1x128xf32>
    %cst_68 = arith.constant dense<0.000000e+00> : vector<1x128xf32>
    %242 = tpu.matmul %241, %233, %cst_68 {dimension_numbers = #tpu.dot_dimension_numbers<[1], [1], [0], [0], [0, 0, 1, 0], [], []>} : vector<1x128xf32>, vector<128x128xf32>, vector<1x128xf32> -> vector<1x128xf32>
    %243 = vector.broadcast %239 : vector<16x1xf32> to vector<16x128xf32>
    %244 = vector.broadcast %242 : vector<1x128xf32> to vector<16x128xf32>
    %245 = arith.addf %243, %244 : vector<16x128xf32>
    %246 = vector.broadcast %49 : f32 to vector<16x128xf32>
    %247 = arith.addf %245, %246 : vector<16x128xf32>
    %248 = arith.negf %247 : vector<16x128xf32>
    %249 = math.exp %248 : vector<16x128xf32>
    %cst_69 = arith.constant 1.000000e+00 : f32
    %250 = vector.broadcast %cst_69 : f32 to vector<16x128xf32>
    %251 = arith.addf %250, %249 : vector<16x128xf32>
    %252 = arith.divf %250, %251 : vector<16x128xf32>
    %253 = arith.mulf %252, %0 : vector<16x128xf32>
    %cst_70 = arith.constant dense<0.000000e+00> : vector<16x128xf32>
    %254 = tpu.matmul %253, %233, %cst_70 {dimension_numbers = #tpu.dot_dimension_numbers<[1], [0], [0], [1], [0, 0, 1, 1], [], []>} : vector<16x128xf32>, vector<128x128xf32>, vector<16x128xf32> -> vector<16x128xf32>
    %255 = arith.mulf %254, %254 : vector<16x128xf32>
    %cst_71 = arith.constant dense<0.000000e+00> : vector<16xf32>
    %256 = vector.multi_reduction <add>, %255, %cst_71 [1] : vector<16x128xf32> to vector<16xf32>
    %257 = vector.shape_cast %256 : vector<16xf32> to vector<16x1xf32>
    %cst_72 = arith.constant 1.000000e-30 : f32
    %258 = vector.broadcast %cst_72 : f32 to vector<16x1xf32>
    %259 = arith.maximumf %257, %258 : vector<16x1xf32>
    %260 = math.rsqrt %259 : vector<16x1xf32>
    %261 = arith.mulf %259, %260 : vector<16x1xf32>
    %262 = vector.broadcast %40 : f32 to vector<16x1xf32>
    %263 = arith.mulf %262, %261 : vector<16x1xf32>
    %264 = math.tanh %263 : vector<16x1xf32>
    %265 = vector.broadcast %264 : vector<16x1xf32> to vector<16x128xf32>
    %266 = arith.mulf %265, %254 : vector<16x128xf32>
    %267 = vector.broadcast %41 : f32 to vector<16x1xf32>
    %268 = arith.mulf %260, %267 : vector<16x1xf32>
    %269 = vector.broadcast %268 : vector<16x1xf32> to vector<16x128xf32>
    %270 = arith.mulf %266, %269 : vector<16x128xf32>
    %271 = arith.mulf %270, %270 : vector<16x128xf32>
    %cst_73 = arith.constant dense<0.000000e+00> : vector<16xf32>
    %272 = vector.multi_reduction <add>, %271, %cst_73 [1] : vector<16x128xf32> to vector<16xf32>
    %273 = vector.shape_cast %272 : vector<16xf32> to vector<16x1xf32>
    %cst_74 = arith.constant 1.000000e-30 : f32
    %274 = vector.broadcast %cst_74 : f32 to vector<16x1xf32>
    %275 = arith.maximumf %273, %274 : vector<16x1xf32>
    %276 = math.rsqrt %275 : vector<16x1xf32>
    %277 = vector.broadcast %43 : f32 to vector<16x1xf32>
    %278 = arith.cmpf ogt, %273, %277 : vector<16x1xf32>
    %279 = vector.broadcast %42 : f32 to vector<16x1xf32>
    %280 = arith.mulf %279, %276 : vector<16x1xf32>
    %281 = vector.broadcast %280 : vector<16x1xf32> to vector<16x128xf32>
    %282 = arith.mulf %270, %281 : vector<16x128xf32>
    %283 = vector.shape_cast %278 : vector<16x1xi1> to vector<16x1xi1>
    %284 = vector.broadcast %283 : vector<16x1xi1> to vector<16x128xi1>
    %285 = arith.select %284, %282, %270 : vector<16x128xi1>, vector<16x128xf32>
    %286 = arith.mulf %285, %285 : vector<16x128xf32>
    %cst_75 = arith.constant dense<0.000000e+00> : vector<16xf32>
    %287 = vector.multi_reduction <add>, %286, %cst_75 [1] : vector<16x128xf32> to vector<16xf32>
    %288 = vector.shape_cast %287 : vector<16xf32> to vector<16x1xf32>
    %cst_76 = arith.constant 1.000000e-30 : f32
    %289 = vector.broadcast %cst_76 : f32 to vector<16x1xf32>
    %290 = arith.maximumf %288, %289 : vector<16x1xf32>
    %291 = math.rsqrt %290 : vector<16x1xf32>
    %292 = arith.mulf %290, %291 : vector<16x1xf32>
    %293 = vector.broadcast %40 : f32 to vector<16x1xf32>
    %294 = arith.mulf %293, %292 : vector<16x1xf32>
    %cst_77 = arith.constant -0.999998986 : f32
    %cst_78 = arith.constant 0.999998986 : f32
    %295 = vector.broadcast %cst_77 : f32 to vector<16x1xf32>
    %296 = arith.maximumf %295, %294 : vector<16x1xf32>
    %297 = vector.broadcast %cst_78 : f32 to vector<16x1xf32>
    %298 = arith.minimumf %297, %296 : vector<16x1xf32>
    %cst_79 = arith.constant 1.000000e+00 : f32
    %299 = vector.broadcast %cst_79 : f32 to vector<16x1xf32>
    %300 = arith.addf %299, %298 : vector<16x1xf32>
    %cst_80 = arith.constant 1.000000e+00 : f32
    %301 = vector.broadcast %cst_80 : f32 to vector<16x1xf32>
    %302 = arith.subf %301, %298 : vector<16x1xf32>
    %303 = arith.divf %300, %302 : vector<16x1xf32>
    %304 = math.log %303 : vector<16x1xf32>
    %cst_81 = arith.constant 5.000000e-01 : f32
    %305 = vector.broadcast %cst_81 : f32 to vector<16x1xf32>
    %306 = arith.mulf %305, %304 : vector<16x1xf32>
    %307 = vector.broadcast %306 : vector<16x1xf32> to vector<16x128xf32>
    %308 = arith.mulf %307, %285 : vector<16x128xf32>
    %309 = vector.broadcast %41 : f32 to vector<16x1xf32>
    %310 = arith.mulf %291, %309 : vector<16x1xf32>
    %311 = vector.broadcast %310 : vector<16x1xf32> to vector<16x128xf32>
    %312 = arith.mulf %308, %311 : vector<16x128xf32>
    %313 = math.tanh %312 : vector<16x128xf32>
    %314 = arith.mulf %313, %313 : vector<16x128xf32>
    %cst_82 = arith.constant dense<0.000000e+00> : vector<16xf32>
    %315 = vector.multi_reduction <add>, %314, %cst_82 [1] : vector<16x128xf32> to vector<16xf32>
    %316 = vector.shape_cast %315 : vector<16xf32> to vector<16x1xf32>
    %cst_83 = arith.constant 1.000000e-30 : f32
    %317 = vector.broadcast %cst_83 : f32 to vector<16x1xf32>
    %318 = arith.maximumf %316, %317 : vector<16x1xf32>
    %319 = math.rsqrt %318 : vector<16x1xf32>
    %320 = arith.mulf %318, %319 : vector<16x1xf32>
    %321 = vector.broadcast %45 : f32 to vector<16x1xf32>
    %322 = arith.mulf %321, %320 : vector<16x1xf32>
    %323 = math.tanh %322 : vector<16x1xf32>
    %324 = vector.broadcast %323 : vector<16x1xf32> to vector<16x128xf32>
    %325 = arith.mulf %324, %313 : vector<16x128xf32>
    %326 = vector.broadcast %46 : f32 to vector<16x1xf32>
    %327 = arith.mulf %319, %326 : vector<16x1xf32>
    %328 = vector.broadcast %327 : vector<16x1xf32> to vector<16x128xf32>
    %329 = arith.mulf %325, %328 : vector<16x128xf32>
    %330 = arith.mulf %329, %329 : vector<16x128xf32>
    %cst_84 = arith.constant dense<0.000000e+00> : vector<16xf32>
    %331 = vector.multi_reduction <add>, %330, %cst_84 [1] : vector<16x128xf32> to vector<16xf32>
    %332 = vector.shape_cast %331 : vector<16xf32> to vector<16x1xf32>
    %cst_85 = arith.constant 1.000000e-30 : f32
    %333 = vector.broadcast %cst_85 : f32 to vector<16x1xf32>
    %334 = arith.maximumf %332, %333 : vector<16x1xf32>
    %335 = math.rsqrt %334 : vector<16x1xf32>
    %336 = vector.broadcast %48 : f32 to vector<16x1xf32>
    %337 = arith.cmpf ogt, %332, %336 : vector<16x1xf32>
    %338 = vector.broadcast %47 : f32 to vector<16x1xf32>
    %339 = arith.mulf %338, %335 : vector<16x1xf32>
    %340 = vector.broadcast %339 : vector<16x1xf32> to vector<16x128xf32>
    %341 = arith.mulf %329, %340 : vector<16x128xf32>
    %342 = vector.shape_cast %337 : vector<16x1xi1> to vector<16x1xi1>
    %343 = vector.broadcast %342 : vector<16x1xi1> to vector<16x128xi1>
    %344 = arith.select %343, %341, %329 : vector<16x128xi1>, vector<16x128xf32>
    %c6 = arith.constant 6 : index
    %345 = memref.load %arg0[%c6] : memref<20xf32, #tpu.memory_space<smem>>
    %c7_86 = arith.constant 7 : index
    %346 = memref.load %arg0[%c7_86] : memref<20xf32, #tpu.memory_space<smem>>
    %c8_87 = arith.constant 8 : index
    %347 = memref.load %arg0[%c8_87] : memref<20xf32, #tpu.memory_space<smem>>
    %c9_88 = arith.constant 9 : index
    %348 = memref.load %arg0[%c9_88] : memref<20xf32, #tpu.memory_space<smem>>
    %c10_89 = arith.constant 10 : index
    %349 = memref.load %arg0[%c10_89] : memref<20xf32, #tpu.memory_space<smem>>
    %c11 = arith.constant 11 : index
    %350 = memref.load %arg0[%c11] : memref<20xf32, #tpu.memory_space<smem>>
    %c13 = arith.constant 13 : index
    %351 = memref.load %arg0[%c13] : memref<20xf32, #tpu.memory_space<smem>>
    %c14 = arith.constant 14 : index
    %352 = memref.load %arg0[%c14] : memref<20xf32, #tpu.memory_space<smem>>
    %c15 = arith.constant 15 : index
    %353 = memref.load %arg0[%c15] : memref<20xf32, #tpu.memory_space<smem>>
    %c16 = arith.constant 16 : index
    %354 = memref.load %arg0[%c16] : memref<20xf32, #tpu.memory_space<smem>>
    %c19 = arith.constant 19 : index
    %355 = memref.load %arg0[%c19] : memref<20xf32, #tpu.memory_space<smem>>
    %c1_90 = arith.constant 1 : index
    %c0_91 = arith.constant 0 : index
    %c0_92 = arith.constant 0 : index
    %356 = vector.load %arg3[%c1_90, %c0_91, %c0_92] : memref<2x128x128xf32, #tpu.memory_space<vmem>>, vector<1x128x128xf32>
    %357 = vector.shape_cast %356 : vector<1x128x128xf32> to vector<128x128xf32>
    %358 = arith.mulf %344, %344 : vector<16x128xf32>
    %cst_93 = arith.constant dense<0.000000e+00> : vector<16xf32>
    %359 = vector.multi_reduction <add>, %358, %cst_93 [1] : vector<16x128xf32> to vector<16xf32>
    %360 = vector.shape_cast %359 : vector<16xf32> to vector<16x1xf32>
    %cst_94 = arith.constant 1.000000e-30 : f32
    %361 = vector.broadcast %cst_94 : f32 to vector<16x1xf32>
    %362 = arith.maximumf %360, %361 : vector<16x1xf32>
    %363 = math.rsqrt %362 : vector<16x1xf32>
    %364 = arith.mulf %362, %363 : vector<16x1xf32>
    %cst_95 = arith.constant dense<0.000000e+00> : vector<16x128xf32>
    %365 = tpu.matmul %344, %357, %cst_95 {dimension_numbers = #tpu.dot_dimension_numbers<[1], [0], [0], [1], [0, 0, 1, 1], [], []>} : vector<16x128xf32>, vector<128x128xf32>, vector<16x128xf32> -> vector<16x128xf32>
    %366 = arith.mulf %365, %365 : vector<16x128xf32>
    %cst_96 = arith.constant dense<0.000000e+00> : vector<16xf32>
    %367 = vector.multi_reduction <add>, %366, %cst_96 [1] : vector<16x128xf32> to vector<16xf32>
    %368 = vector.shape_cast %367 : vector<16xf32> to vector<16x1xf32>
    %cst_97 = arith.constant 1.000000e-30 : f32
    %369 = vector.broadcast %cst_97 : f32 to vector<16x1xf32>
    %370 = arith.maximumf %368, %369 : vector<16x1xf32>
    %371 = math.rsqrt %370 : vector<16x1xf32>
    %372 = arith.mulf %370, %371 : vector<16x1xf32>
    %373 = arith.mulf %372, %363 : vector<16x1xf32>
    %374 = vector.broadcast %346 : f32 to vector<16x1xf32>
    %375 = arith.mulf %374, %364 : vector<16x1xf32>
    %cst_98 = arith.constant -0.999998986 : f32
    %cst_99 = arith.constant 0.999998986 : f32
    %376 = vector.broadcast %cst_98 : f32 to vector<16x1xf32>
    %377 = arith.maximumf %376, %375 : vector<16x1xf32>
    %378 = vector.broadcast %cst_99 : f32 to vector<16x1xf32>
    %379 = arith.minimumf %378, %377 : vector<16x1xf32>
    %cst_100 = arith.constant 1.000000e+00 : f32
    %380 = vector.broadcast %cst_100 : f32 to vector<16x1xf32>
    %381 = arith.addf %380, %379 : vector<16x1xf32>
    %cst_101 = arith.constant 1.000000e+00 : f32
    %382 = vector.broadcast %cst_101 : f32 to vector<16x1xf32>
    %383 = arith.subf %382, %379 : vector<16x1xf32>
    %384 = arith.divf %381, %383 : vector<16x1xf32>
    %385 = math.log %384 : vector<16x1xf32>
    %cst_102 = arith.constant 5.000000e-01 : f32
    %386 = vector.broadcast %cst_102 : f32 to vector<16x1xf32>
    %387 = arith.mulf %386, %385 : vector<16x1xf32>
    %388 = arith.mulf %373, %387 : vector<16x1xf32>
    %389 = math.tanh %388 : vector<16x1xf32>
    %390 = vector.broadcast %389 : vector<16x1xf32> to vector<16x128xf32>
    %391 = arith.mulf %390, %365 : vector<16x128xf32>
    %392 = vector.broadcast %347 : f32 to vector<16x1xf32>
    %393 = arith.mulf %371, %392 : vector<16x1xf32>
    %394 = vector.broadcast %393 : vector<16x1xf32> to vector<16x128xf32>
    %395 = arith.mulf %391, %394 : vector<16x128xf32>
    %396 = math.absf %365 : vector<16x128xf32>
    %cst_103 = arith.constant dense<0.000000e+00> : vector<16xf32>
    %397 = vector.multi_reduction <add>, %396, %cst_103 [1] : vector<16x128xf32> to vector<16xf32>
    %398 = vector.shape_cast %397 : vector<16xf32> to vector<16x1xf32>
    %cst_104 = arith.constant 0.000000e+00 : f32
    %399 = vector.broadcast %cst_104 : f32 to vector<16x1xf32>
    %400 = arith.cmpf oeq, %398, %399 : vector<16x1xf32>
    %cst_105 = arith.constant 0.000000e+00 : f32
    %401 = vector.broadcast %cst_105 : f32 to vector<16x128xf32>
    %402 = vector.shape_cast %400 : vector<16x1xi1> to vector<16x1xi1>
    %403 = vector.broadcast %402 : vector<16x1xi1> to vector<16x128xi1>
    %404 = arith.select %403, %401, %395 : vector<16x128xi1>, vector<16x128xf32>
    %405 = arith.mulf %404, %404 : vector<16x128xf32>
    %cst_106 = arith.constant dense<0.000000e+00> : vector<16xf32>
    %406 = vector.multi_reduction <add>, %405, %cst_106 [1] : vector<16x128xf32> to vector<16xf32>
    %407 = vector.shape_cast %406 : vector<16xf32> to vector<16x1xf32>
    %cst_107 = arith.constant 1.000000e-30 : f32
    %408 = vector.broadcast %cst_107 : f32 to vector<16x1xf32>
    %409 = arith.maximumf %407, %408 : vector<16x1xf32>
    %410 = math.rsqrt %409 : vector<16x1xf32>
    %411 = vector.broadcast %349 : f32 to vector<16x1xf32>
    %412 = arith.cmpf ogt, %407, %411 : vector<16x1xf32>
    %413 = vector.broadcast %348 : f32 to vector<16x1xf32>
    %414 = arith.mulf %413, %410 : vector<16x1xf32>
    %415 = vector.broadcast %414 : vector<16x1xf32> to vector<16x128xf32>
    %416 = arith.mulf %404, %415 : vector<16x128xf32>
    %417 = vector.shape_cast %412 : vector<16x1xi1> to vector<16x1xi1>
    %418 = vector.broadcast %417 : vector<16x1xi1> to vector<16x128xi1>
    %419 = arith.select %418, %416, %404 : vector<16x128xi1>, vector<16x128xf32>
    %c1_108 = arith.constant 1 : index
    %c0_109 = arith.constant 0 : index
    %c0_110 = arith.constant 0 : index
    %420 = vector.load %arg4[%c1_108, %c0_109, %c0_110] : memref<2x1x128xf32, #tpu.memory_space<vmem>>, vector<1x1x128xf32>
    %421 = vector.shape_cast %420 : vector<1x1x128xf32> to vector<1x128xf32>
    %422 = arith.mulf %421, %421 : vector<1x128xf32>
    %cst_111 = arith.constant dense<0.000000e+00> : vector<1xf32>
    %423 = vector.multi_reduction <add>, %422, %cst_111 [1] : vector<1x128xf32> to vector<1xf32>
    %424 = vector.shape_cast %423 : vector<1xf32> to vector<1x1xf32>
    %cst_112 = arith.constant 1.000000e-30 : f32
    %425 = vector.broadcast %cst_112 : f32 to vector<1x1xf32>
    %426 = arith.maximumf %424, %425 : vector<1x1xf32>
    %427 = math.rsqrt %426 : vector<1x1xf32>
    %428 = arith.mulf %426, %427 : vector<1x1xf32>
    %429 = vector.broadcast %346 : f32 to vector<1x1xf32>
    %430 = arith.mulf %429, %428 : vector<1x1xf32>
    %431 = math.tanh %430 : vector<1x1xf32>
    %432 = vector.broadcast %431 : vector<1x1xf32> to vector<1x128xf32>
    %433 = arith.mulf %432, %421 : vector<1x128xf32>
    %434 = vector.broadcast %347 : f32 to vector<1x1xf32>
    %435 = arith.mulf %427, %434 : vector<1x1xf32>
    %436 = vector.broadcast %435 : vector<1x1xf32> to vector<1x128xf32>
    %437 = arith.mulf %433, %436 : vector<1x128xf32>
    %438 = arith.mulf %437, %437 : vector<1x128xf32>
    %cst_113 = arith.constant dense<0.000000e+00> : vector<1xf32>
    %439 = vector.multi_reduction <add>, %438, %cst_113 [1] : vector<1x128xf32> to vector<1xf32>
    %440 = vector.shape_cast %439 : vector<1xf32> to vector<1x1xf32>
    %cst_114 = arith.constant 1.000000e-30 : f32
    %441 = vector.broadcast %cst_114 : f32 to vector<1x1xf32>
    %442 = arith.maximumf %440, %441 : vector<1x1xf32>
    %443 = math.rsqrt %442 : vector<1x1xf32>
    %444 = vector.broadcast %349 : f32 to vector<1x1xf32>
    %445 = arith.cmpf ogt, %440, %444 : vector<1x1xf32>
    %446 = vector.broadcast %348 : f32 to vector<1x1xf32>
    %447 = arith.mulf %446, %443 : vector<1x1xf32>
    %448 = vector.broadcast %447 : vector<1x1xf32> to vector<1x128xf32>
    %449 = arith.mulf %437, %448 : vector<1x128xf32>
    %450 = vector.shape_cast %445 : vector<1x1xi1> to vector<1x1xi1>
    %451 = vector.broadcast %450 : vector<1x1xi1> to vector<1x128xi1>
    %452 = arith.select %451, %449, %437 : vector<1x128xi1>, vector<1x128xf32>
    %453 = arith.mulf %419, %419 : vector<16x128xf32>
    %cst_115 = arith.constant dense<0.000000e+00> : vector<16xf32>
    %454 = vector.multi_reduction <add>, %453, %cst_115 [1] : vector<16x128xf32> to vector<16xf32>
    %455 = vector.shape_cast %454 : vector<16xf32> to vector<16x1xf32>
    %456 = arith.mulf %452, %452 : vector<1x128xf32>
    %cst_116 = arith.constant dense<0.000000e+00> : vector<1xf32>
    %457 = vector.multi_reduction <add>, %456, %cst_116 [1] : vector<1x128xf32> to vector<1xf32>
    %458 = vector.shape_cast %457 : vector<1xf32> to vector<1x1xf32>
    %459 = vector.broadcast %452 : vector<1x128xf32> to vector<16x128xf32>
    %460 = arith.mulf %419, %459 : vector<16x128xf32>
    %cst_117 = arith.constant dense<0.000000e+00> : vector<16xf32>
    %461 = vector.multi_reduction <add>, %460, %cst_117 [1] : vector<16x128xf32> to vector<16xf32>
    %462 = vector.shape_cast %461 : vector<16xf32> to vector<16x1xf32>
    %cst_118 = arith.constant 2.000000e+00 : f32
    %463 = arith.mulf %cst_118, %345 : f32
    %464 = vector.broadcast %463 : f32 to vector<16x1xf32>
    %465 = arith.mulf %464, %462 : vector<16x1xf32>
    %cst_119 = arith.constant 1.000000e+00 : f32
    %466 = vector.broadcast %cst_119 : f32 to vector<16x1xf32>
    %467 = arith.addf %466, %465 : vector<16x1xf32>
    %468 = vector.broadcast %345 : f32 to vector<1x1xf32>
    %469 = arith.mulf %468, %458 : vector<1x1xf32>
    %470 = vector.broadcast %469 : vector<1x1xf32> to vector<16x1xf32>
    %471 = arith.addf %467, %470 : vector<16x1xf32>
    %472 = vector.broadcast %471 : vector<16x1xf32> to vector<16x128xf32>
    %473 = arith.mulf %472, %419 : vector<16x128xf32>
    %474 = vector.broadcast %345 : f32 to vector<16x1xf32>
    %475 = arith.mulf %474, %455 : vector<16x1xf32>
    %cst_120 = arith.constant 1.000000e+00 : f32
    %476 = vector.broadcast %cst_120 : f32 to vector<16x1xf32>
    %477 = arith.subf %476, %475 : vector<16x1xf32>
    %478 = vector.broadcast %477 : vector<16x1xf32> to vector<16x128xf32>
    %479 = vector.broadcast %452 : vector<1x128xf32> to vector<16x128xf32>
    %480 = arith.mulf %478, %479 : vector<16x128xf32>
    %481 = arith.addf %473, %480 : vector<16x128xf32>
    %cst_121 = arith.constant 2.000000e+00 : f32
    %482 = arith.mulf %cst_121, %345 : f32
    %483 = vector.broadcast %482 : f32 to vector<16x1xf32>
    %484 = arith.mulf %483, %462 : vector<16x1xf32>
    %cst_122 = arith.constant 1.000000e+00 : f32
    %485 = vector.broadcast %cst_122 : f32 to vector<16x1xf32>
    %486 = arith.addf %485, %484 : vector<16x1xf32>
    %487 = vector.broadcast %350 : f32 to vector<16x1xf32>
    %488 = arith.mulf %487, %455 : vector<16x1xf32>
    %489 = vector.broadcast %458 : vector<1x1xf32> to vector<16x1xf32>
    %490 = arith.mulf %488, %489 : vector<16x1xf32>
    %491 = arith.addf %486, %490 : vector<16x1xf32>
    %cst_123 = arith.constant 1.000000e-15 : f32
    %492 = vector.broadcast %cst_123 : f32 to vector<16x1xf32>
    %493 = arith.maximumf %491, %492 : vector<16x1xf32>
    %494 = vector.broadcast %493 : vector<16x1xf32> to vector<16x128xf32>
    %495 = arith.divf %481, %494 : vector<16x128xf32>
    %496 = arith.mulf %495, %495 : vector<16x128xf32>
    %cst_124 = arith.constant dense<0.000000e+00> : vector<16xf32>
    %497 = vector.multi_reduction <add>, %496, %cst_124 [1] : vector<16x128xf32> to vector<16xf32>
    %498 = vector.shape_cast %497 : vector<16xf32> to vector<16x1xf32>
    %cst_125 = arith.constant 1.000000e-30 : f32
    %499 = vector.broadcast %cst_125 : f32 to vector<16x1xf32>
    %500 = arith.maximumf %498, %499 : vector<16x1xf32>
    %501 = math.rsqrt %500 : vector<16x1xf32>
    %502 = vector.broadcast %349 : f32 to vector<16x1xf32>
    %503 = arith.cmpf ogt, %498, %502 : vector<16x1xf32>
    %504 = vector.broadcast %348 : f32 to vector<16x1xf32>
    %505 = arith.mulf %504, %501 : vector<16x1xf32>
    %506 = vector.broadcast %505 : vector<16x1xf32> to vector<16x128xf32>
    %507 = arith.mulf %495, %506 : vector<16x128xf32>
    %508 = vector.shape_cast %503 : vector<16x1xi1> to vector<16x1xi1>
    %509 = vector.broadcast %508 : vector<16x1xi1> to vector<16x128xi1>
    %510 = arith.select %509, %507, %495 : vector<16x128xi1>, vector<16x128xf32>
    %511 = arith.mulf %510, %510 : vector<16x128xf32>
    %cst_126 = arith.constant dense<0.000000e+00> : vector<16xf32>
    %512 = vector.multi_reduction <add>, %511, %cst_126 [1] : vector<16x128xf32> to vector<16xf32>
    %513 = vector.shape_cast %512 : vector<16xf32> to vector<16x1xf32>
    %cst_127 = arith.constant 1.000000e-30 : f32
    %514 = vector.broadcast %cst_127 : f32 to vector<16x1xf32>
    %515 = arith.maximumf %513, %514 : vector<16x1xf32>
    %516 = math.rsqrt %515 : vector<16x1xf32>
    %517 = arith.mulf %515, %516 : vector<16x1xf32>
    %518 = vector.broadcast %346 : f32 to vector<16x1xf32>
    %519 = arith.mulf %518, %517 : vector<16x1xf32>
    %cst_128 = arith.constant -0.999998986 : f32
    %cst_129 = arith.constant 0.999998986 : f32
    %520 = vector.broadcast %cst_128 : f32 to vector<16x1xf32>
    %521 = arith.maximumf %520, %519 : vector<16x1xf32>
    %522 = vector.broadcast %cst_129 : f32 to vector<16x1xf32>
    %523 = arith.minimumf %522, %521 : vector<16x1xf32>
    %cst_130 = arith.constant 1.000000e+00 : f32
    %524 = vector.broadcast %cst_130 : f32 to vector<16x1xf32>
    %525 = arith.addf %524, %523 : vector<16x1xf32>
    %cst_131 = arith.constant 1.000000e+00 : f32
    %526 = vector.broadcast %cst_131 : f32 to vector<16x1xf32>
    %527 = arith.subf %526, %523 : vector<16x1xf32>
    %528 = arith.divf %525, %527 : vector<16x1xf32>
    %529 = math.log %528 : vector<16x1xf32>
    %cst_132 = arith.constant 5.000000e-01 : f32
    %530 = vector.broadcast %cst_132 : f32 to vector<16x1xf32>
    %531 = arith.mulf %530, %529 : vector<16x1xf32>
    %532 = vector.broadcast %531 : vector<16x1xf32> to vector<16x128xf32>
    %533 = arith.mulf %532, %510 : vector<16x128xf32>
    %534 = vector.broadcast %347 : f32 to vector<16x1xf32>
    %535 = arith.mulf %516, %534 : vector<16x1xf32>
    %536 = vector.broadcast %535 : vector<16x1xf32> to vector<16x128xf32>
    %537 = arith.mulf %533, %536 : vector<16x128xf32>
    %c0_133 = arith.constant 0 : index
    %c0_134 = arith.constant 0 : index
    %538 = vector.load %arg8[%c0_133, %c0_134] : memref<128x128xf32, #tpu.memory_space<vmem>>, vector<16x128xf32>
    tpu.vector_store %arg8[%c0_133, %c0_134], %537 {strides = array<i32>} : memref<128x128xf32, #tpu.memory_space<vmem>>, vector<16x128xf32>,
    %c0_135 = arith.constant 0 : index
    %c0_136 = arith.constant 0 : index
    %539 = vector.load %arg8[%c0_135, %c0_136] : memref<128x128xf32, #tpu.memory_space<vmem>>, vector<128x128xf32>
    %c1_137 = arith.constant 1 : index
    %c0_138 = arith.constant 0 : index
    %c0_139 = arith.constant 0 : index
    %540 = vector.load %arg5[%c1_137, %c0_138, %c0_139] : memref<2x1x128xf32, #tpu.memory_space<vmem>>, vector<1x1x128xf32>
    %541 = vector.shape_cast %540 : vector<1x1x128xf32> to vector<1x128xf32>
    %542 = vector.broadcast %541 : vector<1x128xf32> to vector<16x128xf32>
    %543 = arith.mulf %537, %542 : vector<16x128xf32>
    %cst_140 = arith.constant dense<0.000000e+00> : vector<16xf32>
    %544 = vector.multi_reduction <add>, %543, %cst_140 [1] : vector<16x128xf32> to vector<16xf32>
    %545 = vector.shape_cast %544 : vector<16xf32> to vector<16x1xf32>
    %c1_141 = arith.constant 1 : index
    %c0_142 = arith.constant 0 : index
    %c0_143 = arith.constant 0 : index
    %546 = vector.load %arg6[%c1_141, %c0_142, %c0_143] : memref<2x1x128xf32, #tpu.memory_space<vmem>>, vector<1x1x128xf32>
    %547 = vector.shape_cast %546 : vector<1x1x128xf32> to vector<1x128xf32>
    %cst_144 = arith.constant dense<0.000000e+00> : vector<1x128xf32>
    %548 = tpu.matmul %547, %539, %cst_144 {dimension_numbers = #tpu.dot_dimension_numbers<[1], [1], [0], [0], [0, 0, 1, 0], [], []>} : vector<1x128xf32>, vector<128x128xf32>, vector<1x128xf32> -> vector<1x128xf32>
    %549 = vector.broadcast %545 : vector<16x1xf32> to vector<16x128xf32>
    %550 = vector.broadcast %548 : vector<1x128xf32> to vector<16x128xf32>
    %551 = arith.addf %549, %550 : vector<16x128xf32>
    %552 = vector.broadcast %355 : f32 to vector<16x128xf32>
    %553 = arith.addf %551, %552 : vector<16x128xf32>
    %554 = arith.negf %553 : vector<16x128xf32>
    %555 = math.exp %554 : vector<16x128xf32>
    %cst_145 = arith.constant 1.000000e+00 : f32
    %556 = vector.broadcast %cst_145 : f32 to vector<16x128xf32>
    %557 = arith.addf %556, %555 : vector<16x128xf32>
    %558 = arith.divf %556, %557 : vector<16x128xf32>
    %559 = arith.mulf %558, %0 : vector<16x128xf32>
    %cst_146 = arith.constant dense<0.000000e+00> : vector<16x128xf32>
    %560 = tpu.matmul %559, %539, %cst_146 {dimension_numbers = #tpu.dot_dimension_numbers<[1], [0], [0], [1], [0, 0, 1, 1], [], []>} : vector<16x128xf32>, vector<128x128xf32>, vector<16x128xf32> -> vector<16x128xf32>
    %561 = arith.mulf %560, %560 : vector<16x128xf32>
    %cst_147 = arith.constant dense<0.000000e+00> : vector<16xf32>
    %562 = vector.multi_reduction <add>, %561, %cst_147 [1] : vector<16x128xf32> to vector<16xf32>
    %563 = vector.shape_cast %562 : vector<16xf32> to vector<16x1xf32>
    %cst_148 = arith.constant 1.000000e-30 : f32
    %564 = vector.broadcast %cst_148 : f32 to vector<16x1xf32>
    %565 = arith.maximumf %563, %564 : vector<16x1xf32>
    %566 = math.rsqrt %565 : vector<16x1xf32>
    %567 = arith.mulf %565, %566 : vector<16x1xf32>
    %568 = vector.broadcast %346 : f32 to vector<16x1xf32>
    %569 = arith.mulf %568, %567 : vector<16x1xf32>
    %570 = math.tanh %569 : vector<16x1xf32>
    %571 = vector.broadcast %570 : vector<16x1xf32> to vector<16x128xf32>
    %572 = arith.mulf %571, %560 : vector<16x128xf32>
    %573 = vector.broadcast %347 : f32 to vector<16x1xf32>
    %574 = arith.mulf %566, %573 : vector<16x1xf32>
    %575 = vector.broadcast %574 : vector<16x1xf32> to vector<16x128xf32>
    %576 = arith.mulf %572, %575 : vector<16x128xf32>
    %577 = arith.mulf %576, %576 : vector<16x128xf32>
    %cst_149 = arith.constant dense<0.000000e+00> : vector<16xf32>
    %578 = vector.multi_reduction <add>, %577, %cst_149 [1] : vector<16x128xf32> to vector<16xf32>
    %579 = vector.shape_cast %578 : vector<16xf32> to vector<16x1xf32>
    %cst_150 = arith.constant 1.000000e-30 : f32
    %580 = vector.broadcast %cst_150 : f32 to vector<16x1xf32>
    %581 = arith.maximumf %579, %580 : vector<16x1xf32>
    %582 = math.rsqrt %581 : vector<16x1xf32>
    %583 = vector.broadcast %349 : f32 to vector<16x1xf32>
    %584 = arith.cmpf ogt, %579, %583 : vector<16x1xf32>
    %585 = vector.broadcast %348 : f32 to vector<16x1xf32>
    %586 = arith.mulf %585, %582 : vector<16x1xf32>
    %587 = vector.broadcast %586 : vector<16x1xf32> to vector<16x128xf32>
    %588 = arith.mulf %576, %587 : vector<16x128xf32>
    %589 = vector.shape_cast %584 : vector<16x1xi1> to vector<16x1xi1>
    %590 = vector.broadcast %589 : vector<16x1xi1> to vector<16x128xi1>
    %591 = arith.select %590, %588, %576 : vector<16x128xi1>, vector<16x128xf32>
    %592 = arith.mulf %591, %591 : vector<16x128xf32>
    %cst_151 = arith.constant dense<0.000000e+00> : vector<16xf32>
    %593 = vector.multi_reduction <add>, %592, %cst_151 [1] : vector<16x128xf32> to vector<16xf32>
    %594 = vector.shape_cast %593 : vector<16xf32> to vector<16x1xf32>
    %cst_152 = arith.constant 1.000000e-30 : f32
    %595 = vector.broadcast %cst_152 : f32 to vector<16x1xf32>
    %596 = arith.maximumf %594, %595 : vector<16x1xf32>
    %597 = math.rsqrt %596 : vector<16x1xf32>
    %598 = arith.mulf %596, %597 : vector<16x1xf32>
    %599 = vector.broadcast %346 : f32 to vector<16x1xf32>
    %600 = arith.mulf %599, %598 : vector<16x1xf32>
    %cst_153 = arith.constant -0.999998986 : f32
    %cst_154 = arith.constant 0.999998986 : f32
    %601 = vector.broadcast %cst_153 : f32 to vector<16x1xf32>
    %602 = arith.maximumf %601, %600 : vector<16x1xf32>
    %603 = vector.broadcast %cst_154 : f32 to vector<16x1xf32>
    %604 = arith.minimumf %603, %602 : vector<16x1xf32>
    %cst_155 = arith.constant 1.000000e+00 : f32
    %605 = vector.broadcast %cst_155 : f32 to vector<16x1xf32>
    %606 = arith.addf %605, %604 : vector<16x1xf32>
    %cst_156 = arith.constant 1.000000e+00 : f32
    %607 = vector.broadcast %cst_156 : f32 to vector<16x1xf32>
    %608 = arith.subf %607, %604 : vector<16x1xf32>
    %609 = arith.divf %606, %608 : vector<16x1xf32>
    %610 = math.log %609 : vector<16x1xf32>
    %cst_157 = arith.constant 5.000000e-01 : f32
    %611 = vector.broadcast %cst_157 : f32 to vector<16x1xf32>
    %612 = arith.mulf %611, %610 : vector<16x1xf32>
    %613 = vector.broadcast %612 : vector<16x1xf32> to vector<16x128xf32>
    %614 = arith.mulf %613, %591 : vector<16x128xf32>
    %615 = vector.broadcast %347 : f32 to vector<16x1xf32>
    %616 = arith.mulf %597, %615 : vector<16x1xf32>
    %617 = vector.broadcast %616 : vector<16x1xf32> to vector<16x128xf32>
    %618 = arith.mulf %614, %617 : vector<16x128xf32>
    %619 = math.tanh %618 : vector<16x128xf32>
    %620 = arith.mulf %619, %619 : vector<16x128xf32>
    %cst_158 = arith.constant dense<0.000000e+00> : vector<16xf32>
    %621 = vector.multi_reduction <add>, %620, %cst_158 [1] : vector<16x128xf32> to vector<16xf32>
    %622 = vector.shape_cast %621 : vector<16xf32> to vector<16x1xf32>
    %cst_159 = arith.constant 1.000000e-30 : f32
    %623 = vector.broadcast %cst_159 : f32 to vector<16x1xf32>
    %624 = arith.maximumf %622, %623 : vector<16x1xf32>
    %625 = math.rsqrt %624 : vector<16x1xf32>
    %626 = arith.mulf %624, %625 : vector<16x1xf32>
    %627 = vector.broadcast %351 : f32 to vector<16x1xf32>
    %628 = arith.mulf %627, %626 : vector<16x1xf32>
    %629 = math.tanh %628 : vector<16x1xf32>
    %630 = vector.broadcast %629 : vector<16x1xf32> to vector<16x128xf32>
    %631 = arith.mulf %630, %619 : vector<16x128xf32>
    %632 = vector.broadcast %352 : f32 to vector<16x1xf32>
    %633 = arith.mulf %625, %632 : vector<16x1xf32>
    %634 = vector.broadcast %633 : vector<16x1xf32> to vector<16x128xf32>
    %635 = arith.mulf %631, %634 : vector<16x128xf32>
    %636 = arith.mulf %635, %635 : vector<16x128xf32>
    %cst_160 = arith.constant dense<0.000000e+00> : vector<16xf32>
    %637 = vector.multi_reduction <add>, %636, %cst_160 [1] : vector<16x128xf32> to vector<16xf32>
    %638 = vector.shape_cast %637 : vector<16xf32> to vector<16x1xf32>
    %cst_161 = arith.constant 1.000000e-30 : f32
    %639 = vector.broadcast %cst_161 : f32 to vector<16x1xf32>
    %640 = arith.maximumf %638, %639 : vector<16x1xf32>
    %641 = math.rsqrt %640 : vector<16x1xf32>
    %642 = vector.broadcast %354 : f32 to vector<16x1xf32>
    %643 = arith.cmpf ogt, %638, %642 : vector<16x1xf32>
    %644 = vector.broadcast %353 : f32 to vector<16x1xf32>
    %645 = arith.mulf %644, %641 : vector<16x1xf32>
    %646 = vector.broadcast %645 : vector<16x1xf32> to vector<16x128xf32>
    %647 = arith.mulf %635, %646 : vector<16x128xf32>
    %648 = vector.shape_cast %643 : vector<16x1xi1> to vector<16x1xi1>
    %649 = vector.broadcast %648 : vector<16x1xi1> to vector<16x128xi1>
    %650 = arith.select %649, %647, %635 : vector<16x128xi1>, vector<16x128xf32>
    %c0_162 = arith.constant 0 : index
    %c0_163 = arith.constant 0 : index
    %651 = vector.load %arg7[%c0_162, %c0_163] : memref<16x128xf32, #tpu.memory_space<vmem>>, vector<16x128xf32>
    tpu.vector_store %arg7[%c0_162, %c0_163], %650 {strides = array<i32>} : memref<16x128xf32, #tpu.memory_space<vmem>>, vector<16x128xf32>,
    return
  }
}

</mosaic_0001>

<bundles_post_ra>
// kernel: tpu_custom_call.1
= control target key start
LH: loop header
LB: loop body
LE: loop exit
PB: predicated region body
PF: predicated region fallthrough
CT: control target
= control target key end

     0   :  { %12 = vsyncpa [#allocation6], 0  ;;  %s2648_s0 = inlined_call_operand.hbm [shape: f32[20], index: 0, kind: input, shape index: {}]   ;;  %s2649_s1 = inlined_call_operand.hbm [shape: f32[16,128], index: 1, kind: input, shape index: {}]   ;;  %s2650_s2 = inlined_call_operand.hbm [shape: f32[16,128], index: 2, kind: input, shape index: {}]   ;;  %s2651_s3 = inlined_call_operand.hbm [shape: f32[2,128,128], index: 3, kind: input, shape index: {}]   ;;  %s2652_s4 = inlined_call_operand.vmem [shape: f32[2,1,128], index: 4, kind: input, shape index: {}]   ;;  %s2653_s5 = inlined_call_operand.vmem [shape: f32[2,1,128], index: 5, kind: input, shape index: {}]   ;;  %s2654_s6 = inlined_call_operand.hbm [shape: f32[2,1,128], index: 6, kind: input, shape index: {}]   ;;  %s2655_s7 = inlined_call_operand.hbm [shape: f32[16,128], index: 7, kind: output, shape index: {}]  }
   0x1   :  { %13 = vsyncpa [#allocation4], 0 }
   0x2   :  { %14 = vsyncpa [#allocation9], 0 }
   0x3   :  { %15 = vsyncpa [#allocation12], 0 }
   0x4   :  { %16 = vsyncpa [#allocation5], 0  ;;  %s43_s26 = sshll.u32 %s2650_s2, 4  ;;  %s2305_s27 = smov [#allocation8]   ;;  %s44_s26 = int_to_ptr.hbm [resolvable:$true] %s43_s26 }
   0x5   :  { %s45_s28 = sshll.u32 %s2305_s27, 4  ;;  %s22_s8 = sshll.u32 %s2648_s0, 4  ;;  %s46_s28 = int_to_ptr.vmem [resolvable:$true] %s45_s28  ;;  %s23_s8 = int_to_ptr.hbm [resolvable:$true] %s22_s8 }
   0x6   :  { %s2306_s9 = smov 128   ;;  %s2307_s10 = smov 8  }
   0x7   :  { %51 = dma.hbm_to_vmem [thread:$0]  %s44_s26, 256, %s46_s28, [#allocation9], %s2306_s9, %s2306_s9, %s2307_s10  }
   0x8   :  { %s2308_s11 = smov [#allocation3]   ;;  %s30_s2 = sshll.u32 %s2649_s1, 4  ;;  %s31_s2 = int_to_ptr.hbm [resolvable:$true] %s30_s2 }
   0x9   :  { %25 = dma.hbm_to_smem %s23_s8, 16, %s2308_s11, [#allocation6]  }
   0xa   :  { %s2309_s14 = smov [#allocation7]   ;;  %s56_s0 = sshll.u32 %s2651_s3, 4  ;;  %s57_s0 = int_to_ptr.hbm [resolvable:$true] %s56_s0 }
   0xb   :  { %s32_s15 = sshll.u32 %s2309_s14, 4  ;;  %s2310_s18 = smov [#allocation10]   ;;  %s33_s15 = int_to_ptr.vmem [resolvable:$true] %s32_s15 }
   0xc   :  { %38 = dma.hbm_to_vmem [thread:$0]  %s31_s2, 256, %s33_s15, [#allocation4], %s2306_s9, %s2306_s9, %s2307_s10  }
   0xd   :  { %s58_s19 = sshll.u32 %s2310_s18, 4  ;;  %s73_s22 = sshll.u32 %s2654_s6, 4  ;;  %s59_s19 = int_to_ptr.vmem [resolvable:$true] %s58_s19  ;;  %s74_s22 = int_to_ptr.hbm [resolvable:$true] %s73_s22 }
   0xe   :  { %64 = dma.hbm_to_vmem [thread:$0]  %s57_s0, 4096, %s59_s19, [#allocation9], %s2306_s9, %s2306_s9, %s2307_s10  }
   0xf   :  { %s2311_s1 = smov [#allocation11]   ;;  %s2312_s3 = smov 16  }
  0x10   :  { %s75_s23 = sshll.u32 %s2311_s1, 4  ;;  %s2313_s24 = smov 1   ;;  %s76_s23 = int_to_ptr.vmem [resolvable:$true] %s75_s23 }
  0x11   :  { %81 = dma.hbm_to_vmem [thread:$0]  %s74_s22, 32, %s76_s23, [#allocation12], %s2312_s3, %s2312_s3, %s2313_s24  }
  0x12   :  { %2295 = dma.done.wait [#allocation6], 16  }
  0x13   :  { %2296 = vsyncadd [#allocation6], 4294967280 }
  0x14   :  { %2297 = dma.done.wait [#allocation4], 256  }
  0x15   :  { %2298 = vsyncadd [#allocation4], 4294967040 }
  0x16   :  { %2299 = dma.done.wait [#allocation9], 4352  }
  0x17   :  { %2300 = vsyncadd [#allocation9], 4294962944 }
  0x18   :  { %2301 = dma.done.wait [#allocation12], 32  }
  0x19   :  { %2302 = vsyncadd [#allocation12], 4294967264 }
  0x1a   :  { %102 = sfence }
  0x1b   :  { %v125_v0 = vld [vmem:[#allocation7] sm:$0xff]  ;;  %v126_v2 = vld [vmem:[#allocation7 + $0x8] sm:$0xff]  ;;  %s1902_s6 = sld [smem:[#allocation3 + $0x1]]  ;;  %v233_v12 = vld [vmem:[#allocation10 + $0x78] sm:$0xff]  ;;  %vm431_vm6 = vcmask 1040384  }
  0x1c   :  { %v127_v1 = vmul.f32 %v125_v0, %v125_v0  ;;  %v128_v3 = vmul.f32 %v126_v2, %v126_v2  ;;  %v232_v13 = vld [vmem:[#allocation10 + $0x70] sm:$0xff]  ;;  %264 = vmatpush.msra.mxu0 %v233_v12  ;;  %v231_v15 = vld [vmem:[#allocation10 + $0x68] sm:$0xff]  ;;  %s1903_s25 = sld [smem:[#allocation3 + $0x2]]  ;;  %v230_v41 = vld [vmem:[#allocation10 + $0x60] sm:$0xff] }
  0x1d   :  { %v229_v42 = vld [vmem:[#allocation10 + $0x58] sm:$0xff]  ;;  %v228_v43 = vld [vmem:[#allocation10 + $0x50] sm:$0xff]  ;;  %v2398_v44 = vld [vmem:[%s2652_s4] sm:$0x1]  ;;  %s1904_s28 = sld [smem:[#allocation3 + $0x3]] }
  0x1e   :  { %129 = vadd.xlane.f32.xlu0 %v127_v1  ;;  %265 = vmatpush.msra.mxu0 %v232_v13  ;;  %v430_v45 = vmul.f32 %v2398_v44, %v2398_v44  ;;  %v227_v46 = vld [vmem:[#allocation10 + $0x48] sm:$0xff]  ;;  %v226_v48 = vld [vmem:[#allocation10 + $0x40] sm:$0xff]  ;;  %v225_v49 = vld [vmem:[#allocation10 + $0x38] sm:$0xff]  ;;  %s1905_s29 = sld [smem:[#allocation3 + $0x4]] }
  0x1f   :  { %v224_v50 = vld [vmem:[#allocation10 + $0x30] sm:$0xff]  ;;  %v223_v51 = vld [vmem:[#allocation10 + $0x28] sm:$0xff]  ;;  %v222_v52 = vld [vmem:[#allocation10 + $0x20] sm:$0xff]  ;;  %s211_s30 = sld [smem:[#allocation3]] }
  0x20   :  { %266 = vmatpush.msra.mxu0 %v231_v15  ;;  %v432_v47 = vsel %vm431_vm6, %v430_v45, 0.0  ;;  %v221_v53 = vld [vmem:[#allocation10 + $0x18] sm:$0xff]  ;;  %v220_v54 = vld [vmem:[#allocation10 + $0x10] sm:$0xff]  ;;  %v219_v55 = vld [vmem:[#allocation10 + $0x8] sm:$0xff]  ;;  %s1906_s8 = sld [smem:[#allocation3 + $0x5]] }
  0x21   :  { %v2379_v20 = vstv %s1902_s6  ;;  %v218_v56 = vld [vmem:[#allocation10] sm:$0xff]  ;;  %s1911_s2 = sld [smem:[#allocation3 + $0x12]]  ;;  %s2314_s6 = smov [#allocation13]  }
  0x22   :  { %v2382_v29 = vstv %s1903_s25  ;;  %267 = vmatpush.msra.mxu0 %v230_v41  ;;  %s1907_s14 = sld [smem:[#allocation3 + $0x7]]  ;;  %s1884_s25 = sshll.u32 %s2314_s6, 4  ;;  %s1885_s25 = int_to_ptr.vmem [resolvable:$true] %s1884_s25 }
  0x23   :  { %s1908_s15 = sld [smem:[#allocation3 + $0x8]] }
  0x24   :  { %268 = vmatpush.msra.mxu0 %v229_v42  ;;  %s1909_s16 = sld [smem:[#allocation3 + $0x9]] }
  0x25   :  { %s490_s11 = smul.f32 2.0, %s211_s30  ;;  %s1910_s17 = sld [smem:[#allocation3 + $0xa]] }
  0x26   :  { %131 = vadd.xlane.f32.xlu0 %v128_v3  ;;  %269 = vmatpush.msra.mxu0 %v228_v43  ;;  %s1925_s19 = sld [smem:[#allocation3 + $0xb]] }
  0x27   :  { %s1926_s1 = sld [smem:[#allocation3 + $0xd]] }
  0x28   :  { %270 = vmatpush.msra.mxu0 %v227_v46  ;;  %s1927_s23 = sld [smem:[#allocation3 + $0xe]] }
  0x29   :  { %s1928_s3 = sld [smem:[#allocation3 + $0xf]] }
  0x2a   :  { %271 = vmatpush.msra.mxu0 %v226_v48  ;;  %s1929_s24 = sld [smem:[#allocation3 + $0x10]] }
  0x2c   :  { %272 = vmatpush.msra.mxu0 %v225_v49 }
  0x2e   :  { %273 = vmatpush.msra.mxu0 %v224_v50 }
  0x30   :  { %274 = vmatpush.msra.mxu0 %v223_v51 }
  0x32   :  { %275 = vmatpush.msra.mxu0 %v222_v52 }
  0x34   :  { %276 = vmatpush.msra.mxu0 %v221_v53 }
  0x36   :  { %277 = vmatpush.msra.mxu0 %v220_v54 }
  0x38   :  { %278 = vmatpush.msra.mxu0 %v219_v55 }
  0x3a   :  { %279 = vmatpush.msra.mxu0 %v218_v56 }
  0x91   :  { %v130_v4 = vpop.xlane.xlu0 %129 }
  0x92   :  { %v133_v5 = vmax.f32 %v130_v4, 1e-30 }
  0x94   :  { %1953 = vrsqrt.f32 %v133_v5  ;;  %vm141_vm1 = vweird.f32 %v133_v5 }
  0x99   :  { %v132_v6 = vpop.xlane.xlu0 %131 }
  0x9a   :  { %v1954_v7 = vpop.eup %1953  ;;  %v134_v8 = vmax.f32 %v132_v6, 1e-30 }
  0x9b   :  { %v136_v9 = vmul.f32 %v1954_v7, %v133_v5  ;;  %vm142_vm0 = vweird.f32 %v1954_v7 }
  0x9c   :  { %1955 = vrsqrt.f32 %v134_v8  ;;  %vm143_vm2 = vmor %vm141_vm1, %vm142_vm0  ;;  %vm151_vm4 = vweird.f32 %v134_v8 }
  0x9d   :  { %v137_v10 = vmul.f32 %v1954_v7, %v136_v9 }
  0x9f   :  { %v138_v11 = vmul.f32 0.5, %v137_v10 }
  0xa1   :  { %v139_v14 = vsub.f32 1.5, %v138_v11 }
  0xa2   :  { %v1956_v16 = vpop.eup %1955 }
  0xa3   :  { %v146_v17 = vmul.f32 %v1956_v16, %v134_v8  ;;  %v140_v18 = vmul.f32 %v1954_v7, %v139_v14  ;;  %vm152_vm3 = vweird.f32 %v1956_v16 }
  0xa4   :  { %vm153_vm5 = vmor %vm151_vm4, %vm152_vm3 }
  0xa5   :  { %v147_v19 = vmul.f32 %v1956_v16, %v146_v17  ;;  %v144_v21 = vsel %vm143_vm2, %v1954_v7, %v140_v18 }
  0xa6   :  { %v155_v22 = vmul.f32 %v144_v21, %v133_v5  ;;  %v165_v33 = vmul.f32 %v2382_v29, %v144_v21  ;;  %v2403_v5 = vstv %s1904_s28  ;;  %s1886_s28 = sshll.u32 %s2655_s7, 4  ;;  %s1887_s28 = int_to_ptr.hbm [resolvable:$true] %s1886_s28 }
  0xa7   :  { %v148_v23 = vmul.f32 0.5, %v147_v19 }
  0xa8   :  { %v158_v24 = vmul.f32 %v2379_v20, %v155_v22 }
  0xa9   :  { %v149_v25 = vsub.f32 1.5, %v148_v23 }
  0xaa   :  { %1957 = vtanh.f32 %v158_v24 }
  0xab   :  { %v150_v26 = vmul.f32 %v1956_v16, %v149_v25 }
  0xad   :  { %v154_v27 = vsel %vm153_vm5, %v1956_v16, %v150_v26 }
  0xae   :  { %v156_v28 = vmul.f32 %v154_v27, %v134_v8  ;;  %v166_v38 = vmul.f32 %v2382_v29, %v154_v27  ;;  %v2405_v8 = vstv %s1905_s29 }
  0xb0   :  { %v1958_v30 = vpop.eup %1957  ;;  %v159_v31 = vmul.f32 %v2379_v20, %v156_v28 }
  0xb1   :  { %v162_v32 = vmul.f32 %v1958_v30, %v125_v0 }
  0xb2   :  { %1959 = vtanh.f32 %v159_v31 }
  0xb3   :  { %v2386_v34 = vmul.f32 %v165_v33, %v162_v32 }
  0xb5   :  { %v169_v35 = vmul.f32 %v2386_v34, %v2386_v34 }
  0xb7   :  { %171 = vadd.xlane.f32.xlu1 %v169_v35 }
  0xb8   :  { %v1960_v36 = vpop.eup %1959 }
  0xb9   :  { %v163_v37 = vmul.f32 %v1960_v36, %v126_v2 }
  0xbb   :  { %v2391_v39 = vmul.f32 %v166_v38, %v163_v37 }
  0xbd   :  { %v170_v40 = vmul.f32 %v2391_v39, %v2391_v39 }
  0xbf   :  { %173 = vadd.xlane.f32.xlu1 %v170_v40 }
  0xc7   :  { %433 = vadd.xlane.f32.xlu1 %v432_v47 }
 0x12a   :  { %v172_v57 = vpop.xlane.xlu1 %171 }
 0x12b   :  { %v175_v58 = vmax.f32 %v172_v57, 1e-30  ;;  %vm198_vm10 = vcmp.gt.f32.partialorder %v172_v57, %v2405_v8 }
 0x12d   :  { %1961 = vrsqrt.f32 %v175_v58  ;;  %vm183_vm8 = vweird.f32 %v175_v58 }
 0x132   :  { %v174_v59 = vpop.xlane.xlu1 %173 }
 0x133   :  { %v1962_v60 = vpop.eup %1961  ;;  %v176_v61 = vmax.f32 %v174_v59, 1e-30  ;;  %vm199_vm14 = vcmp.gt.f32.partialorder %v174_v59, %v2405_v8 }
 0x134   :  { %v178_v62 = vmul.f32 %v1962_v60, %v175_v58  ;;  %vm184_vm7 = vweird.f32 %v1962_v60 }
 0x135   :  { %1963 = vrsqrt.f32 %v176_v61  ;;  %vm185_vm9 = vmor %vm183_vm8, %vm184_vm7  ;;  %vm193_vm12 = vweird.f32 %v176_v61 }
 0x136   :  { %v179_v63 = vmul.f32 %v1962_v60, %v178_v62 }
 0x138   :  { %v180_v0 = vmul.f32 0.5, %v179_v63 }
 0x13a   :  { %v181_v1 = vsub.f32 1.5, %v180_v0  ;;  %v434_v22 = vpop.xlane.xlu1 %433 }
 0x13b   :  { %v1964_v2 = vpop.eup %1963  ;;  %v435_v23 = vmax.f32 %v434_v22, 1e-30 }
 0x13c   :  { %v182_v3 = vmul.f32 %v1962_v60, %v181_v1  ;;  %v188_v4 = vmul.f32 %v1964_v2, %v176_v61  ;;  %vm194_vm11 = vweird.f32 %v1964_v2 }
 0x13d   :  { %vm195_vm13 = vmor %vm193_vm12, %vm194_vm11  ;;  %1965 = vrsqrt.f32 %v435_v23  ;;  %vm442_vm15 = vweird.f32 %v435_v23 }
 0x13e   :  { %v189_v6 = vmul.f32 %v1964_v2, %v188_v4  ;;  %v186_v7 = vsel %vm185_vm9, %v1962_v60, %v182_v3 }
 0x13f   :  { %v201_v9 = vmul.f32 %v2403_v5, %v186_v7 }
 0x140   :  { %v190_v10 = vmul.f32 0.5, %v189_v6 }
 0x141   :  { %v203_v11 = vmul.f32 %v201_v9, %v2386_v34 }
 0x142   :  { %v191_v12 = vsub.f32 1.5, %v190_v10 }
 0x143   :  { %v209_v13 = vsel %vm198_vm10, %v203_v11, %v2386_v34  ;;  %v1966_v24 = vpop.eup %1965 }
 0x144   :  { %v192_v14 = vmul.f32 %v1964_v2, %v191_v12  ;;  %280 = vmatmul.f32.vlgmr.msra.gmra.mxu0 %v209_v13  ;;  %v234_v21 = vmul.f32 %v209_v13, %v209_v13  ;;  %v437_v25 = vmul.f32 %v1966_v24, %v435_v23  ;;  %vm443_vm0 = vweird.f32 %v1966_v24 }
 0x145   :  { %vm444_vm1 = vmor %vm442_vm15, %vm443_vm0 }
 0x146   :  { %v196_v15 = vsel %vm195_vm13, %v1964_v2, %v192_v14  ;;  %v438_v26 = vmul.f32 %v1966_v24, %v437_v25 }
 0x147   :  { %v202_v16 = vmul.f32 %v2403_v5, %v196_v15 }
 0x148   :  { %v439_v27 = vmul.f32 0.5, %v438_v26 }
 0x149   :  { %v204_v17 = vmul.f32 %v202_v16, %v2391_v39 }
 0x14a   :  { %v440_v28 = vsub.f32 1.5, %v439_v27 }
 0x14b   :  { %v210_v18 = vsel %vm199_vm14, %v204_v17, %v2391_v39 }
 0x14c   :  { %283 = vmatmul.f32.gmra.mxu0 %v210_v18  ;;  %v235_v19 = vmul.f32 %v210_v18, %v210_v18  ;;  %v441_v30 = vmul.f32 %v1966_v24, %v440_v28 }
 0x14e   :  { %238 = vadd.xlane.f32.xlu2 %v235_v19  ;;  %v445_v31 = vsel %vm444_vm1, %v1966_v24, %v441_v30 }
 0x14f   :  { %v446_v32 = vmul.f32 %v445_v31, %v435_v23  ;;  %v450_v36 = vmul.f32 %v445_v31, %v2382_v29 }
 0x151   :  { %v447_v33 = vmul.f32 %v446_v32, %v2379_v20 }
 0x153   :  { %1967 = vtanh.f32 %v447_v33 }
 0x156   :  { %236 = vadd.xlane.f32.xlu2 %v234_v21 }
 0x159   :  { %v1968_v34 = vpop.eup %1967 }
 0x15a   :  { %v449_v35 = vmul.f32 %v1968_v34, %v2398_v44 }
 0x15c   :  { %v2420_v38 = vmul.f32 %v450_v36, %v449_v35 }
 0x15e   :  { %v452_v41 = vmul.f32 %v2420_v38, %v2420_v38 }
 0x160   :  { %v453_v43 = vsel %vm431_vm6, %v452_v41, 0.0 }
 0x1c1   :  { %v2418_v37 = vpop.f32.mrf.mxu0  ;;  %v239_v46 = vpop.xlane.xlu2 %238 }
 0x1c2   :  { %v375_v39 = vand.u32 2147483647, %v2418_v37  ;;  %v287_v40 = vmul.f32 %v2418_v37, %v2418_v37  ;;  %v241_v49 = vmax.f32 %v239_v46, 1e-30 }
 0x1c4   :  { %377 = vadd.xlane.f32.xlu1 %v375_v39  ;;  %289 = vadd.xlane.f32.xlu2 %v287_v40  ;;  %vm258_vm7 = vweird.f32 %v241_v49 }
 0x1c9   :  { %v2427_v42 = vpop.f32.mrf.mxu0  ;;  %v237_v47 = vpop.xlane.xlu2 %236 }
 0x1ca   :  { %v288_v44 = vmul.f32 %v2427_v42, %v2427_v42  ;;  %v376_v45 = vand.u32 2147483647, %v2427_v42  ;;  %v240_v48 = vmax.f32 %v237_v47, 1e-30 }
 0x1cc   :  { %291 = vadd.xlane.f32.xlu0 %v288_v44  ;;  %454 = vadd.xlane.f32.xlu2 %v453_v43  ;;  %1969 = vrsqrt.f32 %v240_v48  ;;  %vm248_vm3 = vweird.f32 %v240_v48 }
 0x1cd   :  { %1971 = vrsqrt.f32 %v241_v49 }
 0x1d2   :  { %v1970_v50 = vpop.eup %1969 }
 0x1d3   :  { %v243_v51 = vmul.f32 %v1970_v50, %v240_v48  ;;  %v1972_v53 = vpop.eup %1971  ;;  %vm249_vm2 = vweird.f32 %v1970_v50 }
 0x1d4   :  { %379 = vadd.xlane.f32.xlu0 %v376_v45  ;;  %v253_v54 = vmul.f32 %v1972_v53, %v241_v49  ;;  %vm250_vm4 = vmor %vm248_vm3, %vm249_vm2  ;;  %vm259_vm5 = vweird.f32 %v1972_v53 }
 0x1d5   :  { %v244_v52 = vmul.f32 %v1970_v50, %v243_v51  ;;  %vm260_vm8 = vmor %vm258_vm7, %vm259_vm5 }
 0x1d6   :  { %v254_v56 = vmul.f32 %v1972_v53, %v253_v54 }
 0x1d7   :  { %v245_v55 = vmul.f32 0.5, %v244_v52 }
 0x1d8   :  { %v255_v58 = vmul.f32 0.5, %v254_v56 }
 0x1d9   :  { %v246_v57 = vsub.f32 1.5, %v245_v55 }
 0x1da   :  { %v256_v60 = vsub.f32 1.5, %v255_v58 }
 0x1db   :  { %v247_v59 = vmul.f32 %v1970_v50, %v246_v57 }
 0x1dc   :  { %v257_v63 = vmul.f32 %v1972_v53, %v256_v60 }
 0x1dd   :  { %v2433_v61 = vsel %vm250_vm4, %v1970_v50, %v247_v59 }
 0x1de   :  { %v262_v62 = vmul.f32 %v2433_v61, %v240_v48  ;;  %v2437_v1 = vsel %vm260_vm8, %v1972_v53, %v257_v63 }
 0x1df   :  { %v263_v2 = vmul.f32 %v2437_v1, %v241_v49 }
 0x1e0   :  { %v319_v0 = vmul.f32 %v262_v62, %v2379_v20 }
 0x1e1   :  { %v320_v4 = vmul.f32 %v263_v2, %v2379_v20 }
 0x1e2   :  { %v1912_v3 = vclamps-f32 %v319_v0, 0.999999 }
 0x1e3   :  { %v1913_v7 = vclamps-f32 %v320_v4, 0.999999 }
 0x1e4   :  { %v327_v6 = vsub.f32 1.0, %v1912_v3  ;;  %v325_v28 = vadd.f32 1.0, %v1912_v3 }
 0x1e5   :  { %v328_v9 = vsub.f32 1.0, %v1913_v7  ;;  %v326_v45 = vadd.f32 1.0, %v1913_v7 }
 0x1e6   :  { %1973 = vrcp.f32 %v327_v6  ;;  %v340_v18 = vand.u32 2147483648, %v327_v6  ;;  %vm334_vm10 = vweird.f32 %v327_v6  ;;  %v338_v19 = vand.u32 2147483647, %v327_v6 }
 0x1e7   :  { %1975 = vrcp.f32 %v328_v9  ;;  %v355_v30 = vand.u32 2147483648, %v328_v9  ;;  %vm349_vm14 = vweird.f32 %v328_v9  ;;  %v353_v31 = vand.u32 2147483647, %v328_v9 }
 0x1e8   :  { %v341_v24 = vor.u32 1.1754944e-38, %v340_v18  ;;  %vm339_vm12 = vcmp.eq.f32.partialorder %v338_v19, 8.507059e+37 }
 0x1e9   :  { %v356_v39 = vor.u32 1.1754944e-38, %v355_v30  ;;  %vm354_vm0 = vcmp.eq.f32.partialorder %v353_v31, 8.507059e+37 }
 0x1ec   :  { %v1974_v10 = vpop.eup %1973 }
 0x1ed   :  { %v330_v11 = vmul.f32 %v1974_v10, %v327_v6  ;;  %v1976_v13 = vpop.eup %1975  ;;  %vm335_vm9 = vweird.f32 %v1974_v10 }
 0x1ee   :  { %v345_v14 = vmul.f32 %v1976_v13, %v328_v9  ;;  %vm336_vm11 = vmor %vm334_vm10, %vm335_vm9  ;;  %vm350_vm13 = vweird.f32 %v1976_v13 }
 0x1ef   :  { %v331_v12 = vsub.f32 1.0, %v330_v11  ;;  %vm351_vm15 = vmor %vm349_vm14, %vm350_vm13 }
 0x1f0   :  { %v346_v16 = vsub.f32 1.0, %v345_v14 }
 0x1f1   :  { %v332_v15 = vmul.f32 %v1974_v10, %v331_v12 }
 0x1f2   :  { %v347_v21 = vmul.f32 %v1976_v13, %v346_v16 }
 0x1f3   :  { %v333_v17 = vadd.f32 %v1974_v10, %v332_v15 }
 0x1f4   :  { %v348_v27 = vadd.f32 %v1976_v13, %v347_v21 }
 0x1f5   :  { %v337_v22 = vsel %vm336_vm11, %v1974_v10, %v333_v17 }
 0x1f6   :  { %v342_v26 = vsel %vm339_vm12, %v341_v24, %v337_v22  ;;  %v352_v33 = vsel %vm351_vm15, %v1976_v13, %v348_v27 }
 0x1f7   :  { %v343_v32 = vmul.f32 %v342_v26, %v325_v28  ;;  %v357_v44 = vsel %vm354_vm0, %v356_v39, %v352_v33 }
 0x1f8   :  { %v358_v47 = vmul.f32 %v357_v44, %v326_v45 }
 0x237   :  { %v290_v23 = vpop.xlane.xlu2 %289  ;;  %v378_v18 = vpop.xlane.xlu1 %377 }
 0x238   :  { %v293_v25 = vmax.f32 %v290_v23, 1e-30  ;;  %vm381_vm11 = vcmp.eq.f32.partialorder %v378_v18, 0.0 }
 0x23a   :  { %1977 = vrsqrt.f32 %v293_v25  ;;  %vm301_vm2 = vweird.f32 %v293_v25 }
 0x23b   :  { %1979 = vlog2.f32 %v343_v32 }
 0x23f   :  { %v292_v34 = vpop.xlane.xlu0 %291  ;;  %v2441_v35 = vpop.xlane.xlu2 %454 }
 0x240   :  { %v1978_v36 = vpop.eup %1977  ;;  %v294_v40 = vmax.f32 %v292_v34, 1e-30  ;;  %v456_v41 = vmax.f32 %v2441_v35, 1e-30  ;;  %vm467_vm13 = vcmp.gt.f32.partialorder %v2441_v35, %v2405_v8 }
 0x241   :  { %v296_v43 = vmul.f32 %v1978_v36, %v293_v25  ;;  %v1980_v49 = vpop.eup %1979  ;;  %vm302_vm1 = vweird.f32 %v1978_v36 }
 0x242   :  { %1981 = vrsqrt.f32 %v294_v40  ;;  %vm303_vm3 = vmor %vm301_vm2, %vm302_vm1  ;;  %v360_v55 = vmul.f32 0.6931472, %v1980_v49  ;;  %vm311_vm5 = vweird.f32 %v294_v40  ;;  %vm463_vm8 = vweird.f32 %v456_v41 }
 0x243   :  { %v297_v46 = vmul.f32 %v1978_v36, %v296_v43  ;;  %1983 = vrsqrt.f32 %v456_v41 }
 0x244   :  { %1985 = vlog2.f32 %v358_v47  ;;  %v363_v0 = vmul.f32 0.5, %v360_v55 }
 0x245   :  { %v298_v48 = vmul.f32 0.5, %v297_v46 }
 0x247   :  { %v299_v50 = vsub.f32 1.5, %v298_v48  ;;  %v380_v27 = vpop.xlane.xlu0 %379 }
 0x248   :  { %v1982_v51 = vpop.eup %1981  ;;  %vm382_vm12 = vcmp.eq.f32.partialorder %v380_v27, 0.0 }
 0x249   :  { %v1984_v52 = vpop.eup %1983  ;;  %v300_v53 = vmul.f32 %v1978_v36, %v299_v50  ;;  %v306_v54 = vmul.f32 %v1982_v51, %v294_v40  ;;  %vm312_vm4 = vweird.f32 %v1982_v51 }
 0x24a   :  { %v458_v56 = vmul.f32 %v1984_v52, %v456_v41  ;;  %v1986_v2 = vpop.eup %1985  ;;  %vm313_vm7 = vmor %vm311_vm5, %vm312_vm4  ;;  %vm464_vm9 = vweird.f32 %v1984_v52 }
 0x24b   :  { %v304_v57 = vsel %vm303_vm3, %v1978_v36, %v300_v53  ;;  %v307_v58 = vmul.f32 %v1982_v51, %v306_v54  ;;  %v362_v9 = vmul.f32 0.6931472, %v1986_v2  ;;  %vm465_vm10 = vmor %vm463_vm8, %vm464_vm9 }
 0x24c   :  { %v315_v59 = vmul.f32 %v304_v57, %v293_v25  ;;  %v459_v62 = vmul.f32 %v1984_v52, %v458_v56  ;;  %v371_v17 = vmul.f32 %v304_v57, %v2382_v29 }
 0x24d   :  { %v308_v60 = vmul.f32 0.5, %v307_v58  ;;  %v364_v14 = vmul.f32 0.5, %v362_v9 }
 0x24e   :  { %v317_v63 = vmul.f32 %v315_v59, %v2433_v61  ;;  %v460_v6 = vmul.f32 0.5, %v459_v62 }
 0x24f   :  { %v309_v3 = vsub.f32 1.5, %v308_v60 }
 0x250   :  { %v365_v4 = vmul.f32 %v363_v0, %v317_v63  ;;  %v461_v12 = vsub.f32 1.5, %v460_v6  ;;  %v511_v6 = vstv %s1906_s8 }
 0x251   :  { %v310_v7 = vmul.f32 %v1982_v51, %v309_v3 }
 0x252   :  { %1987 = vtanh.f32 %v365_v4  ;;  %v462_v19 = vmul.f32 %v1984_v52, %v461_v12 }
 0x253   :  { %v314_v10 = vsel %vm313_vm7, %v1982_v51, %v310_v7  ;;  %v491_v7 = vstv %s490_s11 }
 0x254   :  { %v316_v11 = vmul.f32 %v314_v10, %v294_v40  ;;  %v466_v23 = vsel %vm465_vm10, %v1984_v52, %v462_v19  ;;  %v372_v26 = vmul.f32 %v314_v10, %v2382_v29 }
 0x256   :  { %v318_v13 = vmul.f32 %v316_v11, %v2437_v1  ;;  %v468_v1 = vmul.f32 %v466_v23, %v2403_v5 }
 0x258   :  { %v1988_v61 = vpop.eup %1987  ;;  %v366_v15 = vmul.f32 %v364_v14, %v318_v13  ;;  %v469_v30 = vmul.f32 %v468_v1, %v2420_v38 }
 0x259   :  { %v369_v16 = vmul.f32 %v1988_v61, %v2418_v37 }
 0x25a   :  { %1989 = vtanh.f32 %v366_v15  ;;  %v472_v33 = vsel %vm467_vm13, %v469_v30, %v2420_v38 }
 0x25b   :  { %v373_v21 = vmul.f32 %v371_v17, %v369_v16  ;;  %v479_v34 = vmul.f32 %v472_v33, %v472_v33  ;;  %v2457_v54 = vperm.slane %v472_v33, 0  ;;  %v496_v17 = vstv %s211_s30 }
 0x25d   :  { %v387_v22 = vsel %vm381_vm11, 0.0, %v373_v21  ;;  %v480_v36 = vsel %vm431_vm6, %v479_v34, 0.0 }
 0x25e   :  { %v389_v24 = vmul.f32 %v387_v22, %v387_v22 }
 0x260   :  { %v1990_v25 = vpop.eup %1989  ;;  %391 = vadd.xlane.f32.xlu1 %v389_v24 }
 0x261   :  { %v370_v37 = vmul.f32 %v1990_v25, %v2427_v42 }
 0x263   :  { %v374_v28 = vmul.f32 %v372_v26, %v370_v37 }
 0x265   :  { %v388_v31 = vsel %vm382_vm12, 0.0, %v374_v28 }
 0x266   :  { %v390_v32 = vmul.f32 %v388_v31, %v388_v31 }
 0x268   :  { %393 = vadd.xlane.f32.xlu0 %v390_v32 }
 0x270   :  { %481 = vadd.xlane.f32.xlu0 %v480_v36 }
 0x2d3   :  { %v392_v39 = vpop.xlane.xlu1 %391 }
 0x2d4   :  { %v395_v40 = vmax.f32 %v392_v39, 1e-30  ;;  %vm417_vm1 = vcmp.gt.f32.partialorder %v392_v39, %v2405_v8 }
 0x2d6   :  { %1991 = vrsqrt.f32 %v395_v40  ;;  %vm403_vm15 = vweird.f32 %v395_v40 }
 0x2db   :  { %v394_v42 = vpop.xlane.xlu0 %393 }
 0x2dc   :  { %v1992_v41 = vpop.eup %1991  ;;  %v396_v43 = vmax.f32 %v394_v42, 1e-30  ;;  %vm418_vm5 = vcmp.gt.f32.partialorder %v394_v42, %v2405_v8 }
 0x2dd   :  { %v398_v44 = vmul.f32 %v1992_v41, %v395_v40  ;;  %vm404_vm14 = vweird.f32 %v1992_v41 }
 0x2de   :  { %1993 = vrsqrt.f32 %v396_v43  ;;  %vm405_vm0 = vmor %vm403_vm15, %vm404_vm14  ;;  %vm413_vm3 = vweird.f32 %v396_v43 }
 0x2df   :  { %v399_v45 = vmul.f32 %v1992_v41, %v398_v44 }
 0x2e1   :  { %v400_v46 = vmul.f32 0.5, %v399_v45 }
 0x2e3   :  { %v401_v35 = vsub.f32 1.5, %v400_v46  ;;  %v482_v4 = vpop.xlane.xlu0 %481 }
 0x2e4   :  { %v1994_v47 = vpop.eup %1993  ;;  %v514_v11 = vperm.slane %v482_v4, 0  ;;  %v497_v23 = vmul.f32 %v496_v17, %v482_v4 }
 0x2e5   :  { %v402_v48 = vmul.f32 %v1992_v41, %v401_v35  ;;  %v408_v38 = vmul.f32 %v1994_v47, %v396_v43  ;;  %vm414_vm2 = vweird.f32 %v1994_v47 }
 0x2e6   :  { %vm415_vm4 = vmor %vm413_vm3, %vm414_vm2  ;;  %v498_v26 = vperm.slane %v497_v23, 0 }
 0x2e7   :  { %v406_v49 = vsel %vm405_vm0, %v1992_v41, %v402_v48  ;;  %v409_v50 = vmul.f32 %v1994_v47, %v408_v38 }
 0x2e8   :  { %v419_v51 = vmul.f32 %v406_v49, %v2403_v5 }
 0x2e9   :  { %v410_v52 = vmul.f32 0.5, %v409_v50 }
 0x2ea   :  { %v421_v53 = vmul.f32 %v419_v51, %v387_v22 }
 0x2eb   :  { %v411_v55 = vsub.f32 1.5, %v410_v52 }
 0x2ec   :  { %v2460_v56 = vsel %vm417_vm1, %v421_v53, %v387_v22 }
 0x2ed   :  { %v412_v57 = vmul.f32 %v1994_v47, %v411_v55  ;;  %v484_v58 = vmul.f32 %v2457_v54, %v2460_v56  ;;  %v473_v3 = vmul.f32 %v2460_v56, %v2460_v56 }
 0x2ef   :  { %v416_v59 = vsel %vm415_vm4, %v1994_v47, %v412_v57  ;;  %486 = vadd.xlane.f32.xlu0 %v484_v58 }
 0x2f0   :  { %v420_v60 = vmul.f32 %v416_v59, %v2403_v5 }
 0x2f2   :  { %v422_v62 = vmul.f32 %v420_v60, %v388_v31 }
 0x2f4   :  { %v428_v63 = vsel %vm418_vm5, %v422_v62, %v388_v31 }
 0x2f5   :  { %v474_v0 = vmul.f32 %v428_v63, %v428_v63  ;;  %v485_v2 = vmul.f32 %v2457_v54, %v428_v63 }
 0x2f7   :  { %477 = vadd.xlane.f32.xlu2 %v474_v0  ;;  %488 = vadd.xlane.f32.xlu1 %v485_v2 }
 0x2ff   :  { %475 = vadd.xlane.f32.xlu2 %v473_v3 }
 0x362   :  { %v487_v15 = vpop.xlane.xlu0 %486 }
 0x363   :  { %v492_v18 = vmul.f32 %v491_v7, %v487_v15 }
 0x365   :  { %v494_v24 = vadd.f32 1.0, %v492_v18 }
 0x367   :  { %v499_v49 = vadd.f32 %v498_v26, %v494_v24 }
 0x369   :  { %v501_v59 = vmul.f32 %v499_v49, %v2460_v56 }
 0x36a   :  { %v478_v9 = vpop.xlane.xlu2 %477  ;;  %v489_v10 = vpop.xlane.xlu1 %488 }
 0x36b   :  { %v513_v12 = vmul.f32 %v511_v6, %v478_v9  ;;  %v493_v13 = vmul.f32 %v491_v7, %v489_v10  ;;  %v504_v27 = vmul.f32 %v496_v17, %v478_v9 }
 0x36d   :  { %v516_v14 = vmul.f32 %v514_v11, %v513_v12  ;;  %v495_v61 = vadd.f32 1.0, %v493_v13  ;;  %v506_v32 = vsub.f32 1.0, %v504_v27 }
 0x36f   :  { %v518_v16 = vadd.f32 %v516_v14, %v495_v61  ;;  %v500_v30 = vadd.f32 %v498_v26, %v495_v61  ;;  %v508_v41 = vmul.f32 %v506_v32, %v2457_v54 }
 0x371   :  { %v520_v19 = vmax.f32 %v518_v16, 1e-15  ;;  %v502_v39 = vmul.f32 %v500_v30, %v428_v63 }
 0x372   :  { %v476_v21 = vpop.xlane.xlu2 %475 }
 0x373   :  { %1995 = vrcp.f32 %v520_v19  ;;  %v512_v22 = vmul.f32 %v511_v6, %v476_v21  ;;  %v503_v34 = vmul.f32 %v496_v17, %v476_v21  ;;  %v547_v36 = vand.u32 2147483648, %v520_v19 }
 0x374   :  { %v545_v42 = vand.u32 2147483647, %v520_v19  ;;  %vm541_vm8 = vweird.f32 %v520_v19  ;;  %v510_v35 = vadd.f32 %v508_v41, %v502_v39 }
 0x375   :  { %v515_v25 = vmul.f32 %v514_v11, %v512_v22  ;;  %v505_v45 = vsub.f32 1.0, %v503_v34  ;;  %v548_v46 = vor.u32 1.1754944e-38, %v547_v36 }
 0x376   :  { %vm546_vm10 = vcmp.eq.f32.partialorder %v545_v42, 8.507059e+37 }
 0x377   :  { %v517_v1 = vadd.f32 %v515_v25, %v494_v24  ;;  %v507_v52 = vmul.f32 %v505_v45, %v2457_v54 }
 0x379   :  { %v1996_v37 = vpop.eup %1995  ;;  %v519_v28 = vmax.f32 %v517_v1, 1e-15  ;;  %v509_v63 = vadd.f32 %v507_v52, %v501_v59 }
 0x37a   :  { %v537_v31 = vmul.f32 %v1996_v37, %v520_v19  ;;  %vm542_vm7 = vweird.f32 %v1996_v37 }
 0x37b   :  { %1997 = vrcp.f32 %v519_v28  ;;  %vm543_vm9 = vmor %vm541_vm8, %vm542_vm7  ;;  %v532_v53 = vand.u32 2147483648, %v519_v28  ;;  %v530_v58 = vand.u32 2147483647, %v519_v28  ;;  %vm526_vm12 = vweird.f32 %v519_v28 }
 0x37c   :  { %v538_v33 = vsub.f32 1.0, %v537_v31 }
 0x37d   :  { %v533_v62 = vor.u32 1.1754944e-38, %v532_v53  ;;  %vm531_vm14 = vcmp.eq.f32.partialorder %v530_v58, 8.507059e+37 }
 0x37e   :  { %v539_v40 = vmul.f32 %v1996_v37, %v538_v33 }
 0x380   :  { %v540_v43 = vadd.f32 %v1996_v37, %v539_v40 }
 0x381   :  { %v1998_v44 = vpop.eup %1997 }
 0x382   :  { %v544_v47 = vsel %vm543_vm9, %v1996_v37, %v540_v43  ;;  %v522_v48 = vmul.f32 %v1998_v44, %v519_v28  ;;  %vm527_vm11 = vweird.f32 %v1998_v44 }
 0x383   :  { %v549_v38 = vsel %vm546_vm10, %v548_v46, %v544_v47  ;;  %vm528_vm13 = vmor %vm526_vm12, %vm527_vm11 }
 0x384   :  { %v550_v50 = vmul.f32 %v549_v38, %v510_v35  ;;  %v523_v51 = vsub.f32 1.0, %v522_v48 }
 0x386   :  { %v552_v55 = vmul.f32 %v550_v50, %v550_v50  ;;  %v524_v57 = vmul.f32 %v1998_v44, %v523_v51 }
 0x388   :  { %555 = vadd.xlane.f32.xlu1 %v552_v55  ;;  %v525_v60 = vadd.f32 %v1998_v44, %v524_v57 }
 0x38a   :  { %v529_v0 = vsel %vm528_vm13, %v1998_v44, %v525_v60 }
 0x38b   :  { %v534_v2 = vsel %vm531_vm14, %v533_v62, %v529_v0 }
 0x38c   :  { %v535_v3 = vmul.f32 %v534_v2, %v509_v63 }
 0x38e   :  { %v551_v4 = vmul.f32 %v535_v3, %v535_v3 }
 0x390   :  { %553 = vadd.xlane.f32.xlu2 %v551_v4 }
 0x3fb   :  { %v556_v54 = vpop.xlane.xlu1 %555 }
 0x3fc   :  { %v558_v6 = vmax.f32 %v556_v54, 1e-30  ;;  %vm580_vm2 = vcmp.gt.f32.partialorder %v556_v54, %v2405_v8 }
 0x3fe   :  { %1999 = vrsqrt.f32 %v558_v6  ;;  %vm575_vm0 = vweird.f32 %v558_v6 }
 0x403   :  { %v554_v7 = vpop.xlane.xlu2 %553 }
 0x404   :  { %v2000_v9 = vpop.eup %1999  ;;  %v557_v10 = vmax.f32 %v554_v7, 1e-30  ;;  %vm579_vm7 = vcmp.gt.f32.partialorder %v554_v7, %v2405_v8 }
 0x405   :  { %v570_v11 = vmul.f32 %v2000_v9, %v558_v6  ;;  %vm576_vm15 = vweird.f32 %v2000_v9 }
 0x406   :  { %2001 = vrsqrt.f32 %v557_v10  ;;  %vm577_vm1 = vmor %vm575_vm0, %vm576_vm15  ;;  %vm565_vm4 = vweird.f32 %v557_v10 }
 0x407   :  { %v571_v56 = vmul.f32 %v2000_v9, %v570_v11 }
 0x409   :  { %v572_v12 = vmul.f32 0.5, %v571_v56 }
 0x40b   :  { %v573_v13 = vsub.f32 1.5, %v572_v12 }
 0x40c   :  { %v2002_v14 = vpop.eup %2001 }
 0x40d   :  { %v574_v61 = vmul.f32 %v2000_v9, %v573_v13  ;;  %v560_v15 = vmul.f32 %v2002_v14, %v557_v10  ;;  %vm566_vm3 = vweird.f32 %v2002_v14 }
 0x40e   :  { %vm567_vm5 = vmor %vm565_vm4, %vm566_vm3 }
 0x40f   :  { %v578_v16 = vsel %vm577_vm1, %v2000_v9, %v574_v61  ;;  %v561_v17 = vmul.f32 %v2002_v14, %v560_v15 }
 0x410   :  { %v582_v18 = vmul.f32 %v578_v16, %v2403_v5 }
 0x411   :  { %v562_v19 = vmul.f32 0.5, %v561_v17 }
 0x412   :  { %v584_v21 = vmul.f32 %v582_v18, %v550_v50 }
 0x413   :  { %v563_v22 = vsub.f32 1.5, %v562_v19 }
 0x414   :  { %v2474_v23 = vsel %vm580_vm2, %v584_v21, %v550_v50 }
 0x415   :  { %v564_v24 = vmul.f32 %v2002_v14, %v563_v22  ;;  %v592_v25 = vmul.f32 %v2474_v23, %v2474_v23 }
 0x417   :  { %v568_v1 = vsel %vm567_vm5, %v2002_v14, %v564_v24  ;;  %595 = vadd.xlane.f32.xlu0 %v592_v25 }
 0x418   :  { %v581_v26 = vmul.f32 %v568_v1, %v2403_v5 }
 0x41a   :  { %v583_v27 = vmul.f32 %v581_v26, %v535_v3  ;;  %v1951_v26 = vld [vmem:[%s2653_s5] ss:$0 sm:$0xff] }
 0x41c   :  { %v2480_v37 = vsel %vm579_vm7, %v583_v27, %v535_v3 }
 0x41d   :  { %v591_v28 = vmul.f32 %v2480_v37, %v2480_v37 }
 0x41f   :  { %593 = vadd.xlane.f32.xlu1 %v591_v28 }
 0x48a   :  { %v596_v30 = vpop.xlane.xlu0 %595 }
 0x48b   :  { %v598_v31 = vmax.f32 %v596_v30, 1e-30 }
 0x48d   :  { %2003 = vrsqrt.f32 %v598_v31  ;;  %vm615_vm9 = vweird.f32 %v598_v31 }
 0x492   :  { %v594_v32 = vpop.xlane.xlu1 %593 }
 0x493   :  { %v2004_v33 = vpop.eup %2003  ;;  %v597_v34 = vmax.f32 %v594_v32, 1e-30 }
 0x494   :  { %v610_v36 = vmul.f32 %v2004_v33, %v598_v31  ;;  %vm616_vm8 = vweird.f32 %v2004_v33 }
 0x495   :  { %2005 = vrsqrt.f32 %v597_v34  ;;  %vm617_vm10 = vmor %vm615_vm9, %vm616_vm8  ;;  %vm605_vm12 = vweird.f32 %v597_v34 }
 0x496   :  { %v611_v39 = vmul.f32 %v2004_v33, %v610_v36 }
 0x498   :  { %v612_v40 = vmul.f32 0.5, %v611_v39  ;;  %v701_v39 = vld [vmem:[#allocation11] sm:$0x1] }
 0x49a   :  { %v613_v42 = vsub.f32 1.5, %v612_v40 }
 0x49b   :  { %v2006_v41 = vpop.eup %2005 }
 0x49c   :  { %v600_v43 = vmul.f32 %v2006_v41, %v597_v34  ;;  %v614_v44 = vmul.f32 %v2004_v33, %v613_v42  ;;  %vm606_vm11 = vweird.f32 %v2006_v41 }
 0x49d   :  { %vm607_vm13 = vmor %vm605_vm12, %vm606_vm11 }
 0x49e   :  { %v601_v45 = vmul.f32 %v2006_v41, %v600_v43  ;;  %v618_v46 = vsel %vm617_vm10, %v2004_v33, %v614_v44  ;;  %v725_v44 = vstv %s1911_s2 }
 0x49f   :  { %v620_v35 = vmul.f32 %v618_v46, %v598_v31  ;;  %v670_v1 = vmul.f32 %v618_v46, %v2382_v29 }
 0x4a0   :  { %v602_v47 = vmul.f32 0.5, %v601_v45 }
 0x4a1   :  { %v622_v48 = vmul.f32 %v620_v35, %v2379_v20 }
 0x4a2   :  { %v603_v38 = vsub.f32 1.5, %v602_v47 }
 0x4a3   :  { %v1915_v49 = vclamps-f32 %v622_v48, 0.999999 }
 0x4a4   :  { %v604_v50 = vmul.f32 %v2006_v41, %v603_v38 }
 0x4a5   :  { %v630_v51 = vsub.f32 1.0, %v1915_v49  ;;  %v628_v6 = vadd.f32 1.0, %v1915_v49 }
 0x4a6   :  { %v608_v52 = vsel %vm607_vm13, %v2006_v41, %v604_v50 }
 0x4a7   :  { %2007 = vrcp.f32 %v630_v51  ;;  %v619_v53 = vmul.f32 %v608_v52, %v597_v34  ;;  %v657_v63 = vand.u32 2147483648, %v630_v51  ;;  %v655_v2 = vand.u32 2147483647, %v630_v51 }
 0x4a8   :  { %vm651_vm15 = vweird.f32 %v630_v51  ;;  %v669_v34 = vmul.f32 %v608_v52, %v2382_v29 }
 0x4a9   :  { %v621_v55 = vmul.f32 %v619_v53, %v2379_v20  ;;  %v658_v4 = vor.u32 1.1754944e-38, %v657_v63  ;;  %vm656_vm1 = vcmp.eq.f32.partialorder %v655_v2, 8.507059e+37 }
 0x4ab   :  { %v1914_v57 = vclamps-f32 %v621_v55, 0.999999 }
 0x4ad   :  { %v2008_v58 = vpop.eup %2007  ;;  %v629_v60 = vsub.f32 1.0, %v1914_v57  ;;  %v627_v16 = vadd.f32 1.0, %v1914_v57 }
 0x4ae   :  { %v647_v59 = vmul.f32 %v2008_v58, %v630_v51  ;;  %vm652_vm14 = vweird.f32 %v2008_v58 }
 0x4af   :  { %2009 = vrcp.f32 %v629_v60  ;;  %vm653_vm0 = vmor %vm651_vm15, %vm652_vm14  ;;  %v642_v12 = vand.u32 2147483648, %v629_v60  ;;  %v640_v14 = vand.u32 2147483647, %v629_v60  ;;  %vm636_vm3 = vweird.f32 %v629_v60 }
 0x4b0   :  { %v648_v62 = vsub.f32 1.0, %v647_v59 }
 0x4b1   :  { %v643_v15 = vor.u32 1.1754944e-38, %v642_v12  ;;  %vm641_vm5 = vcmp.eq.f32.partialorder %v640_v14, 8.507059e+37 }
 0x4b2   :  { %v649_v0 = vmul.f32 %v2008_v58, %v648_v62 }
 0x4b4   :  { %v650_v3 = vadd.f32 %v2008_v58, %v649_v0 }
 0x4b5   :  { %v2010_v54 = vpop.eup %2009 }
 0x4b6   :  { %v654_v7 = vsel %vm653_vm0, %v2008_v58, %v650_v3  ;;  %v632_v10 = vmul.f32 %v2010_v54, %v629_v60  ;;  %vm637_vm2 = vweird.f32 %v2010_v54  ;;  %v103_v3 = vld [vmem:[#allocation8] sm:$0xff] }
 0x4b7   :  { %v659_v9 = vsel %vm656_vm1, %v658_v4, %v654_v7  ;;  %vm638_vm4 = vmor %vm636_vm3, %vm637_vm2 }
 0x4b8   :  { %v660_v11 = vmul.f32 %v659_v9, %v628_v6  ;;  %v633_v56 = vsub.f32 1.0, %v632_v10 }
 0x4ba   :  { %2011 = vlog2.f32 %v660_v11  ;;  %v634_v13 = vmul.f32 %v2010_v54, %v633_v56 }
 0x4bc   :  { %v635_v61 = vadd.f32 %v2010_v54, %v634_v13  ;;  %v104_v13 = vld [vmem:[#allocation8 + $0x8] sm:$0xff] }
 0x4be   :  { %v639_v17 = vsel %vm638_vm4, %v2010_v54, %v635_v61 }
 0x4bf   :  { %v644_v19 = vsel %vm641_vm5, %v643_v15, %v639_v17 }
 0x4c0   :  { %v2012_v18 = vpop.eup %2011  ;;  %v645_v22 = vmul.f32 %v644_v19, %v627_v16 }
 0x4c1   :  { %v664_v21 = vmul.f32 0.6931472, %v2012_v18 }
 0x4c2   :  { %2013 = vlog2.f32 %v645_v22 }
 0x4c3   :  { %v666_v24 = vmul.f32 0.5, %v664_v21 }
 0x4c5   :  { %v668_v25 = vmul.f32 %v666_v24, %v2474_v23 }
 0x4c7   :  { %v672_v27 = vmul.f32 %v670_v1, %v668_v25 }
 0x4c8   :  { %v2014_v28 = vpop.eup %2013 }
 0x4c9   :  { %716 = vmatpush.xpose.msra.mxu1 %v672_v27  ;;  %782 = vmatpush.msra.mxu2 %v672_v27  ;;  %v696_v30 = vmul.f32 %v1951_v26, %v672_v27  ;;  %v662_v31 = vmul.f32 0.6931472, %v2014_v28 }
 0x4cb   :  { %699 = vadd.xlane.f32.xlu0 %v696_v30  ;;  %v665_v32 = vmul.f32 0.5, %v662_v31 }
 0x4cd   :  { %v667_v33 = vmul.f32 %v665_v32, %v2480_v37 }
 0x4cf   :  { %v671_v36 = vmul.f32 %v669_v34, %v667_v33 }
 0x4d1   :  { %717 = vmatpush.xpose.msra.mxu1 %v671_v36  ;;  %783 = vmatpush.msra.mxu2 %v671_v36  ;;  %v695_v23 = vmul.f32 %v1951_v26, %v671_v36 }
 0x4d3   :  { %697 = vadd.xlane.f32.xlu2 %v695_v23 }
 0x4d4   :  { %718 = vmatmul.f32.vlgmr.msra.gmra.mxu1 %v701_v39 }
 0x53e   :  { %v700_v41 = vpop.xlane.xlu0 %699 }
 0x546   :  { %v698_v43 = vpop.xlane.xlu2 %697 }
 0x551   :  { %v719_v40 = vpop.f32.mrf.mxu1 }
 0x552   :  { %v722_v42 = vperm.slane %v719_v40, 0 }
 0x554   :  { %v723_v45 = vadd.f32 %v722_v42, %v698_v43  ;;  %v724_v46 = vadd.f32 %v722_v42, %v700_v41 }
 0x556   :  { %v726_v35 = vadd.f32 %v725_v44, %v723_v45  ;;  %v727_v47 = vadd.f32 %v725_v44, %v724_v46 }
 0x558   :  { %v1916_v37 = vmul.f32 -1.442695, %v726_v35  ;;  %v1917_v48 = vmul.f32 -1.442695, %v727_v47 }
 0x55a   :  { %2015 = vpow2.f32 %v1916_v37 }
 0x55b   :  { %2017 = vpow2.f32 %v1917_v48 }
 0x560   :  { %v2016_v38 = vpop.eup %2015 }
 0x561   :  { %v2018_v49 = vpop.eup %2017  ;;  %v734_v50 = vadd.f32 1.0, %v2016_v38 }
 0x562   :  { %v735_v51 = vadd.f32 1.0, %v2018_v49 }
 0x563   :  { %2019 = vrcp.f32 %v734_v50  ;;  %v747_v59 = vand.u32 2147483648, %v734_v50  ;;  %v745_v63 = vand.u32 2147483647, %v734_v50  ;;  %vm741_vm8 = vweird.f32 %v734_v50 }
 0x564   :  { %2021 = vrcp.f32 %v735_v51  ;;  %v762_v9 = vand.u32 2147483648, %v735_v51  ;;  %vm756_vm12 = vweird.f32 %v735_v51  ;;  %v760_v11 = vand.u32 2147483647, %v735_v51 }
 0x565   :  { %v748_v4 = vor.u32 1.1754944e-38, %v747_v59  ;;  %vm746_vm10 = vcmp.eq.f32.partialorder %v745_v63, 8.507059e+37 }
 0x566   :  { %v763_v12 = vor.u32 1.1754944e-38, %v762_v9  ;;  %vm761_vm14 = vcmp.eq.f32.partialorder %v760_v11, 8.507059e+37 }
 0x569   :  { %v2020_v52 = vpop.eup %2019 }
 0x56a   :  { %v2022_v53 = vpop.eup %2021  ;;  %v737_v55 = vmul.f32 %v2020_v52, %v734_v50  ;;  %vm742_vm7 = vweird.f32 %v2020_v52 }
 0x56b   :  { %v752_v57 = vmul.f32 %v2022_v53, %v735_v51  ;;  %vm743_vm9 = vmor %vm741_vm8, %vm742_vm7  ;;  %vm757_vm11 = vweird.f32 %v2022_v53 }
 0x56c   :  { %v738_v58 = vsub.f32 1.0, %v737_v55  ;;  %vm758_vm13 = vmor %vm756_vm12, %vm757_vm11 }
 0x56d   :  { %v753_v60 = vsub.f32 1.0, %v752_v57 }
 0x56e   :  { %v739_v62 = vmul.f32 %v2020_v52, %v738_v58 }
 0x56f   :  { %v754_v0 = vmul.f32 %v2022_v53, %v753_v60 }
 0x570   :  { %v740_v2 = vadd.f32 %v2020_v52, %v739_v62 }
 0x571   :  { %v755_v6 = vadd.f32 %v2022_v53, %v754_v0 }
 0x572   :  { %v744_v54 = vsel %vm743_vm9, %v2020_v52, %v740_v2 }
 0x573   :  { %v749_v7 = vsel %vm746_vm10, %v748_v4, %v744_v54  ;;  %v759_v56 = vsel %vm758_vm13, %v2022_v53, %v755_v6 }
 0x574   :  { %v766_v10 = vmul.f32 %v749_v7, %v103_v3  ;;  %v764_v14 = vsel %vm761_vm14, %v763_v12, %v759_v56 }
 0x575   :  { %v767_v61 = vmul.f32 %v764_v14, %v104_v13 }
 0x576   :  { %784 = vmatmul.f32.vlgmr.msra.gmra.mxu2 %v766_v10 }
 0x57e   :  { %787 = vmatmul.f32.gmra.mxu2 %v767_v61 }
 0x5f9   :  { %v785_v15 = vpop.f32.mrf.mxu2 }
 0x5fa   :  { %v791_v16 = vmul.f32 %v785_v15, %v785_v15 }
 0x5fc   :  { %793 = vadd.xlane.f32.xlu1 %v791_v16 }
 0x601   :  { %v788_v17 = vpop.f32.mrf.mxu2 }
 0x602   :  { %v792_v18 = vmul.f32 %v788_v17, %v788_v17 }
 0x604   :  { %795 = vadd.xlane.f32.xlu2 %v792_v18 }
 0x66f   :  { %v794_v19 = vpop.xlane.xlu1 %793 }
 0x670   :  { %v797_v21 = vmax.f32 %v794_v19, 1e-30 }
 0x672   :  { %2023 = vrsqrt.f32 %v797_v21  ;;  %vm805_vm0 = vweird.f32 %v797_v21 }
 0x677   :  { %v796_v22 = vpop.xlane.xlu2 %795 }
 0x678   :  { %v2024_v24 = vpop.eup %2023  ;;  %v798_v25 = vmax.f32 %v796_v22, 1e-30 }
 0x679   :  { %v800_v1 = vmul.f32 %v2024_v24, %v797_v21  ;;  %vm806_vm15 = vweird.f32 %v2024_v24 }
 0x67a   :  { %2025 = vrsqrt.f32 %v798_v25  ;;  %vm807_vm1 = vmor %vm805_vm0, %vm806_vm15  ;;  %vm815_vm3 = vweird.f32 %v798_v25 }
 0x67b   :  { %v801_v26 = vmul.f32 %v2024_v24, %v800_v1 }
 0x67d   :  { %v802_v27 = vmul.f32 0.5, %v801_v26 }
 0x67f   :  { %v803_v28 = vsub.f32 1.5, %v802_v27 }
 0x680   :  { %v2026_v30 = vpop.eup %2025 }
 0x681   :  { %v804_v31 = vmul.f32 %v2024_v24, %v803_v28  ;;  %v810_v32 = vmul.f32 %v2026_v30, %v798_v25  ;;  %vm816_vm2 = vweird.f32 %v2026_v30 }
 0x682   :  { %vm817_vm4 = vmor %vm815_vm3, %vm816_vm2 }
 0x683   :  { %v808_v33 = vsel %vm807_vm1, %v2024_v24, %v804_v31  ;;  %v811_v34 = vmul.f32 %v2026_v30, %v810_v32 }
 0x684   :  { %v819_v36 = vmul.f32 %v808_v33, %v797_v21  ;;  %v827_v35 = vmul.f32 %v808_v33, %v2382_v29 }
 0x685   :  { %v812_v23 = vmul.f32 0.5, %v811_v34 }
 0x686   :  { %v821_v39 = vmul.f32 %v819_v36, %v2379_v20 }
 0x687   :  { %v813_v40 = vsub.f32 1.5, %v812_v23 }
 0x688   :  { %2027 = vtanh.f32 %v821_v39 }
 0x689   :  { %v814_v42 = vmul.f32 %v2026_v30, %v813_v40 }
 0x68b   :  { %v818_v41 = vsel %vm817_vm4, %v2026_v30, %v814_v42 }
 0x68c   :  { %v820_v43 = vmul.f32 %v818_v41, %v798_v25  ;;  %v828_v49 = vmul.f32 %v818_v41, %v2382_v29 }
 0x68e   :  { %v2028_v44 = vpop.eup %2027  ;;  %v822_v45 = vmul.f32 %v820_v43, %v2379_v20 }
 0x68f   :  { %v825_v46 = vmul.f32 %v2028_v44, %v785_v15 }
 0x690   :  { %2029 = vtanh.f32 %v822_v45 }
 0x691   :  { %v829_v47 = vmul.f32 %v827_v35, %v825_v46 }
 0x693   :  { %v831_v37 = vmul.f32 %v829_v47, %v829_v47 }
 0x695   :  { %833 = vadd.xlane.f32.xlu0 %v831_v37 }
 0x696   :  { %v2030_v48 = vpop.eup %2029 }
 0x697   :  { %v826_v38 = vmul.f32 %v2030_v48, %v788_v17 }
 0x699   :  { %v830_v50 = vmul.f32 %v828_v49, %v826_v38 }
 0x69b   :  { %v832_v51 = vmul.f32 %v830_v50, %v830_v50 }
 0x69d   :  { %835 = vadd.xlane.f32.xlu1 %v832_v51 }
 0x708   :  { %v834_v52 = vpop.xlane.xlu0 %833 }
 0x709   :  { %v837_v53 = vmax.f32 %v834_v52, 1e-30  ;;  %vm859_vm9 = vcmp.gt.f32.partialorder %v834_v52, %v2405_v8 }
 0x70b   :  { %2031 = vrsqrt.f32 %v837_v53  ;;  %vm845_vm7 = vweird.f32 %v837_v53 }
 0x710   :  { %v836_v55 = vpop.xlane.xlu1 %835 }
 0x711   :  { %v2032_v57 = vpop.eup %2031  ;;  %v838_v58 = vmax.f32 %v836_v55, 1e-30  ;;  %vm860_vm13 = vcmp.gt.f32.partialorder %v836_v55, %v2405_v8 }
 0x712   :  { %v840_v59 = vmul.f32 %v2032_v57, %v837_v53  ;;  %vm846_vm5 = vweird.f32 %v2032_v57 }
 0x713   :  { %2033 = vrsqrt.f32 %v838_v58  ;;  %vm847_vm8 = vmor %vm845_vm7, %vm846_vm5  ;;  %vm855_vm11 = vweird.f32 %v838_v58 }
 0x714   :  { %v841_v60 = vmul.f32 %v2032_v57, %v840_v59 }
 0x716   :  { %v842_v62 = vmul.f32 0.5, %v841_v60 }
 0x718   :  { %v843_v63 = vsub.f32 1.5, %v842_v62 }
 0x719   :  { %v2034_v0 = vpop.eup %2033 }
 0x71a   :  { %v844_v2 = vmul.f32 %v2032_v57, %v843_v63  ;;  %v850_v3 = vmul.f32 %v2034_v0, %v838_v58  ;;  %vm856_vm10 = vweird.f32 %v2034_v0 }
 0x71b   :  { %vm857_vm12 = vmor %vm855_vm11, %vm856_vm10 }
 0x71c   :  { %v848_v4 = vsel %vm847_vm8, %v2032_v57, %v844_v2  ;;  %v851_v54 = vmul.f32 %v2034_v0, %v850_v3 }
 0x71d   :  { %v861_v6 = vmul.f32 %v848_v4, %v2403_v5 }
 0x71e   :  { %v852_v7 = vmul.f32 0.5, %v851_v54 }
 0x71f   :  { %v863_v9 = vmul.f32 %v861_v6, %v829_v47 }
 0x720   :  { %v853_v10 = vsub.f32 1.5, %v852_v7 }
 0x721   :  { %v2499_v11 = vsel %vm859_vm9, %v863_v9, %v829_v47 }
 0x722   :  { %v854_v56 = vmul.f32 %v2034_v0, %v853_v10  ;;  %v871_v12 = vmul.f32 %v2499_v11, %v2499_v11 }
 0x724   :  { %v858_v13 = vsel %vm857_vm12, %v2034_v0, %v854_v56  ;;  %873 = vadd.xlane.f32.xlu2 %v871_v12 }
 0x725   :  { %v862_v14 = vmul.f32 %v858_v13, %v2403_v5 }
 0x727   :  { %v864_v61 = vmul.f32 %v862_v14, %v830_v50 }
 0x729   :  { %v2505_v15 = vsel %vm860_vm13, %v864_v61, %v830_v50 }
 0x72a   :  { %v872_v16 = vmul.f32 %v2505_v15, %v2505_v15 }
 0x72c   :  { %875 = vadd.xlane.f32.xlu0 %v872_v16 }
 0x797   :  { %v874_v17 = vpop.xlane.xlu2 %873 }
 0x798   :  { %v877_v18 = vmax.f32 %v874_v17, 1e-30 }
 0x79a   :  { %2035 = vrsqrt.f32 %v877_v18  ;;  %vm885_vm15 = vweird.f32 %v877_v18 }
 0x79f   :  { %v876_v19 = vpop.xlane.xlu0 %875 }
 0x7a0   :  { %v2036_v21 = vpop.eup %2035  ;;  %v878_v22 = vmax.f32 %v876_v19, 1e-30 }
 0x7a1   :  { %v880_v24 = vmul.f32 %v2036_v21, %v877_v18  ;;  %vm886_vm14 = vweird.f32 %v2036_v21 }
 0x7a2   :  { %2037 = vrsqrt.f32 %v878_v22  ;;  %vm887_vm0 = vmor %vm885_vm15, %vm886_vm14  ;;  %vm895_vm2 = vweird.f32 %v878_v22 }
 0x7a3   :  { %v881_v25 = vmul.f32 %v2036_v21, %v880_v24 }
 0x7a5   :  { %v882_v1 = vmul.f32 0.5, %v881_v25 }
 0x7a7   :  { %v883_v5 = vsub.f32 1.5, %v882_v1 }
 0x7a8   :  { %v2038_v26 = vpop.eup %2037 }
 0x7a9   :  { %v884_v8 = vmul.f32 %v2036_v21, %v883_v5  ;;  %v890_v27 = vmul.f32 %v2038_v26, %v878_v22  ;;  %vm896_vm1 = vweird.f32 %v2038_v26 }
 0x7aa   :  { %vm897_vm3 = vmor %vm895_vm2, %vm896_vm1 }
 0x7ab   :  { %v888_v28 = vsel %vm887_vm0, %v2036_v21, %v884_v8  ;;  %v891_v30 = vmul.f32 %v2038_v26, %v890_v27  ;;  %v1065_v27 = vld [vmem:[#allocation10 + $0xf0] sm:$0xff] }
 0x7ac   :  { %v899_v31 = vmul.f32 %v888_v28, %v877_v18  ;;  %v949_v9 = vmul.f32 %v888_v28, %v2382_v29 }
 0x7ad   :  { %v892_v32 = vmul.f32 0.5, %v891_v30  ;;  %v1064_v30 = vld [vmem:[#allocation10 + $0xe8] sm:$0xff] }
 0x7ae   :  { %v901_v33 = vmul.f32 %v899_v31, %v2379_v20 }
 0x7af   :  { %v893_v34 = vsub.f32 1.5, %v892_v32 }
 0x7b0   :  { %v1918_v36 = vclamps-f32 %v901_v33, 0.999999 }
 0x7b1   :  { %v894_v23 = vmul.f32 %v2038_v26, %v893_v34  ;;  %v2515_v34 = vstv %s1907_s14 }
 0x7b2   :  { %v909_v39 = vsub.f32 1.0, %v1918_v36  ;;  %v907_v51 = vadd.f32 1.0, %v1918_v36 }
 0x7b3   :  { %v898_v40 = vsel %vm897_vm3, %v2038_v26, %v894_v23 }
 0x7b4   :  { %2039 = vrcp.f32 %v909_v39  ;;  %v900_v42 = vmul.f32 %v898_v40, %v878_v22  ;;  %v922_v47 = vand.u32 2147483648, %v909_v39  ;;  %v920_v48 = vand.u32 2147483647, %v909_v39 }
 0x7b5   :  { %vm916_vm5 = vweird.f32 %v909_v39  ;;  %v950_v61 = vmul.f32 %v898_v40, %v2382_v29 }
 0x7b6   :  { %v902_v41 = vmul.f32 %v900_v42, %v2379_v20  ;;  %v923_v49 = vor.u32 1.1754944e-38, %v922_v47  ;;  %vm921_vm8 = vcmp.eq.f32.partialorder %v920_v48, 8.507059e+37 }
 0x7b8   :  { %v1919_v43 = vclamps-f32 %v902_v41, 0.999999 }
 0x7ba   :  { %v2040_v44 = vpop.eup %2039  ;;  %v910_v46 = vsub.f32 1.0, %v1919_v43  ;;  %v908_v0 = vadd.f32 1.0, %v1919_v43 }
 0x7bb   :  { %v912_v45 = vmul.f32 %v2040_v44, %v909_v39  ;;  %vm917_vm4 = vweird.f32 %v2040_v44 }
 0x7bc   :  { %2041 = vrcp.f32 %v910_v46  ;;  %vm918_vm7 = vmor %vm916_vm5, %vm917_vm4  ;;  %v937_v58 = vand.u32 2147483648, %v910_v46  ;;  %v935_v60 = vand.u32 2147483647, %v910_v46  ;;  %vm931_vm10 = vweird.f32 %v910_v46 }
 0x7bd   :  { %v913_v35 = vsub.f32 1.0, %v912_v45  ;;  %v2518_v45 = vstv %s1908_s15 }
 0x7be   :  { %v938_v63 = vor.u32 1.1754944e-38, %v937_v58  ;;  %vm936_vm12 = vcmp.eq.f32.partialorder %v935_v60, 8.507059e+37  ;;  %v1061_v58 = vld [vmem:[#allocation10 + $0xd0] sm:$0xff]  ;;  %v1059_v60 = vld [vmem:[#allocation10 + $0xc0] sm:$0xff] }
 0x7bf   :  { %v914_v37 = vmul.f32 %v2040_v44, %v913_v35 }
 0x7c1   :  { %v915_v38 = vadd.f32 %v2040_v44, %v914_v37 }
 0x7c2   :  { %v2042_v50 = vpop.eup %2041 }
 0x7c3   :  { %v919_v52 = vsel %vm918_vm7, %v2040_v44, %v915_v38  ;;  %v927_v20 = vmul.f32 %v2042_v50, %v910_v46  ;;  %vm932_vm9 = vweird.f32 %v2042_v50 }
 0x7c4   :  { %v924_v53 = vsel %vm921_vm8, %v923_v49, %v919_v52  ;;  %vm933_vm11 = vmor %vm931_vm10, %vm932_vm9 }
 0x7c5   :  { %v925_v55 = vmul.f32 %v924_v53, %v907_v51  ;;  %v928_v57 = vsub.f32 1.0, %v927_v20 }
 0x7c7   :  { %2043 = vlog2.f32 %v925_v55  ;;  %v929_v59 = vmul.f32 %v2042_v50, %v928_v57  ;;  %v1063_v55 = vld [vmem:[#allocation10 + $0xe0] sm:$0xff]  ;;  %v1062_v57 = vld [vmem:[#allocation10 + $0xd8] sm:$0xff] }
 0x7c9   :  { %v930_v62 = vadd.f32 %v2042_v50, %v929_v59  ;;  %v1060_v59 = vld [vmem:[#allocation10 + $0xc8] sm:$0xff] }
 0x7cb   :  { %v934_v2 = vsel %vm933_vm11, %v2042_v50, %v930_v62  ;;  %v1058_v62 = vld [vmem:[#allocation10 + $0xb8] sm:$0xff] }
 0x7cc   :  { %v939_v4 = vsel %vm936_vm12, %v938_v63, %v934_v2  ;;  %v1057_v63 = vld [vmem:[#allocation10 + $0xb0] sm:$0xff]  ;;  %v1055_v2 = vld [vmem:[#allocation10 + $0xa0] sm:$0xff] }
 0x7cd   :  { %v2044_v3 = vpop.eup %2043  ;;  %v940_v54 = vmul.f32 %v939_v4, %v908_v0  ;;  %v1056_v0 = vld [vmem:[#allocation10 + $0xa8] sm:$0xff]  ;;  %v1053_v4 = vld [vmem:[#allocation10 + $0x90] sm:$0xff] }
 0x7ce   :  { %v942_v6 = vmul.f32 0.6931472, %v2044_v3  ;;  %v1054_v3 = vld [vmem:[#allocation10 + $0x98] sm:$0xff] }
 0x7cf   :  { %2045 = vlog2.f32 %v940_v54  ;;  %v1052_v54 = vld [vmem:[#allocation10 + $0x88] sm:$0xff] }
 0x7d0   :  { %v945_v7 = vmul.f32 0.5, %v942_v6  ;;  %v1051_v6 = vld [vmem:[#allocation10 + $0x80] sm:$0xff] }
 0x7d2   :  { %v947_v10 = vmul.f32 %v945_v7, %v2499_v11 }
 0x7d4   :  { %v951_v56 = vmul.f32 %v949_v9, %v947_v10 }
 0x7d5   :  { %v2046_v12 = vpop.eup %2045 }
 0x7d6   :  { %2047 = vtanh.f32 %v951_v56  ;;  %v944_v13 = vmul.f32 0.6931472, %v2046_v12 }
 0x7d8   :  { %v946_v14 = vmul.f32 0.5, %v944_v13 }
 0x7da   :  { %v948_v16 = vmul.f32 %v946_v14, %v2505_v15  ;;  %v1066_v15 = vld [vmem:[#allocation10 + $0xf8] sm:$0xff] }
 0x7db   :  { %1097 = vmatpush.msra.mxu3 %v1066_v15 }
 0x7dc   :  { %v2048_v17 = vpop.eup %2047  ;;  %v952_v19 = vmul.f32 %v950_v61, %v948_v16 }
 0x7dd   :  { %v955_v18 = vmul.f32 %v2048_v17, %v2048_v17  ;;  %1098 = vmatpush.msra.mxu3 %v1065_v27 }
 0x7de   :  { %2049 = vtanh.f32 %v952_v19  ;;  %v2531_v19 = vstv %s1909_s16 }
 0x7df   :  { %957 = vadd.xlane.f32.xlu1 %v955_v18  ;;  %1099 = vmatpush.msra.mxu3 %v1064_v30 }
 0x7e1   :  { %1100 = vmatpush.msra.mxu3 %v1063_v55 }
 0x7e3   :  { %1101 = vmatpush.msra.mxu3 %v1062_v57 }
 0x7e4   :  { %v2050_v21 = vpop.eup %2049 }
 0x7e5   :  { %v956_v22 = vmul.f32 %v2050_v21, %v2050_v21  ;;  %1102 = vmatpush.msra.mxu3 %v1061_v58 }
 0x7e7   :  { %959 = vadd.xlane.f32.xlu2 %v956_v22  ;;  %1103 = vmatpush.msra.mxu3 %v1060_v59 }
 0x7e9   :  { %1104 = vmatpush.msra.mxu3 %v1059_v60 }
 0x7eb   :  { %1105 = vmatpush.msra.mxu3 %v1058_v62 }
 0x7ed   :  { %1106 = vmatpush.msra.mxu3 %v1057_v63 }
 0x7ef   :  { %1107 = vmatpush.msra.mxu3 %v1056_v0 }
 0x7f1   :  { %1108 = vmatpush.msra.mxu3 %v1055_v2 }
 0x7f3   :  { %1109 = vmatpush.msra.mxu3 %v1054_v3 }
 0x7f5   :  { %1110 = vmatpush.msra.mxu3 %v1053_v4 }
 0x7f7   :  { %1111 = vmatpush.msra.mxu3 %v1052_v54 }
 0x7f9   :  { %1112 = vmatpush.msra.mxu3 %v1051_v6 }
 0x852   :  { %v958_v24 = vpop.xlane.xlu1 %957 }
 0x853   :  { %v961_v25 = vmax.f32 %v958_v24, 1e-30  ;;  %v2533_v24 = vstv %s1910_s17 }
 0x855   :  { %2051 = vrsqrt.f32 %v961_v25  ;;  %vm969_vm14 = vweird.f32 %v961_v25 }
 0x85a   :  { %v960_v1 = vpop.xlane.xlu2 %959 }
 0x85b   :  { %v2052_v11 = vpop.eup %2051  ;;  %v962_v26 = vmax.f32 %v960_v1, 1e-30 }
 0x85c   :  { %v964_v5 = vmul.f32 %v2052_v11, %v961_v25  ;;  %vm970_vm13 = vweird.f32 %v2052_v11 }
 0x85d   :  { %2053 = vrsqrt.f32 %v962_v26  ;;  %vm971_vm15 = vmor %vm969_vm14, %vm970_vm13  ;;  %vm979_vm1 = vweird.f32 %v962_v26 }
 0x85e   :  { %v965_v8 = vmul.f32 %v2052_v11, %v964_v5 }
 0x860   :  { %v966_v29 = vmul.f32 0.5, %v965_v8 }
 0x862   :  { %v967_v28 = vsub.f32 1.5, %v966_v29 }
 0x863   :  { %v2054_v31 = vpop.eup %2053 }
 0x864   :  { %v968_v32 = vmul.f32 %v2052_v11, %v967_v28  ;;  %v974_v33 = vmul.f32 %v2054_v31, %v962_v26  ;;  %vm980_vm0 = vweird.f32 %v2054_v31 }
 0x865   :  { %vm981_vm2 = vmor %vm979_vm1, %vm980_vm0 }
 0x866   :  { %v972_v36 = vsel %vm971_vm15, %v2052_v11, %v968_v32  ;;  %v975_v39 = vmul.f32 %v2054_v31, %v974_v33  ;;  %v1933_v33 = vld [vmem:[%s2652_s4 + $0x1] sm:$0x1]  ;;  %s1920_s4 = sld [smem:[#allocation3 + $0x6]] }
 0x867   :  { %v983_v23 = vmul.f32 %v972_v36, %v961_v25  ;;  %v993_v48 = vmul.f32 %v2518_v45, %v972_v36  ;;  %v1268_v36 = vmul.f32 %v1933_v33, %v1933_v33 }
 0x868   :  { %v976_v42 = vmul.f32 0.5, %v975_v39 }
 0x869   :  { %v986_v40 = vmul.f32 %v2515_v34, %v983_v23  ;;  %v1269_v23 = vsel %vm431_vm6, %v1268_v36, 0.0 }
 0x86a   :  { %v977_v41 = vsub.f32 1.5, %v976_v42 }
 0x86b   :  { %2055 = vtanh.f32 %v986_v40 }
 0x86c   :  { %v978_v43 = vmul.f32 %v2054_v31, %v977_v41  ;;  %s1327_s20 = smul.f32 2.0, %s1920_s4 }
 0x86e   :  { %v982_v44 = vsel %vm981_vm2, %v2054_v31, %v978_v43 }
 0x86f   :  { %v984_v46 = vmul.f32 %v982_v44, %v962_v26  ;;  %v994_v52 = vmul.f32 %v2518_v45, %v982_v44 }
 0x871   :  { %v2056_v35 = vpop.eup %2055  ;;  %v987_v47 = vmul.f32 %v2515_v34, %v984_v46 }
 0x872   :  { %v990_v37 = vmul.f32 %v2056_v35, %v2048_v17 }
 0x873   :  { %2057 = vtanh.f32 %v987_v47 }
 0x874   :  { %v2522_v38 = vmul.f32 %v993_v48, %v990_v37 }
 0x876   :  { %v997_v49 = vmul.f32 %v2522_v38, %v2522_v38 }
 0x878   :  { %999 = vadd.xlane.f32.xlu0 %v997_v49 }
 0x879   :  { %v2058_v50 = vpop.eup %2057 }
 0x87a   :  { %v991_v51 = vmul.f32 %v2058_v50, %v2050_v21 }
 0x87c   :  { %v2527_v53 = vmul.f32 %v994_v52, %v991_v51 }
 0x87e   :  { %v998_v20 = vmul.f32 %v2527_v53, %v2527_v53 }
 0x880   :  { %1001 = vadd.xlane.f32.xlu1 %v998_v20 }
 0x8eb   :  { %v1000_v7 = vpop.xlane.xlu0 %999 }
 0x8ec   :  { %v1003_v9 = vmax.f32 %v1000_v7, 1e-30  ;;  %vm1026_vm7 = vcmp.gt.f32.partialorder %v1000_v7, %v2533_v24 }
 0x8ee   :  { %2059 = vrsqrt.f32 %v1003_v9  ;;  %vm1011_vm4 = vweird.f32 %v1003_v9 }
 0x8f3   :  { %v1002_v56 = vpop.xlane.xlu1 %1001 }
 0x8f4   :  { %v2060_v10 = vpop.eup %2059  ;;  %v1004_v13 = vmax.f32 %v1002_v56, 1e-30  ;;  %vm1027_vm11 = vcmp.gt.f32.partialorder %v1002_v56, %v2533_v24 }
 0x8f5   :  { %v1006_v12 = vmul.f32 %v2060_v10, %v1003_v9  ;;  %vm1012_vm3 = vweird.f32 %v2060_v10 }
 0x8f6   :  { %2061 = vrsqrt.f32 %v1004_v13  ;;  %vm1013_vm5 = vmor %vm1011_vm4, %vm1012_vm3  ;;  %vm1021_vm9 = vweird.f32 %v1004_v13 }
 0x8f7   :  { %v1007_v14 = vmul.f32 %v2060_v10, %v1006_v12 }
 0x8f9   :  { %v1008_v61 = vmul.f32 0.5, %v1007_v14 }
 0x8fb   :  { %v1009_v16 = vsub.f32 1.5, %v1008_v61 }
 0x8fc   :  { %v2062_v17 = vpop.eup %2061 }
 0x8fd   :  { %v1010_v18 = vmul.f32 %v2060_v10, %v1009_v16  ;;  %v1016_v21 = vmul.f32 %v2062_v17, %v1004_v13  ;;  %vm1022_vm8 = vweird.f32 %v2062_v17 }
 0x8fe   :  { %vm1023_vm10 = vmor %vm1021_vm9, %vm1022_vm8 }
 0x8ff   :  { %v1014_v22 = vsel %vm1013_vm5, %v2060_v10, %v1010_v18  ;;  %v1017_v25 = vmul.f32 %v2062_v17, %v1016_v21 }
 0x900   :  { %v1029_v11 = vmul.f32 %v2531_v19, %v1014_v22 }
 0x901   :  { %v1018_v1 = vmul.f32 0.5, %v1017_v25 }
 0x902   :  { %v1031_v5 = vmul.f32 %v1029_v11, %v2522_v38 }
 0x903   :  { %v1019_v26 = vsub.f32 1.5, %v1018_v1 }
 0x904   :  { %v1037_v8 = vsel %vm1026_vm7, %v1031_v5, %v2522_v38 }
 0x905   :  { %1113 = vmatmul.f32.vlgmr.msra.gmra.mxu3 %v1037_v8  ;;  %v1067_v29 = vmul.f32 %v1037_v8, %v1037_v8  ;;  %v1020_v15 = vmul.f32 %v2062_v17, %v1019_v26 }
 0x907   :  { %1069 = vadd.xlane.f32.xlu0 %v1067_v29  ;;  %v1024_v27 = vsel %vm1023_vm10, %v2062_v17, %v1020_v15 }
 0x908   :  { %v1030_v28 = vmul.f32 %v2531_v19, %v1024_v27 }
 0x90a   :  { %v1032_v30 = vmul.f32 %v1030_v28, %v2527_v53 }
 0x90c   :  { %v1038_v31 = vsel %vm1027_vm11, %v1032_v30, %v2527_v53 }
 0x90d   :  { %1116 = vmatmul.f32.gmra.mxu3 %v1038_v31  ;;  %v1068_v32 = vmul.f32 %v1038_v31, %v1038_v31 }
 0x90f   :  { %1071 = vadd.xlane.f32.xlu2 %v1068_v32 }
 0x917   :  { %1270 = vadd.xlane.f32.xlu2 %v1269_v23 }
 0x97a   :  { %v1070_v59 = vpop.xlane.xlu0 %1069 }
 0x97b   :  { %v1073_v62 = vmax.f32 %v1070_v59, 1e-30 }
 0x97d   :  { %vm1081_vm0 = vweird.f32 %v1073_v62 }
 0x982   :  { %v1072_v39 = vpop.xlane.xlu2 %1071 }
 0x983   :  { %v1074_v2 = vmax.f32 %v1072_v39, 1e-30 }
 0x985   :  { %vm1091_vm3 = vweird.f32 %v1074_v2 }
 0x988   :  { %v2547_v40 = vpop.f32.mrf.mxu3 }
 0x989   :  { %v1120_v42 = vmul.f32 %v2547_v40, %v2547_v40  ;;  %v1210_v41 = vand.u32 2147483647, %v2547_v40 }
 0x98a   :  { %v1271_v43 = vpop.xlane.xlu2 %1270 }
 0x98b   :  { %1122 = vadd.xlane.f32.xlu0 %v1120_v42  ;;  %1212 = vadd.xlane.f32.xlu2 %v1210_v41  ;;  %v1272_v44 = vmax.f32 %v1271_v43, 1e-30 }
 0x98d   :  { %2063 = vrsqrt.f32 %v1272_v44  ;;  %vm1279_vm12 = vweird.f32 %v1272_v44 }
 0x990   :  { %v2552_v46 = vpop.f32.mrf.mxu3 }
 0x991   :  { %v1121_v35 = vmul.f32 %v2552_v46, %v2552_v46  ;;  %v1211_v49 = vand.u32 2147483647, %v2552_v46 }
 0x993   :  { %v2064_v47 = vpop.eup %2063  ;;  %1124 = vadd.xlane.f32.xlu1 %v1121_v35 }
 0x994   :  { %v1274_v37 = vmul.f32 %v2064_v47, %v1272_v44  ;;  %vm1280_vm13 = vweird.f32 %v2064_v47 }
 0x995   :  { %vm1281_vm14 = vmor %vm1279_vm12, %vm1280_vm13 }
 0x996   :  { %v1275_v48 = vmul.f32 %v2064_v47, %v1274_v37 }
 0x998   :  { %v1276_v38 = vmul.f32 0.5, %v1275_v48 }
 0x99a   :  { %v1277_v50 = vsub.f32 1.5, %v1276_v38 }
 0x99b   :  { %1214 = vadd.xlane.f32.xlu1 %v1211_v49 }
 0x99c   :  { %v1278_v51 = vmul.f32 %v2064_v47, %v1277_v50 }
 0x99e   :  { %v1282_v52 = vsel %vm1281_vm14, %v2064_v47, %v1278_v51 }
 0x99f   :  { %v1283_v53 = vmul.f32 %v1282_v52, %v1272_v44  ;;  %v1287_v55 = vmul.f32 %v1282_v52, %v2518_v45 }
 0x9a1   :  { %v1284_v20 = vmul.f32 %v1283_v53, %v2515_v34 }
 0x9a3   :  { %2065 = vtanh.f32 %v1284_v20 }
 0x9a4   :  { %2067 = vrsqrt.f32 %v1073_v62 }
 0x9a5   :  { %2069 = vrsqrt.f32 %v1074_v2 }
 0x9a9   :  { %v2066_v57 = vpop.eup %2065 }
 0x9aa   :  { %v1286_v58 = vmul.f32 %v2066_v57, %v1933_v33  ;;  %v2068_v3 = vpop.eup %2067 }
 0x9ab   :  { %v1076_v4 = vmul.f32 %v2068_v3, %v1073_v62  ;;  %v2070_v6 = vpop.eup %2069  ;;  %vm1082_vm15 = vweird.f32 %v2068_v3 }
 0x9ac   :  { %v2559_v60 = vmul.f32 %v1287_v55, %v1286_v58  ;;  %v1086_v9 = vmul.f32 %v2070_v6, %v1074_v2  ;;  %vm1083_vm1 = vmor %vm1081_vm0, %vm1082_vm15  ;;  %vm1092_vm2 = vweird.f32 %v2070_v6 }
 0x9ad   :  { %v1077_v54 = vmul.f32 %v2068_v3, %v1076_v4  ;;  %vm1093_vm4 = vmor %vm1091_vm3, %vm1092_vm2 }
 0x9ae   :  { %v1289_v63 = vmul.f32 %v2559_v60, %v2559_v60  ;;  %v1087_v56 = vmul.f32 %v2070_v6, %v1086_v9 }
 0x9af   :  { %v1078_v7 = vmul.f32 0.5, %v1077_v54 }
 0x9b0   :  { %v1290_v0 = vsel %vm431_vm6, %v1289_v63, 0.0  ;;  %v1088_v13 = vmul.f32 0.5, %v1087_v56 }
 0x9b1   :  { %1291 = vadd.xlane.f32.xlu0 %v1290_v0  ;;  %v1079_v10 = vsub.f32 1.5, %v1078_v7 }
 0x9b2   :  { %v1089_v61 = vsub.f32 1.5, %v1088_v13 }
 0x9b3   :  { %v1080_v12 = vmul.f32 %v2068_v3, %v1079_v10 }
 0x9b4   :  { %v1090_v17 = vmul.f32 %v2070_v6, %v1089_v61 }
 0x9b5   :  { %v2564_v14 = vsel %vm1083_vm1, %v2068_v3, %v1080_v12 }
 0x9b6   :  { %v1095_v16 = vmul.f32 %v2564_v14, %v1073_v62  ;;  %v2568_v21 = vsel %vm1093_vm4, %v2070_v6, %v1090_v17 }
 0x9b7   :  { %v1096_v25 = vmul.f32 %v2568_v21, %v1074_v2 }
 0x9b8   :  { %v1153_v18 = vmul.f32 %v1095_v16, %v2515_v34 }
 0x9b9   :  { %v1154_v1 = vmul.f32 %v1096_v25, %v2515_v34 }
 0x9ba   :  { %v1931_v22 = vclamps-f32 %v1153_v18, 0.999999 }
 0x9bb   :  { %v1932_v5 = vclamps-f32 %v1154_v1, 0.999999 }
 0x9bc   :  { %v1161_v11 = vsub.f32 1.0, %v1931_v22  ;;  %v1159_v35 = vadd.f32 1.0, %v1931_v22 }
 0x9bd   :  { %v1162_v26 = vsub.f32 1.0, %v1932_v5  ;;  %v1160_v58 = vadd.f32 1.0, %v1932_v5 }
 0x9be   :  { %2071 = vrcp.f32 %v1161_v11  ;;  %v1174_v32 = vand.u32 2147483648, %v1161_v11  ;;  %vm1168_vm7 = vweird.f32 %v1161_v11  ;;  %v1172_v36 = vand.u32 2147483647, %v1161_v11 }
 0x9bf   :  { %2073 = vrcp.f32 %v1162_v26  ;;  %v1189_v48 = vand.u32 2147483648, %v1162_v26  ;;  %vm1183_vm11 = vweird.f32 %v1162_v26  ;;  %v1187_v38 = vand.u32 2147483647, %v1162_v26 }
 0x9c0   :  { %v1175_v42 = vor.u32 1.1754944e-38, %v1174_v32  ;;  %vm1173_vm9 = vcmp.eq.f32.partialorder %v1172_v36, 8.507059e+37 }
 0x9c1   :  { %v1190_v52 = vor.u32 1.1754944e-38, %v1189_v48  ;;  %vm1188_vm13 = vcmp.eq.f32.partialorder %v1187_v38, 8.507059e+37 }
 0x9c4   :  { %v2072_v8 = vpop.eup %2071 }
 0x9c5   :  { %v1164_v29 = vmul.f32 %v2072_v8, %v1161_v11  ;;  %v2074_v27 = vpop.eup %2073  ;;  %vm1169_vm5 = vweird.f32 %v2072_v8 }
 0x9c6   :  { %v1179_v30 = vmul.f32 %v2074_v27, %v1162_v26  ;;  %vm1170_vm8 = vmor %vm1168_vm7, %vm1169_vm5  ;;  %vm1184_vm10 = vweird.f32 %v2074_v27 }
 0x9c7   :  { %v1165_v15 = vsub.f32 1.0, %v1164_v29  ;;  %vm1185_vm12 = vmor %vm1183_vm11, %vm1184_vm10 }
 0x9c8   :  { %v1180_v33 = vsub.f32 1.0, %v1179_v30 }
 0x9c9   :  { %v1166_v28 = vmul.f32 %v2072_v8, %v1165_v15 }
 0x9ca   :  { %v1181_v41 = vmul.f32 %v2074_v27, %v1180_v33 }
 0x9cb   :  { %v1167_v31 = vadd.f32 %v2072_v8, %v1166_v28 }
 0x9cc   :  { %v1182_v47 = vadd.f32 %v2074_v27, %v1181_v41 }
 0x9cd   :  { %v1171_v23 = vsel %vm1170_vm8, %v2072_v8, %v1167_v31 }
 0x9ce   :  { %v1176_v44 = vsel %vm1173_vm9, %v1175_v42, %v1171_v23  ;;  %v1186_v50 = vsel %vm1185_vm12, %v2074_v27, %v1182_v47 }
 0x9cf   :  { %v1177_v37 = vmul.f32 %v1176_v44, %v1159_v35  ;;  %v1191_v55 = vsel %vm1188_vm13, %v1190_v52, %v1186_v50 }
 0x9d0   :  { %v1192_v62 = vmul.f32 %v1191_v55, %v1160_v58 }
 0x9fe   :  { %v1123_v39 = vpop.xlane.xlu0 %1122  ;;  %v1213_v8 = vpop.xlane.xlu2 %1212 }
 0x9ff   :  { %v1126_v43 = vmax.f32 %v1123_v39, 1e-30  ;;  %vm1216_vm4 = vcmp.eq.f32.partialorder %v1213_v8, 0.0 }
 0xa01   :  { %2075 = vrsqrt.f32 %v1126_v43  ;;  %vm1134_vm15 = vweird.f32 %v1126_v43 }
 0xa02   :  { %2077 = vlog2.f32 %v1177_v37 }
 0xa06   :  { %v1125_v51 = vpop.xlane.xlu1 %1124 }
 0xa07   :  { %v2076_v49 = vpop.eup %2075  ;;  %v1127_v20 = vmax.f32 %v1125_v51, 1e-30 }
 0xa08   :  { %v1129_v53 = vmul.f32 %v2076_v49, %v1126_v43  ;;  %v2078_v63 = vpop.eup %2077  ;;  %vm1135_vm14 = vweird.f32 %v2076_v49 }
 0xa09   :  { %2079 = vrsqrt.f32 %v1127_v20  ;;  %vm1136_vm0 = vmor %vm1134_vm15, %vm1135_vm14  ;;  %v1194_v4 = vmul.f32 0.6931472, %v2078_v63  ;;  %vm1144_vm2 = vweird.f32 %v1127_v20 }
 0xa0a   :  { %v1130_v57 = vmul.f32 %v2076_v49, %v1129_v53  ;;  %2081 = vlog2.f32 %v1192_v62 }
 0xa0b   :  { %v1197_v56 = vmul.f32 0.5, %v1194_v4 }
 0xa0c   :  { %v1131_v59 = vmul.f32 0.5, %v1130_v57 }
 0xa0e   :  { %v1132_v0 = vsub.f32 1.5, %v1131_v59 }
 0xa0f   :  { %v2080_v2 = vpop.eup %2079 }
 0xa10   :  { %v1133_v3 = vmul.f32 %v2076_v49, %v1132_v0  ;;  %v1139_v54 = vmul.f32 %v2080_v2, %v1127_v20  ;;  %v2082_v13 = vpop.eup %2081  ;;  %vm1145_vm1 = vweird.f32 %v2080_v2 }
 0xa11   :  { %vm1146_vm3 = vmor %vm1144_vm2, %vm1145_vm1  ;;  %v1196_v18 = vmul.f32 0.6931472, %v2082_v13 }
 0xa12   :  { %v1137_v6 = vsel %vm1136_vm0, %v2076_v49, %v1133_v3  ;;  %v1140_v9 = vmul.f32 %v2080_v2, %v1139_v54 }
 0xa13   :  { %v1148_v7 = vmul.f32 %v1137_v6, %v1126_v43  ;;  %v1198_v1 = vmul.f32 0.5, %v1196_v18 }
 0xa14   :  { %v1141_v12 = vmul.f32 0.5, %v1140_v9 }
 0xa15   :  { %v1150_v10 = vmul.f32 %v1148_v7, %v2564_v14  ;;  %v1206_v14 = vmul.f32 %v1137_v6, %v2518_v45 }
 0xa16   :  { %v1142_v16 = vsub.f32 1.5, %v1141_v12 }
 0xa17   :  { %v1199_v61 = vmul.f32 %v1197_v56, %v1150_v10 }
 0xa18   :  { %v1143_v17 = vmul.f32 %v2080_v2, %v1142_v16 }
 0xa19   :  { %2083 = vtanh.f32 %v1199_v61 }
 0xa1a   :  { %v1147_v22 = vsel %vm1146_vm3, %v2080_v2, %v1143_v17 }
 0xa1b   :  { %v1149_v25 = vmul.f32 %v1147_v22, %v1127_v20  ;;  %v1207_v33 = vmul.f32 %v1147_v22, %v2518_v45 }
 0xa1d   :  { %v1151_v11 = vmul.f32 %v1149_v25, %v2568_v21  ;;  %v1215_v21 = vpop.xlane.xlu1 %1214 }
 0xa1e   :  { %vm1217_vm5 = vcmp.eq.f32.partialorder %v1215_v21, 0.0 }
 0xa1f   :  { %v2084_v5 = vpop.eup %2083  ;;  %v1200_v29 = vmul.f32 %v1198_v1, %v1151_v11  ;;  %v1348_v1 = vstv %s1925_s19 }
 0xa20   :  { %v1203_v26 = vmul.f32 %v2084_v5, %v2547_v40  ;;  %v1328_v5 = vstv %s1327_s20 }
 0xa21   :  { %2085 = vtanh.f32 %v1200_v29 }
 0xa22   :  { %v1208_v15 = vmul.f32 %v1206_v14, %v1203_v26 }
 0xa24   :  { %v1222_v27 = vsel %vm1216_vm4, 0.0, %v1208_v15  ;;  %v1292_v30 = vpop.xlane.xlu0 %1291 }
 0xa25   :  { %v1224_v28 = vmul.f32 %v1222_v27, %v1222_v27  ;;  %v1293_v32 = vmax.f32 %v1292_v30, 1e-30  ;;  %vm1304_vm10 = vcmp.gt.f32.partialorder %v1292_v30, %v2533_v24 }
 0xa27   :  { %1226 = vadd.xlane.f32.xlu2 %v1224_v28  ;;  %v2086_v31 = vpop.eup %2085  ;;  %2087 = vrsqrt.f32 %v1293_v32  ;;  %vm1300_vm7 = vweird.f32 %v1293_v32 }
 0xa28   :  { %v1204_v36 = vmul.f32 %v2086_v31, %v2552_v46 }
 0xa2a   :  { %v1209_v40 = vmul.f32 %v1207_v33, %v1204_v36 }
 0xa2c   :  { %v1223_v23 = vsel %vm1217_vm5, 0.0, %v1209_v40 }
 0xa2d   :  { %v1225_v39 = vmul.f32 %v1223_v23, %v1223_v23  ;;  %v2088_v42 = vpop.eup %2087 }
 0xa2e   :  { %v1295_v41 = vmul.f32 %v2088_v42, %v1293_v32  ;;  %vm1301_vm8 = vweird.f32 %v2088_v42  ;;  %v1333_v32 = vstv %s1920_s4 }
 0xa2f   :  { %1228 = vadd.xlane.f32.xlu1 %v1225_v39  ;;  %vm1302_vm9 = vmor %vm1300_vm7, %vm1301_vm8 }
 0xa30   :  { %v1296_v43 = vmul.f32 %v2088_v42, %v1295_v41 }
 0xa32   :  { %v1297_v44 = vmul.f32 0.5, %v1296_v43 }
 0xa34   :  { %v1298_v35 = vsub.f32 1.5, %v1297_v44 }
 0xa36   :  { %v1299_v47 = vmul.f32 %v2088_v42, %v1298_v35 }
 0xa38   :  { %v1303_v37 = vsel %vm1302_vm9, %v2088_v42, %v1299_v47 }
 0xa39   :  { %v1305_v48 = vmul.f32 %v1303_v37, %v2531_v19 }
 0xa3b   :  { %v1306_v46 = vmul.f32 %v1305_v48, %v2559_v60 }
 0xa3d   :  { %v1309_v38 = vsel %vm1304_vm10, %v1306_v46, %v2559_v60 }
 0xa3e   :  { %v1316_v49 = vmul.f32 %v1309_v38, %v1309_v38  ;;  %v2584_v7 = vperm.slane %v1309_v38, 0 }
 0xa40   :  { %v1317_v50 = vsel %vm431_vm6, %v1316_v49, 0.0 }
 0xa41   :  { %1318 = vadd.xlane.f32.xlu1 %v1317_v50 }
 0xa9a   :  { %v1227_v51 = vpop.xlane.xlu2 %1226 }
 0xa9b   :  { %v1230_v52 = vmax.f32 %v1227_v51, 1e-30  ;;  %vm1253_vm6 = vcmp.gt.f32.partialorder %v1227_v51, %v2533_v24 }
 0xa9d   :  { %2089 = vrsqrt.f32 %v1230_v52  ;;  %vm1238_vm12 = vweird.f32 %v1230_v52 }
 0xaa2   :  { %v1229_v20 = vpop.xlane.xlu1 %1228 }
 0xaa3   :  { %v2090_v53 = vpop.eup %2089  ;;  %v1231_v57 = vmax.f32 %v1229_v20, 1e-30  ;;  %vm1254_vm1 = vcmp.gt.f32.partialorder %v1229_v20, %v2533_v24 }
 0xaa4   :  { %v1233_v55 = vmul.f32 %v2090_v53, %v1230_v52  ;;  %vm1239_vm11 = vweird.f32 %v2090_v53 }
 0xaa5   :  { %2091 = vrsqrt.f32 %v1231_v57  ;;  %vm1240_vm13 = vmor %vm1238_vm12, %vm1239_vm11  ;;  %vm1248_vm15 = vweird.f32 %v1231_v57 }
 0xaa6   :  { %v1234_v58 = vmul.f32 %v2090_v53, %v1233_v55 }
 0xaa8   :  { %v1235_v59 = vmul.f32 0.5, %v1234_v58 }
 0xaaa   :  { %v1236_v62 = vsub.f32 1.5, %v1235_v59 }
 0xaab   :  { %v2092_v63 = vpop.eup %2091 }
 0xaac   :  { %v1237_v0 = vmul.f32 %v2090_v53, %v1236_v62  ;;  %v1243_v60 = vmul.f32 %v2092_v63, %v1231_v57  ;;  %vm1249_vm14 = vweird.f32 %v2092_v63 }
 0xaad   :  { %vm1250_vm0 = vmor %vm1248_vm15, %vm1249_vm14 }
 0xaae   :  { %v1241_v2 = vsel %vm1240_vm13, %v2090_v53, %v1237_v0  ;;  %v1244_v3 = vmul.f32 %v2092_v63, %v1243_v60 }
 0xaaf   :  { %v1256_v4 = vmul.f32 %v1241_v2, %v2531_v19 }
 0xab0   :  { %v1245_v54 = vmul.f32 0.5, %v1244_v3 }
 0xab1   :  { %v1258_v6 = vmul.f32 %v1256_v4, %v1222_v27 }
 0xab2   :  { %v1246_v9 = vsub.f32 1.5, %v1245_v54 }
 0xab3   :  { %v2587_v10 = vsel %vm1253_vm6, %v1258_v6, %v1222_v27 }
 0xab4   :  { %v1321_v56 = vmul.f32 %v2584_v7, %v2587_v10  ;;  %v1247_v12 = vmul.f32 %v2092_v63, %v1246_v9  ;;  %v1310_v25 = vmul.f32 %v2587_v10, %v2587_v10  ;;  %v1319_v11 = vpop.xlane.xlu1 %1318 }
 0xab5   :  { %v1351_v8 = vperm.slane %v1319_v11, 0 }
 0xab6   :  { %1323 = vadd.xlane.f32.xlu1 %v1321_v56  ;;  %v1251_v13 = vsel %vm1250_vm0, %v2092_v63, %v1247_v12 }
 0xab7   :  { %v1257_v61 = vmul.f32 %v1251_v13, %v2531_v19 }
 0xab9   :  { %v1259_v16 = vmul.f32 %v1257_v61, %v1223_v23 }
 0xabb   :  { %v1265_v17 = vsel %vm1254_vm1, %v1259_v16, %v1223_v23  ;;  %v1334_v23 = vmul.f32 %v1333_v32, %v1319_v11 }
 0xabc   :  { %v1311_v18 = vmul.f32 %v1265_v17, %v1265_v17  ;;  %v1322_v22 = vmul.f32 %v2584_v7, %v1265_v17 }
 0xabd   :  { %v1335_v43 = vperm.slane %v1334_v23, 0 }
 0xabe   :  { %1314 = vadd.xlane.f32.xlu0 %v1311_v18  ;;  %1325 = vadd.xlane.f32.xlu2 %v1322_v22 }
 0xac6   :  { %1312 = vadd.xlane.f32.xlu0 %v1310_v25 }
 0xb29   :  { %v1324_v30 = vpop.xlane.xlu1 %1323 }
 0xb2a   :  { %v1329_v33 = vmul.f32 %v1328_v5, %v1324_v30 }
 0xb2c   :  { %v1331_v39 = vadd.f32 1.0, %v1329_v33 }
 0xb2e   :  { %v1336_v2 = vadd.f32 %v1335_v43, %v1331_v39 }
 0xb30   :  { %v1338_v13 = vmul.f32 %v1336_v2, %v2587_v10 }
 0xb31   :  { %v1315_v26 = vpop.xlane.xlu0 %1314  ;;  %v1326_v14 = vpop.xlane.xlu2 %1325 }
 0xb32   :  { %v1350_v29 = vmul.f32 %v1348_v1, %v1315_v26  ;;  %v1330_v15 = vmul.f32 %v1328_v5, %v1326_v14  ;;  %v1341_v44 = vmul.f32 %v1333_v32, %v1315_v26 }
 0xb34   :  { %v1353_v27 = vmul.f32 %v1351_v8, %v1350_v29  ;;  %v1332_v28 = vadd.f32 1.0, %v1330_v15  ;;  %v1343_v46 = vsub.f32 1.0, %v1341_v44 }
 0xb36   :  { %v1355_v31 = vadd.f32 %v1353_v27, %v1332_v28  ;;  %v1337_v37 = vadd.f32 %v1335_v43, %v1332_v28  ;;  %v1345_v20 = vmul.f32 %v1343_v46, %v2584_v7 }
 0xb38   :  { %v1357_v21 = vmax.f32 %v1355_v31, 1e-15  ;;  %v1339_v51 = vmul.f32 %v1337_v37, %v1265_v17 }
 0xb39   :  { %v1313_v36 = vpop.xlane.xlu0 %1312 }
 0xb3a   :  { %2093 = vrcp.f32 %v1357_v21  ;;  %v1349_v40 = vmul.f32 %v1348_v1, %v1313_v36  ;;  %v1340_v49 = vmul.f32 %v1333_v32, %v1313_v36  ;;  %v1384_v50 = vand.u32 2147483648, %v1357_v21 }
 0xb3b   :  { %v1382_v53 = vand.u32 2147483647, %v1357_v21  ;;  %vm1378_vm3 = vweird.f32 %v1357_v21  ;;  %v1347_v62 = vadd.f32 %v1345_v20, %v1339_v51 }
 0xb3c   :  { %v1352_v42 = vmul.f32 %v1351_v8, %v1349_v40  ;;  %v1342_v58 = vsub.f32 1.0, %v1340_v49  ;;  %v1385_v59 = vor.u32 1.1754944e-38, %v1384_v50 }
 0xb3d   :  { %vm1383_vm5 = vcmp.eq.f32.partialorder %v1382_v53, 8.507059e+37 }
 0xb3e   :  { %v1354_v41 = vadd.f32 %v1352_v42, %v1331_v39  ;;  %v1344_v54 = vmul.f32 %v1342_v58, %v2584_v7 }
 0xb40   :  { %v2094_v35 = vpop.eup %2093  ;;  %v1356_v47 = vmax.f32 %v1354_v41, 1e-15  ;;  %v1346_v17 = vadd.f32 %v1344_v54, %v1338_v13 }
 0xb41   :  { %v1374_v48 = vmul.f32 %v2094_v35, %v1357_v21  ;;  %vm1379_vm2 = vweird.f32 %v2094_v35 }
 0xb42   :  { %2095 = vrcp.f32 %v1356_v47  ;;  %vm1380_vm4 = vmor %vm1378_vm3, %vm1379_vm2  ;;  %v1369_v6 = vand.u32 2147483648, %v1356_v47  ;;  %v1367_v12 = vand.u32 2147483647, %v1356_v47  ;;  %vm1363_vm8 = vweird.f32 %v1356_v47 }
 0xb43   :  { %v1375_v38 = vsub.f32 1.0, %v1374_v48 }
 0xb44   :  { %v1370_v16 = vor.u32 1.1754944e-38, %v1369_v6  ;;  %vm1368_vm10 = vcmp.eq.f32.partialorder %v1367_v12, 8.507059e+37 }
 0xb45   :  { %v1376_v52 = vmul.f32 %v2094_v35, %v1375_v38 }
 0xb47   :  { %v1377_v55 = vadd.f32 %v2094_v35, %v1376_v52 }
 0xb48   :  { %v2096_v57 = vpop.eup %2095 }
 0xb49   :  { %v1381_v63 = vsel %vm1380_vm4, %v2094_v35, %v1377_v55  ;;  %v1359_v0 = vmul.f32 %v2096_v57, %v1356_v47  ;;  %vm1364_vm7 = vweird.f32 %v2096_v57 }
 0xb4a   :  { %v1386_v60 = vsel %vm1383_vm5, %v1385_v59, %v1381_v63  ;;  %vm1365_vm9 = vmor %vm1363_vm8, %vm1364_vm7 }
 0xb4b   :  { %v1387_v3 = vmul.f32 %v1386_v60, %v1347_v62  ;;  %v1360_v4 = vsub.f32 1.0, %v1359_v0 }
 0xb4d   :  { %v1389_v9 = vmul.f32 %v1387_v3, %v1387_v3  ;;  %v1361_v56 = vmul.f32 %v2096_v57, %v1360_v4 }
 0xb4f   :  { %1392 = vadd.xlane.f32.xlu2 %v1389_v9  ;;  %v1362_v61 = vadd.f32 %v2096_v57, %v1361_v56 }
 0xb51   :  { %v1366_v18 = vsel %vm1365_vm9, %v2096_v57, %v1362_v61 }
 0xb52   :  { %v1371_v22 = vsel %vm1368_vm10, %v1370_v16, %v1366_v18 }
 0xb53   :  { %v1372_v25 = vmul.f32 %v1371_v22, %v1346_v17 }
 0xb55   :  { %v1388_v11 = vmul.f32 %v1372_v25, %v1372_v25 }
 0xb57   :  { %1390 = vadd.xlane.f32.xlu0 %v1388_v11 }
 0xbc2   :  { %v1393_v7 = vpop.xlane.xlu2 %1392 }
 0xbc3   :  { %v1395_v1 = vmax.f32 %v1393_v7, 1e-30  ;;  %vm1417_vm6 = vcmp.gt.f32.partialorder %v1393_v7, %v2533_v24 }
 0xbc5   :  { %2097 = vrsqrt.f32 %v1395_v1  ;;  %vm1412_vm12 = vweird.f32 %v1395_v1 }
 0xbca   :  { %v1391_v5 = vpop.xlane.xlu0 %1390 }
 0xbcb   :  { %v2098_v26 = vpop.eup %2097  ;;  %v1394_v14 = vmax.f32 %v1391_v5, 1e-30  ;;  %vm1416_vm1 = vcmp.gt.f32.partialorder %v1391_v5, %v2533_v24 }
 0xbcc   :  { %v1407_v8 = vmul.f32 %v2098_v26, %v1395_v1  ;;  %vm1413_vm11 = vweird.f32 %v2098_v26 }
 0xbcd   :  { %2099 = vrsqrt.f32 %v1394_v14  ;;  %vm1414_vm13 = vmor %vm1412_vm12, %vm1413_vm11  ;;  %vm1402_vm15 = vweird.f32 %v1394_v14 }
 0xbce   :  { %v1408_v10 = vmul.f32 %v2098_v26, %v1407_v8 }
 0xbd0   :  { %v1409_v29 = vmul.f32 0.5, %v1408_v10 }
 0xbd2   :  { %v1410_v15 = vsub.f32 1.5, %v1409_v29 }
 0xbd3   :  { %v2100_v27 = vpop.eup %2099 }
 0xbd4   :  { %v1411_v28 = vmul.f32 %v2098_v26, %v1410_v15  ;;  %v1397_v30 = vmul.f32 %v2100_v27, %v1394_v14  ;;  %vm1403_vm14 = vweird.f32 %v2100_v27 }
 0xbd5   :  { %vm1404_vm0 = vmor %vm1402_vm15, %vm1403_vm14 }
 0xbd6   :  { %v1415_v31 = vsel %vm1414_vm13, %v2098_v26, %v1411_v28  ;;  %v1398_v32 = vmul.f32 %v2100_v27, %v1397_v30 }
 0xbd7   :  { %v1419_v33 = vmul.f32 %v1415_v31, %v2531_v19 }
 0xbd8   :  { %v1399_v21 = vmul.f32 0.5, %v1398_v32 }
 0xbd9   :  { %v1421_v36 = vmul.f32 %v1419_v33, %v1387_v3 }
 0xbda   :  { %v1400_v40 = vsub.f32 1.5, %v1399_v21 }
 0xbdb   :  { %v2601_v23 = vsel %vm1417_vm6, %v1421_v36, %v1387_v3 }
 0xbdc   :  { %v1401_v39 = vmul.f32 %v2100_v27, %v1400_v40  ;;  %v1429_v42 = vmul.f32 %v2601_v23, %v2601_v23 }
 0xbde   :  { %v1405_v41 = vsel %vm1404_vm0, %v2100_v27, %v1401_v39  ;;  %1432 = vadd.xlane.f32.xlu1 %v1429_v42 }
 0xbdf   :  { %v1418_v43 = vmul.f32 %v1405_v41, %v2531_v19 }
 0xbe1   :  { %v1420_v44 = vmul.f32 %v1418_v43, %v1372_v25  ;;  %v1952_v43 = vld [vmem:[%s2653_s5 + $0x1] ss:$0 sm:$0xff]  ;;  %s1930_s5 = sld [smem:[#allocation3 + $0x13]] }
 0xbe3   :  { %v2607_v35 = vsel %vm1416_vm1, %v1420_v44, %v1372_v25 }
 0xbe4   :  { %v1428_v47 = vmul.f32 %v2607_v35, %v2607_v35 }
 0xbe6   :  { %1430 = vadd.xlane.f32.xlu2 %v1428_v47 }
 0xc51   :  { %v1433_v37 = vpop.xlane.xlu1 %1432 }
 0xc52   :  { %v1435_v48 = vmax.f32 %v1433_v37, 1e-30 }
 0xc54   :  { %2101 = vrsqrt.f32 %v1435_v48  ;;  %vm1452_vm3 = vweird.f32 %v1435_v48 }
 0xc59   :  { %v1431_v46 = vpop.xlane.xlu2 %1430 }
 0xc5a   :  { %v2102_v38 = vpop.eup %2101  ;;  %v1434_v49 = vmax.f32 %v1431_v46, 1e-30 }
 0xc5b   :  { %v1447_v50 = vmul.f32 %v2102_v38, %v1435_v48  ;;  %vm1453_vm2 = vweird.f32 %v2102_v38 }
 0xc5c   :  { %2103 = vrsqrt.f32 %v1434_v49  ;;  %vm1454_vm4 = vmor %vm1452_vm3, %vm1453_vm2  ;;  %vm1442_vm7 = vweird.f32 %v1434_v49 }
 0xc5d   :  { %v1448_v51 = vmul.f32 %v2102_v38, %v1447_v50 }
 0xc5f   :  { %v1449_v52 = vmul.f32 0.5, %v1448_v51  ;;  %v1540_v51 = vld [vmem:[#allocation11 + $0x1] sm:$0x1] }
 0xc61   :  { %v1450_v53 = vsub.f32 1.5, %v1449_v52 }
 0xc62   :  { %v2104_v20 = vpop.eup %2103 }
 0xc63   :  { %v1437_v55 = vmul.f32 %v2104_v20, %v1434_v49  ;;  %v1451_v57 = vmul.f32 %v2102_v38, %v1450_v53  ;;  %vm1443_vm5 = vweird.f32 %v2104_v20 }
 0xc64   :  { %vm1444_vm8 = vmor %vm1442_vm7, %vm1443_vm5 }
 0xc65   :  { %v1438_v58 = vmul.f32 %v2104_v20, %v1437_v55  ;;  %v1455_v59 = vsel %vm1454_vm4, %v2102_v38, %v1451_v57  ;;  %v1564_v57 = vstv %s1930_s5 }
 0xc66   :  { %v1457_v62 = vmul.f32 %v1455_v59, %v1435_v48  ;;  %v1507_v41 = vmul.f32 %v1455_v59, %v2518_v45 }
 0xc67   :  { %v1439_v63 = vmul.f32 0.5, %v1438_v58 }
 0xc68   :  { %v1459_v0 = vmul.f32 %v1457_v62, %v2515_v34 }
 0xc69   :  { %v1440_v60 = vsub.f32 1.5, %v1439_v63 }
 0xc6a   :  { %v1935_v2 = vclamps-f32 %v1459_v0, 0.999999 }
 0xc6b   :  { %v1441_v3 = vmul.f32 %v2104_v20, %v1440_v60 }
 0xc6c   :  { %v1467_v4 = vsub.f32 1.0, %v1935_v2  ;;  %v1465_v1 = vadd.f32 1.0, %v1935_v2 }
 0xc6d   :  { %v1445_v54 = vsel %vm1444_vm8, %v2104_v20, %v1441_v3 }
 0xc6e   :  { %2105 = vrcp.f32 %v1467_v4  ;;  %v1456_v6 = vmul.f32 %v1445_v54, %v1434_v49  ;;  %v1494_v17 = vand.u32 2147483648, %v1467_v4  ;;  %v1492_v22 = vand.u32 2147483647, %v1467_v4 }
 0xc6f   :  { %vm1488_vm10 = vweird.f32 %v1467_v4  ;;  %v1506_v49 = vmul.f32 %v1445_v54, %v2518_v45 }
 0xc70   :  { %v1458_v9 = vmul.f32 %v1456_v6, %v2515_v34  ;;  %v1495_v11 = vor.u32 1.1754944e-38, %v1494_v17  ;;  %vm1493_vm12 = vcmp.eq.f32.partialorder %v1492_v22, 8.507059e+37 }
 0xc72   :  { %v1934_v56 = vclamps-f32 %v1458_v9, 0.999999 }
 0xc74   :  { %v2106_v12 = vpop.eup %2105  ;;  %v1466_v61 = vsub.f32 1.0, %v1934_v56  ;;  %v1464_v31 = vadd.f32 1.0, %v1934_v56 }
 0xc75   :  { %v1484_v13 = vmul.f32 %v2106_v12, %v1467_v4  ;;  %vm1489_vm9 = vweird.f32 %v2106_v12 }
 0xc76   :  { %2107 = vrcp.f32 %v1466_v61  ;;  %vm1490_vm11 = vmor %vm1488_vm10, %vm1489_vm9  ;;  %v1479_v29 = vand.u32 2147483648, %v1466_v61  ;;  %v1477_v27 = vand.u32 2147483647, %v1466_v61  ;;  %vm1473_vm6 = vweird.f32 %v1466_v61 }
 0xc77   :  { %v1485_v16 = vsub.f32 1.0, %v1484_v13 }
 0xc78   :  { %v1480_v30 = vor.u32 1.1754944e-38, %v1479_v29  ;;  %vm1478_vm15 = vcmp.eq.f32.partialorder %v1477_v27, 8.507059e+37  ;;  %v2162_v27 = vld [vmem:[#allocation8 + $0x8] sm:$0xff] }
 0xc79   :  { %v1486_v18 = vmul.f32 %v2106_v12, %v1485_v16 }
 0xc7b   :  { %v1487_v25 = vadd.f32 %v2106_v12, %v1486_v18 }
 0xc7c   :  { %v2108_v7 = vpop.eup %2107 }
 0xc7d   :  { %v1491_v5 = vsel %vm1490_vm11, %v2106_v12, %v1487_v25  ;;  %v1469_v14 = vmul.f32 %v2108_v7, %v1466_v61  ;;  %vm1474_vm13 = vweird.f32 %v2108_v7 }
 0xc7e   :  { %v1496_v26 = vsel %vm1493_vm12, %v1495_v11, %v1491_v5  ;;  %vm1475_vm14 = vmor %vm1473_vm6, %vm1474_vm13 }
 0xc7f   :  { %v1497_v8 = vmul.f32 %v1496_v26, %v1465_v1  ;;  %v1470_v10 = vsub.f32 1.0, %v1469_v14  ;;  %v2161_v26 = vld [vmem:[#allocation8] sm:$0xff] }
 0xc81   :  { %2109 = vlog2.f32 %v1497_v8  ;;  %v1471_v15 = vmul.f32 %v2108_v7, %v1470_v10 }
 0xc83   :  { %v1472_v28 = vadd.f32 %v2108_v7, %v1471_v15 }
 0xc85   :  { %v1476_v32 = vsel %vm1475_vm14, %v2108_v7, %v1472_v28 }
 0xc86   :  { %v1481_v21 = vsel %vm1478_vm15, %v1480_v30, %v1476_v32 }
 0xc87   :  { %v2110_v33 = vpop.eup %2109  ;;  %v1482_v40 = vmul.f32 %v1481_v21, %v1464_v31 }
 0xc88   :  { %v1501_v36 = vmul.f32 0.6931472, %v2110_v33 }
 0xc89   :  { %2111 = vlog2.f32 %v1482_v40 }
 0xc8a   :  { %v1503_v39 = vmul.f32 0.5, %v1501_v36 }
 0xc8c   :  { %v1505_v42 = vmul.f32 %v1503_v39, %v2601_v23 }
 0xc8e   :  { %v1509_v44 = vmul.f32 %v1507_v41, %v1505_v42 }
 0xc8f   :  { %v2112_v47 = vpop.eup %2111 }
 0xc90   :  { %1555 = vmatpush.xpose.msrb.mxu1 %v1509_v44  ;;  %1621 = vmatpush.msrb.mxu2 %v1509_v44  ;;  %v1534_v37 = vmul.f32 %v1952_v43, %v1509_v44  ;;  %v1499_v48 = vmul.f32 0.6931472, %v2112_v47 }
 0xc92   :  { %1537 = vadd.xlane.f32.xlu1 %v1534_v37  ;;  %v1502_v46 = vmul.f32 0.5, %v1499_v48 }
 0xc94   :  { %v1504_v38 = vmul.f32 %v1502_v46, %v2607_v35 }
 0xc96   :  { %v1508_v50 = vmul.f32 %v1506_v49, %v1504_v38 }
 0xc98   :  { %1556 = vmatpush.xpose.msrb.mxu1 %v1508_v50  ;;  %1622 = vmatpush.msrb.mxu2 %v1508_v50  ;;  %v1533_v23 = vmul.f32 %v1952_v43, %v1508_v50 }
 0xc9a   :  { %1535 = vadd.xlane.f32.xlu0 %v1533_v23 }
 0xc9b   :  { %1557 = vmatmul.f32.vlgmr.msrb.gmra.mxu1 %v1540_v51 }
 0xd05   :  { %v1538_v20 = vpop.xlane.xlu1 %1537 }
 0xd0d   :  { %v1536_v55 = vpop.xlane.xlu0 %1535 }
 0xd18   :  { %v1558_v52 = vpop.f32.mrf.mxu1 }
 0xd19   :  { %v1561_v53 = vperm.slane %v1558_v52, 0 }
 0xd1b   :  { %v1562_v58 = vadd.f32 %v1561_v53, %v1536_v55  ;;  %v1563_v59 = vadd.f32 %v1561_v53, %v1538_v20 }
 0xd1d   :  { %v1565_v62 = vadd.f32 %v1564_v57, %v1562_v58  ;;  %v1566_v63 = vadd.f32 %v1564_v57, %v1563_v59 }
 0xd1f   :  { %v1937_v35 = vmul.f32 -1.442695, %v1565_v62  ;;  %v1938_v0 = vmul.f32 -1.442695, %v1566_v63 }
 0xd21   :  { %2113 = vpow2.f32 %v1937_v35 }
 0xd22   :  { %2115 = vpow2.f32 %v1938_v0 }
 0xd27   :  { %v2114_v60 = vpop.eup %2113 }
 0xd28   :  { %v2116_v2 = vpop.eup %2115  ;;  %v1573_v3 = vadd.f32 1.0, %v2114_v60 }
 0xd29   :  { %v1574_v4 = vadd.f32 1.0, %v2116_v2 }
 0xd2a   :  { %2117 = vrcp.f32 %v1573_v3  ;;  %v1586_v13 = vand.u32 2147483648, %v1573_v3  ;;  %v1584_v17 = vand.u32 2147483647, %v1573_v3  ;;  %vm1580_vm1 = vweird.f32 %v1573_v3 }
 0xd2b   :  { %2119 = vrcp.f32 %v1574_v4  ;;  %v1601_v5 = vand.u32 2147483648, %v1574_v4  ;;  %vm1595_vm5 = vweird.f32 %v1574_v4  ;;  %v1599_v8 = vand.u32 2147483647, %v1574_v4 }
 0xd2c   :  { %v1587_v25 = vor.u32 1.1754944e-38, %v1586_v13  ;;  %vm1585_vm3 = vcmp.eq.f32.partialorder %v1584_v17, 8.507059e+37 }
 0xd2d   :  { %v1602_v29 = vor.u32 1.1754944e-38, %v1601_v5  ;;  %vm1600_vm8 = vcmp.eq.f32.partialorder %v1599_v8, 8.507059e+37 }
 0xd30   :  { %v2118_v54 = vpop.eup %2117 }
 0xd31   :  { %v2120_v6 = vpop.eup %2119  ;;  %v1576_v9 = vmul.f32 %v2118_v54, %v1573_v3  ;;  %vm1581_vm0 = vweird.f32 %v2118_v54 }
 0xd32   :  { %v1591_v56 = vmul.f32 %v2120_v6, %v1574_v4  ;;  %vm1582_vm2 = vmor %vm1580_vm1, %vm1581_vm0  ;;  %vm1596_vm4 = vweird.f32 %v2120_v6 }
 0xd33   :  { %v1577_v12 = vsub.f32 1.0, %v1576_v9  ;;  %vm1597_vm7 = vmor %vm1595_vm5, %vm1596_vm4 }
 0xd34   :  { %v1592_v61 = vsub.f32 1.0, %v1591_v56 }
 0xd35   :  { %v1578_v16 = vmul.f32 %v2118_v54, %v1577_v12 }
 0xd36   :  { %v1593_v18 = vmul.f32 %v2120_v6, %v1592_v61 }
 0xd37   :  { %v1579_v22 = vadd.f32 %v2118_v54, %v1578_v16 }
 0xd38   :  { %v1594_v7 = vadd.f32 %v2120_v6, %v1593_v18 }
 0xd39   :  { %v1583_v11 = vsel %vm1582_vm2, %v2118_v54, %v1579_v22 }
 0xd3a   :  { %v1588_v1 = vsel %vm1585_vm3, %v1587_v25, %v1583_v11  ;;  %v1598_v10 = vsel %vm1597_vm7, %v2120_v6, %v1594_v7 }
 0xd3b   :  { %v1605_v14 = vmul.f32 %v2161_v26, %v1588_v1  ;;  %v1603_v15 = vsel %vm1600_vm8, %v1602_v29, %v1598_v10 }
 0xd3c   :  { %v1606_v28 = vmul.f32 %v2162_v27, %v1603_v15 }
 0xd3d   :  { %1623 = vmatmul.f32.vlgmr.msrb.gmra.mxu2 %v1605_v14 }
 0xd45   :  { %1626 = vmatmul.f32.gmra.mxu2 %v1606_v28 }
 0xdc0   :  { %v1624_v30 = vpop.f32.mrf.mxu2 }
 0xdc1   :  { %v1630_v31 = vmul.f32 %v1624_v30, %v1624_v30 }
 0xdc3   :  { %1632 = vadd.xlane.f32.xlu2 %v1630_v31 }
 0xdc8   :  { %v1627_v32 = vpop.f32.mrf.mxu2 }
 0xdc9   :  { %v1631_v33 = vmul.f32 %v1627_v32, %v1627_v32 }
 0xdcb   :  { %1634 = vadd.xlane.f32.xlu0 %v1631_v33 }
 0xe36   :  { %v1633_v21 = vpop.xlane.xlu2 %1632 }
 0xe37   :  { %v1636_v36 = vmax.f32 %v1633_v21, 1e-30 }
 0xe39   :  { %2121 = vrsqrt.f32 %v1636_v36  ;;  %vm1644_vm10 = vweird.f32 %v1636_v36 }
 0xe3e   :  { %v1635_v40 = vpop.xlane.xlu0 %1634 }
 0xe3f   :  { %v2122_v39 = vpop.eup %2121  ;;  %v1637_v42 = vmax.f32 %v1635_v40, 1e-30 }
 0xe40   :  { %v1639_v41 = vmul.f32 %v2122_v39, %v1636_v36  ;;  %vm1645_vm9 = vweird.f32 %v2122_v39 }
 0xe41   :  { %2123 = vrsqrt.f32 %v1637_v42  ;;  %vm1646_vm11 = vmor %vm1644_vm10, %vm1645_vm9  ;;  %vm1654_vm13 = vweird.f32 %v1637_v42 }
 0xe42   :  { %v1640_v43 = vmul.f32 %v2122_v39, %v1639_v41 }
 0xe44   :  { %v1641_v44 = vmul.f32 0.5, %v1640_v43 }
 0xe46   :  { %v1642_v47 = vsub.f32 1.5, %v1641_v44 }
 0xe47   :  { %v2124_v37 = vpop.eup %2123 }
 0xe48   :  { %v1643_v48 = vmul.f32 %v2122_v39, %v1642_v47  ;;  %v1649_v46 = vmul.f32 %v2124_v37, %v1637_v42  ;;  %vm1655_vm12 = vweird.f32 %v2124_v37 }
 0xe49   :  { %vm1656_vm6 = vmor %vm1654_vm13, %vm1655_vm12 }
 0xe4a   :  { %v1647_v38 = vsel %vm1646_vm11, %v2122_v39, %v1643_v48  ;;  %v1650_v49 = vmul.f32 %v2124_v37, %v1649_v46 }
 0xe4b   :  { %v1658_v50 = vmul.f32 %v1647_v38, %v1636_v36  ;;  %v1666_v62 = vmul.f32 %v1647_v38, %v2518_v45 }
 0xe4c   :  { %v1651_v23 = vmul.f32 0.5, %v1650_v49 }
 0xe4d   :  { %v1660_v51 = vmul.f32 %v1658_v50, %v2515_v34 }
 0xe4e   :  { %v1652_v52 = vsub.f32 1.5, %v1651_v23 }
 0xe4f   :  { %2125 = vtanh.f32 %v1660_v51 }
 0xe50   :  { %v1653_v53 = vmul.f32 %v2124_v37, %v1652_v52 }
 0xe52   :  { %v1657_v20 = vsel %vm1656_vm6, %v2124_v37, %v1653_v53 }
 0xe53   :  { %v1659_v55 = vmul.f32 %v1657_v20, %v1637_v42  ;;  %v1667_v2 = vmul.f32 %v1657_v20, %v2518_v45 }
 0xe55   :  { %v2126_v57 = vpop.eup %2125  ;;  %v1661_v58 = vmul.f32 %v1659_v55, %v2515_v34 }
 0xe56   :  { %v1664_v59 = vmul.f32 %v2126_v57, %v1624_v30 }
 0xe57   :  { %2127 = vtanh.f32 %v1661_v58 }
 0xe58   :  { %v1668_v63 = vmul.f32 %v1666_v62, %v1664_v59 }
 0xe5a   :  { %v1670_v35 = vmul.f32 %v1668_v63, %v1668_v63 }
 0xe5c   :  { %1672 = vadd.xlane.f32.xlu1 %v1670_v35 }
 0xe5d   :  { %v2128_v0 = vpop.eup %2127 }
 0xe5e   :  { %v1665_v60 = vmul.f32 %v2128_v0, %v1627_v32 }
 0xe60   :  { %v1669_v3 = vmul.f32 %v1667_v2, %v1665_v60 }
 0xe62   :  { %v1671_v4 = vmul.f32 %v1669_v3, %v1669_v3 }
 0xe64   :  { %1674 = vadd.xlane.f32.xlu2 %v1671_v4 }
 0xecf   :  { %v1673_v54 = vpop.xlane.xlu1 %1672 }
 0xed0   :  { %v1676_v6 = vmax.f32 %v1673_v54, 1e-30  ;;  %vm1698_vm1 = vcmp.gt.f32.partialorder %v1673_v54, %v2533_v24 }
 0xed2   :  { %2129 = vrsqrt.f32 %v1676_v6  ;;  %vm1684_vm15 = vweird.f32 %v1676_v6 }
 0xed7   :  { %v1675_v9 = vpop.xlane.xlu2 %1674 }
 0xed8   :  { %v2130_v56 = vpop.eup %2129  ;;  %v1677_v12 = vmax.f32 %v1675_v9, 1e-30  ;;  %vm1699_vm5 = vcmp.gt.f32.partialorder %v1675_v9, %v2533_v24 }
 0xed9   :  { %v1679_v13 = vmul.f32 %v2130_v56, %v1676_v6  ;;  %vm1685_vm14 = vweird.f32 %v2130_v56 }
 0xeda   :  { %2131 = vrsqrt.f32 %v1677_v12  ;;  %vm1686_vm0 = vmor %vm1684_vm15, %vm1685_vm14  ;;  %vm1694_vm3 = vweird.f32 %v1677_v12 }
 0xedb   :  { %v1680_v61 = vmul.f32 %v2130_v56, %v1679_v13 }
 0xedd   :  { %v1681_v16 = vmul.f32 0.5, %v1680_v61 }
 0xedf   :  { %v1682_v17 = vsub.f32 1.5, %v1681_v16 }
 0xee0   :  { %v2132_v18 = vpop.eup %2131 }
 0xee1   :  { %v1683_v22 = vmul.f32 %v2130_v56, %v1682_v17  ;;  %v1689_v25 = vmul.f32 %v2132_v18, %v1677_v12  ;;  %vm1695_vm2 = vweird.f32 %v2132_v18 }
 0xee2   :  { %vm1696_vm4 = vmor %vm1694_vm3, %vm1695_vm2 }
 0xee3   :  { %v1687_v11 = vsel %vm1686_vm0, %v2130_v56, %v1683_v22  ;;  %v1690_v7 = vmul.f32 %v2132_v18, %v1689_v25 }
 0xee4   :  { %v1700_v1 = vmul.f32 %v1687_v11, %v2531_v19 }
 0xee5   :  { %v1691_v5 = vmul.f32 0.5, %v1690_v7 }
 0xee6   :  { %v1702_v26 = vmul.f32 %v1700_v1, %v1668_v63 }
 0xee7   :  { %v1692_v14 = vsub.f32 1.5, %v1691_v5 }
 0xee8   :  { %v2626_v8 = vsel %vm1698_vm1, %v1702_v26, %v1668_v63 }
 0xee9   :  { %v1693_v10 = vmul.f32 %v2132_v18, %v1692_v14  ;;  %v1710_v29 = vmul.f32 %v2626_v8, %v2626_v8 }
 0xeeb   :  { %v1697_v15 = vsel %vm1696_vm4, %v2132_v18, %v1693_v10  ;;  %1712 = vadd.xlane.f32.xlu0 %v1710_v29 }
 0xeec   :  { %v1701_v27 = vmul.f32 %v1697_v15, %v2531_v19 }
 0xeee   :  { %v1703_v28 = vmul.f32 %v1701_v27, %v1669_v3 }
 0xef0   :  { %v2632_v30 = vsel %vm1699_vm5, %v1703_v28, %v1669_v3 }
 0xef1   :  { %v1711_v31 = vmul.f32 %v2632_v30, %v2632_v30 }
 0xef3   :  { %1714 = vadd.xlane.f32.xlu1 %v1711_v31 }
 0xf5e   :  { %v1713_v32 = vpop.xlane.xlu0 %1712 }
 0xf5f   :  { %v1716_v33 = vmax.f32 %v1713_v32, 1e-30 }
 0xf61   :  { %2133 = vrsqrt.f32 %v1716_v33  ;;  %vm1724_vm8 = vweird.f32 %v1716_v33 }
 0xf66   :  { %v1715_v21 = vpop.xlane.xlu1 %1714 }
 0xf67   :  { %v2134_v36 = vpop.eup %2133  ;;  %v1717_v40 = vmax.f32 %v1715_v21, 1e-30 }
 0xf68   :  { %v1719_v39 = vmul.f32 %v2134_v36, %v1716_v33  ;;  %vm1725_vm7 = vweird.f32 %v2134_v36 }
 0xf69   :  { %2135 = vrsqrt.f32 %v1717_v40  ;;  %vm1726_vm9 = vmor %vm1724_vm8, %vm1725_vm7  ;;  %vm1734_vm11 = vweird.f32 %v1717_v40 }
 0xf6a   :  { %v1720_v42 = vmul.f32 %v2134_v36, %v1719_v39 }
 0xf6c   :  { %v1721_v41 = vmul.f32 0.5, %v1720_v42 }
 0xf6e   :  { %v1722_v19 = vsub.f32 1.5, %v1721_v41 }
 0xf6f   :  { %v2136_v43 = vpop.eup %2135 }
 0xf70   :  { %v1723_v24 = vmul.f32 %v2134_v36, %v1722_v19  ;;  %v1729_v44 = vmul.f32 %v2136_v43, %v1717_v40  ;;  %vm1735_vm10 = vweird.f32 %v2136_v43 }
 0xf71   :  { %vm1736_vm12 = vmor %vm1734_vm11, %vm1735_vm10 }
 0xf72   :  { %v1727_v47 = vsel %vm1726_vm9, %v2134_v36, %v1723_v24  ;;  %v1730_v37 = vmul.f32 %v2136_v43, %v1729_v44 }
 0xf73   :  { %v1738_v48 = vmul.f32 %v1727_v47, %v1716_v33  ;;  %v1788_v26 = vmul.f32 %v1727_v47, %v2518_v45 }
 0xf74   :  { %v1731_v46 = vmul.f32 0.5, %v1730_v37 }
 0xf75   :  { %v1740_v38 = vmul.f32 %v1738_v48, %v2515_v34  ;;  %v1824_v48 = vstv %s1926_s1 }
 0xf76   :  { %v1732_v49 = vsub.f32 1.5, %v1731_v46 }
 0xf77   :  { %v1939_v50 = vclamps-f32 %v1740_v38, 0.999999 }
 0xf78   :  { %v1733_v23 = vmul.f32 %v2136_v43, %v1732_v49 }
 0xf79   :  { %v1748_v51 = vsub.f32 1.0, %v1939_v50  ;;  %v1746_v4 = vadd.f32 1.0, %v1939_v50 }
 0xf7a   :  { %v1737_v52 = vsel %vm1736_vm12, %v2136_v43, %v1733_v23 }
 0xf7b   :  { %2137 = vrcp.f32 %v1748_v51  ;;  %v1739_v53 = vmul.f32 %v1737_v52, %v1717_v40  ;;  %v1761_v63 = vand.u32 2147483648, %v1748_v51  ;;  %v1759_v0 = vand.u32 2147483647, %v1748_v51 }
 0xf7c   :  { %vm1755_vm6 = vweird.f32 %v1748_v51  ;;  %v1789_v28 = vmul.f32 %v1737_v52, %v2518_v45 }
 0xf7d   :  { %v1741_v20 = vmul.f32 %v1739_v53, %v2515_v34  ;;  %v1762_v2 = vor.u32 1.1754944e-38, %v1761_v63  ;;  %vm1760_vm15 = vcmp.eq.f32.partialorder %v1759_v0, 8.507059e+37 }
 0xf7f   :  { %v1940_v55 = vclamps-f32 %v1741_v20, 0.999999  ;;  %v1831_v20 = vstv %s1927_s23 }
 0xf81   :  { %v2138_v57 = vpop.eup %2137  ;;  %v1749_v59 = vsub.f32 1.0, %v1940_v55  ;;  %v1747_v18 = vadd.f32 1.0, %v1940_v55 }
 0xf82   :  { %v1751_v58 = vmul.f32 %v2138_v57, %v1748_v51  ;;  %vm1756_vm13 = vweird.f32 %v2138_v57 }
 0xf83   :  { %2139 = vrcp.f32 %v1749_v59  ;;  %vm1757_vm14 = vmor %vm1755_vm6, %vm1756_vm13  ;;  %v1776_v12 = vand.u32 2147483648, %v1749_v59  ;;  %v1774_v61 = vand.u32 2147483647, %v1749_v59  ;;  %vm1770_vm1 = vweird.f32 %v1749_v59 }
 0xf84   :  { %v1752_v62 = vsub.f32 1.0, %v1751_v58 }
 0xf85   :  { %v1777_v17 = vor.u32 1.1754944e-38, %v1776_v12  ;;  %vm1775_vm3 = vcmp.eq.f32.partialorder %v1774_v61, 8.507059e+37 }
 0xf86   :  { %v1753_v35 = vmul.f32 %v2138_v57, %v1752_v62 }
 0xf88   :  { %v1754_v60 = vadd.f32 %v2138_v57, %v1753_v35 }
 0xf89   :  { %v2140_v3 = vpop.eup %2139 }
 0xf8a   :  { %v1758_v54 = vsel %vm1757_vm14, %v2138_v57, %v1754_v60  ;;  %v1766_v34 = vmul.f32 %v2140_v3, %v1749_v59  ;;  %vm1771_vm0 = vweird.f32 %v2140_v3 }
 0xf8b   :  { %v1763_v6 = vsel %vm1760_vm15, %v1762_v2, %v1758_v54  ;;  %vm1772_vm2 = vmor %vm1770_vm1, %vm1771_vm0 }
 0xf8c   :  { %v1764_v9 = vmul.f32 %v1763_v6, %v1746_v4  ;;  %v1767_v56 = vsub.f32 1.0, %v1766_v34 }
 0xf8e   :  { %2141 = vlog2.f32 %v1764_v9  ;;  %v1768_v13 = vmul.f32 %v2140_v3, %v1767_v56 }
 0xf90   :  { %v1769_v16 = vadd.f32 %v2140_v3, %v1768_v13 }
 0xf92   :  { %v1773_v22 = vsel %vm1772_vm2, %v2140_v3, %v1769_v16 }
 0xf93   :  { %v1778_v11 = vsel %vm1775_vm3, %v1777_v17, %v1773_v22 }
 0xf94   :  { %v2142_v25 = vpop.eup %2141  ;;  %v1779_v7 = vmul.f32 %v1778_v11, %v1747_v18  ;;  %v1867_v18 = vstv %s1928_s3 }
 0xf95   :  { %v1781_v1 = vmul.f32 0.6931472, %v2142_v25 }
 0xf96   :  { %2143 = vlog2.f32 %v1779_v7  ;;  %v1864_v7 = vstv %s1929_s24 }
 0xf97   :  { %v1784_v5 = vmul.f32 0.5, %v1781_v1 }
 0xf99   :  { %v1786_v14 = vmul.f32 %v1784_v5, %v2626_v8 }
 0xf9b   :  { %v1790_v10 = vmul.f32 %v1788_v26, %v1786_v14 }
 0xf9c   :  { %v2144_v29 = vpop.eup %2143 }
 0xf9d   :  { %2145 = vtanh.f32 %v1790_v10  ;;  %v1783_v15 = vmul.f32 0.6931472, %v2144_v29 }
 0xf9f   :  { %v1785_v27 = vmul.f32 0.5, %v1783_v15 }
 0xfa1   :  { %v1787_v31 = vmul.f32 %v1785_v27, %v2632_v30 }
 0xfa3   :  { %v2146_v32 = vpop.eup %2145  ;;  %v1791_v21 = vmul.f32 %v1789_v28, %v1787_v31 }
 0xfa4   :  { %v1794_v33 = vmul.f32 %v2146_v32, %v2146_v32 }
 0xfa5   :  { %2147 = vtanh.f32 %v1791_v21 }
 0xfa6   :  { %1796 = vadd.xlane.f32.xlu2 %v1794_v33 }
 0xfab   :  { %v2148_v36 = vpop.eup %2147 }
 0xfac   :  { %v1795_v40 = vmul.f32 %v2148_v36, %v2148_v36 }
 0xfae   :  { %1798 = vadd.xlane.f32.xlu0 %v1795_v40 }
0x1019   :  { %v1797_v39 = vpop.xlane.xlu2 %1796 }
0x101a   :  { %v1800_v42 = vmax.f32 %v1797_v39, 1e-30 }
0x101c   :  { %2149 = vrsqrt.f32 %v1800_v42  ;;  %vm1808_vm5 = vweird.f32 %v1800_v42 }
0x1021   :  { %v1799_v41 = vpop.xlane.xlu0 %1798 }
0x1022   :  { %v2150_v8 = vpop.eup %2149  ;;  %v1801_v43 = vmax.f32 %v1799_v41, 1e-30 }
0x1023   :  { %v1803_v19 = vmul.f32 %v2150_v8, %v1800_v42  ;;  %vm1809_vm4 = vweird.f32 %v2150_v8 }
0x1024   :  { %2151 = vrsqrt.f32 %v1801_v43  ;;  %vm1810_vm7 = vmor %vm1808_vm5, %vm1809_vm4  ;;  %vm1818_vm9 = vweird.f32 %v1801_v43 }
0x1025   :  { %v1804_v24 = vmul.f32 %v2150_v8, %v1803_v19 }
0x1027   :  { %v1805_v45 = vmul.f32 0.5, %v1804_v24 }
0x1029   :  { %v1806_v30 = vsub.f32 1.5, %v1805_v45 }
0x102a   :  { %v2152_v44 = vpop.eup %2151 }
0x102b   :  { %v1807_v47 = vmul.f32 %v2150_v8, %v1806_v30  ;;  %v1813_v37 = vmul.f32 %v2152_v44, %v1801_v43  ;;  %vm1819_vm8 = vweird.f32 %v2152_v44 }
0x102c   :  { %vm1820_vm10 = vmor %vm1818_vm9, %vm1819_vm8 }
0x102d   :  { %v1811_v46 = vsel %vm1810_vm7, %v2150_v8, %v1807_v47  ;;  %v1814_v49 = vmul.f32 %v2152_v44, %v1813_v37 }
0x102e   :  { %v1822_v38 = vmul.f32 %v1811_v46, %v1800_v42  ;;  %v1832_v62 = vmul.f32 %v1831_v20, %v1811_v46 }
0x102f   :  { %v1815_v23 = vmul.f32 0.5, %v1814_v49 }
0x1030   :  { %v1825_v50 = vmul.f32 %v1824_v48, %v1822_v38 }
0x1031   :  { %v1816_v51 = vsub.f32 1.5, %v1815_v23 }
0x1032   :  { %2153 = vtanh.f32 %v1825_v50 }
0x1033   :  { %v1817_v52 = vmul.f32 %v2152_v44, %v1816_v51 }
0x1035   :  { %v1821_v53 = vsel %vm1820_vm10, %v2152_v44, %v1817_v52 }
0x1036   :  { %v1823_v55 = vmul.f32 %v1821_v53, %v1801_v43  ;;  %v1833_v2 = vmul.f32 %v1831_v20, %v1821_v53 }
0x1038   :  { %v2154_v57 = vpop.eup %2153  ;;  %v1826_v58 = vmul.f32 %v1824_v48, %v1823_v55 }
0x1039   :  { %v1829_v59 = vmul.f32 %v2154_v57, %v2146_v32 }
0x103a   :  { %2155 = vtanh.f32 %v1826_v58 }
0x103b   :  { %v1834_v63 = vmul.f32 %v1832_v62, %v1829_v59 }
0x103d   :  { %v1836_v35 = vmul.f32 %v1834_v63, %v1834_v63 }
0x103f   :  { %1838 = vadd.xlane.f32.xlu1 %v1836_v35 }
0x1040   :  { %v2156_v0 = vpop.eup %2155 }
0x1041   :  { %v1830_v60 = vmul.f32 %v2156_v0, %v2148_v36 }
0x1043   :  { %v1835_v3 = vmul.f32 %v1833_v2, %v1830_v60 }
0x1045   :  { %v1837_v4 = vmul.f32 %v1835_v3, %v1835_v3 }
0x1047   :  { %1840 = vadd.xlane.f32.xlu2 %v1837_v4 }
0x10b2   :  { %v1839_v54 = vpop.xlane.xlu1 %1838 }
0x10b3   :  { %v1842_v6 = vmax.f32 %v1839_v54, 1e-30  ;;  %vm1865_vm6 = vcmp.gt.f32.partialorder %v1839_v54, %v1864_v7 }
0x10b5   :  { %2157 = vrsqrt.f32 %v1842_v6  ;;  %vm1850_vm12 = vweird.f32 %v1842_v6 }
0x10ba   :  { %v1841_v9 = vpop.xlane.xlu2 %1840 }
0x10bb   :  { %v2158_v34 = vpop.eup %2157  ;;  %v1843_v12 = vmax.f32 %v1841_v9, 1e-30  ;;  %vm1866_vm1 = vcmp.gt.f32.partialorder %v1841_v9, %v1864_v7 }
0x10bc   :  { %v1845_v56 = vmul.f32 %v2158_v34, %v1842_v6  ;;  %vm1851_vm11 = vweird.f32 %v2158_v34 }
0x10bd   :  { %2159 = vrsqrt.f32 %v1843_v12  ;;  %vm1852_vm13 = vmor %vm1850_vm12, %vm1851_vm11  ;;  %vm1860_vm15 = vweird.f32 %v1843_v12 }
0x10be   :  { %v1846_v13 = vmul.f32 %v2158_v34, %v1845_v56 }
0x10c0   :  { %v1847_v61 = vmul.f32 0.5, %v1846_v13 }
0x10c2   :  { %v1848_v16 = vsub.f32 1.5, %v1847_v61 }
0x10c3   :  { %v2160_v17 = vpop.eup %2159 }
0x10c4   :  { %v1849_v22 = vmul.f32 %v2158_v34, %v1848_v16  ;;  %v1855_v25 = vmul.f32 %v2160_v17, %v1843_v12  ;;  %vm1861_vm14 = vweird.f32 %v2160_v17 }
0x10c5   :  { %vm1862_vm0 = vmor %vm1860_vm15, %vm1861_vm14 }
0x10c6   :  { %v1853_v11 = vsel %vm1852_vm13, %v2158_v34, %v1849_v22  ;;  %v1856_v5 = vmul.f32 %v2160_v17, %v1855_v25 }
0x10c7   :  { %v1868_v1 = vmul.f32 %v1867_v18, %v1853_v11 }
0x10c8   :  { %v1857_v14 = vmul.f32 0.5, %v1856_v5 }
0x10c9   :  { %v1870_v26 = vmul.f32 %v1868_v1, %v1834_v63 }
0x10ca   :  { %v1858_v29 = vsub.f32 1.5, %v1857_v14 }
0x10cb   :  { %v1876_v10 = vsel %vm1865_vm6, %v1870_v26, %v1834_v63 }
0x10cc   :  { %1878 = vst [vmem:[#allocation13] sm:$0xff] %v1876_v10  ;;  %v1859_v15 = vmul.f32 %v2160_v17, %v1858_v29 }
0x10ce   :  { %v1863_v27 = vsel %vm1862_vm0, %v2160_v17, %v1859_v15 }
0x10cf   :  { %v1869_v28 = vmul.f32 %v1867_v18, %v1863_v27 }
0x10d1   :  { %v1871_v31 = vmul.f32 %v1869_v28, %v1835_v3 }
0x10d3   :  { %v1877_v32 = vsel %vm1866_vm1, %v1871_v31, %v1835_v3 }
0x10d4   :  { %1879 = vst [vmem:[#allocation13 + $0x8] sm:$0xff] %v1877_v32 }
0x10d5   :  { %1892 = dma.vmem_to_hbm [thread:$0]  %s1885_s25, 256, %s1887_s28, [#allocation5], %s2306_s9, %s2306_s9, %s2307_s10  }
0x10d6   :  { %2303 = dma.done.wait [#allocation5], 256  }
0x10d7   :  { %2304 = vsyncadd [#allocation5], 4294967040 }
0x10d8   :  { %1897 = vsyncpa [#allocation4], 1 }
0x10d9   :  { %1898 = vsyncpa [#allocation9], 1 }
0x10da   :  { %1899 = vsyncpa [#allocation12], 1 }
0x10db   :  { %1900 = vsyncpa [#allocation5], 1 }
0x10dc   :  { %1901 = vsyncpa [#allocation6], 1 }

</bundles_post_ra>
